<compile_context>
chip_gen: v6e
topology: v6e:2x2x1
jax: 0.10.0
libtpu: 0.0.40
codegen_flags: <defaults>
</compile_context>

<pallas_src>
import functools
import numpy as np
import jax
import jax.numpy as jnp
from jax.experimental import pallas as pl
from jax.experimental.pallas import tpu as pltpu

EPS = 1e-5
NEG_SLOPE = 0.2
LANE = 128


def get_num_groups(num_channels):
    # TODO(synk): `get_num_groups` is not defined in the provided snippet; assume the
    # common "~16 channels per group" heuristic (always divides num_channels evenly).
    for group_size in (16, 8, 4, 2, 1):
        if num_channels % group_size == 0:
            return max(1, num_channels // group_size)
    return 1


def _pad_to_lane(c):
    return ((c + LANE - 1) // LANE) * LANE


# ------------------------------- Pallas kernel -------------------------------

def _row_shift(y, o):
    """shift(y, o)[r] = y[r + o] if 0 <= r + o < rows else 0.  o is a static int."""
    if o == 0:
        return y
    n = y.shape[0]
    z = jnp.zeros((abs(o),) + tuple(y.shape[1:]), y.dtype)
    if o > 0:
        return jnp.concatenate([y[o:], z], axis=0)
    return jnp.concatenate([z, y[: n + o]], axis=0)


def _gn_lrelu(x, m, gamma, beta):
    """GroupNorm + LeakyReLU(0.2) on an (H*W, C_pad) f32 tile.

    m:      (C_pad, C_pad) group-average matrix (1/group_size within a real group, else 0).
    gamma:  (1, C_pad) affine scale (zero on padded lanes).
    beta:   (1, C_pad) affine shift (zero on padded lanes).
    """
    mean_l = jnp.mean(x, axis=0, keepdims=True)          # (1, C_pad)  mean over H*W
    meansq_l = jnp.mean(x * x, axis=0, keepdims=True)    # (1, C_pad)
    g_mean = jnp.dot(mean_l, m, preferred_element_type=jnp.float32)
    g_meansq = jnp.dot(meansq_l, m, preferred_element_type=jnp.float32)
    var = jnp.maximum(g_meansq - g_mean * g_mean, 0.0)   # biased variance (PyTorch GN)
    xn = (x - g_mean) * jax.lax.rsqrt(var + EPS)
    y = xn * gamma + beta
    return jnp.where(y >= 0, y, NEG_SLOPE * y)


def conv_block_kernel(x_ref, masks_ref,
                      m0_ref, g0_ref, b0_ref, w0_ref,     # GN(Cin) + conv1x1 Cin->F0
                      m1_ref, g1_ref, b1_ref, w1_ref,     # GN(F0)  + conv3x3 F0->F1
                      m2_ref, g2_ref, b2_ref, w2_ref,     # GN(F1)  + conv1x1 F1->Cin
                      o_ref, *, width):
    x = x_ref[0]                                          # (H*W, Cp_in) f32

    # --- stage 0: GN -> LeakyReLU -> 1x1 conv (plain matmul, bf16 x bf16 -> f32) ---
    a0 = _gn_lrelu(x, m0_ref[...], g0_ref[...], b0_ref[...])
    h0 = jnp.dot(a0.astype(jnp.bfloat16), w0_ref[...],
                 preferred_element_type=jnp.float32)      # (H*W, Cp_f0)

    # --- stage 1: GN -> LeakyReLU -> 3x3 conv (9 shifted matmuls, sublane shifts) ---
    a1 = _gn_lrelu(h0, m1_ref[...], g1_ref[...], b1_ref[...])
    mask_m = masks_ref[:, 0:1]                            # (H*W, 1): 1.0 where w != 0
    mask_p = masks_ref[:, 1:2]                            # (H*W, 1): 1.0 where w != W-1
    cs = (
        (_row_shift(a1, -1) * mask_m).astype(jnp.bfloat16),   # dx = -1
        a1.astype(jnp.bfloat16),                               # dx =  0
        (_row_shift(a1, +1) * mask_p).astype(jnp.bfloat16),   # dx = +1
    )

    def dy_term(dy):
        s = None
        for dx in (-1, 0, 1):
            t = jnp.dot(cs[dx + 1], w1_ref[dy + 1, dx + 1],
                        preferred_element_type=jnp.float32)
            s = t if s is None else s + t
        return s                                           # (H*W, Cp_f1) f32

    h1 = dy_term(0)                                        # dy = 0: no row shift needed
    h1 = h1 + _row_shift(dy_term(-1), -width)              # dy = -1: rows shift by -W
    h1 = h1 + _row_shift(dy_term(+1), +width)              # dy = +1: rows shift by +W

    # --- stage 2: GN -> LeakyReLU -> 1x1 conv back to Cin ---
    a2 = _gn_lrelu(h1, m2_ref[...], g2_ref[...], b2_ref[...])
    o_ref[0] = jnp.dot(a2.astype(jnp.bfloat16), w2_ref[...],
                       preferred_element_type=jnp.float32)


# ------------------------------ glue: operands -------------------------------

def build_kernel_operands(params, H, W):
    """Rearrange PyTorch-layout parameters into the small operands the kernel consumes."""
    conv_ws, gammas, betas = params
    HW = H * W

    # w-boundary masks for the 3x3 conv, in flattened row space r = h*W + w.
    wcol = np.arange(HW) % W
    masks = np.stack([(wcol != 0), (wcol != W - 1)], axis=1).astype(np.float32)  # (HW, 2)
    ops = [jnp.asarray(masks)]

    for i in range(3):
        gamma = np.asarray(gammas[i], np.float32)
        beta = np.asarray(betas[i], np.float32)
        w = np.asarray(conv_ws[i], np.float32)
        cin, cout = gamma.shape[0], w.shape[0]
        cin_p, cout_p = _pad_to_lane(cin), _pad_to_lane(cout)

        G = get_num_groups(cin)
        cg = cin // G
        grp = np.arange(cin) // cg
        m = np.zeros((cin_p, cin_p), np.float32)
        m[:cin, :cin] = (grp[:, None] == grp[None, :]).astype(np.float32) / float(cg)

        gpad = np.zeros((1, cin_p), np.float32)
        gpad[0, :cin] = gamma
        bpad = np.zeros((1, cin_p), np.float32)
        bpad[0, :cin] = beta

        if w.shape[2] == 1:                               # 1x1 conv: (Cout, Cin, 1, 1)
            wm = np.zeros((cin_p, cout_p), np.float32)
            wm[:cin, :cout] = np.transpose(w[:, :, 0, 0], (1, 0))
        else:                                             # 3x3 conv: (Cout, Cin, 3, 3)
            wm = np.zeros((3, 3, cin_p, cout_p), np.float32)
            wm[:, :, :cin, :cout] = np.transpose(w, (2, 3, 1, 0))   # (ky, kx, Cin, Cout)

        ops += [jnp.asarray(m), jnp.asarray(gpad), jnp.asarray(bpad),
                jnp.asarray(wm, dtype=jnp.bfloat16)]
    return ops


def conv_block_forward(x_nchw, operands):
    B, C, H, W = x_nchw.shape
    HW = H * W
    Cp = _pad_to_lane(C)

    x_l = jnp.transpose(x_nchw, (0, 2, 3, 1)).reshape(B, HW, C)
    x_l = jnp.pad(x_l, ((0, 0), (0, 0), (0, Cp - C)))

    in_specs = [pl.BlockSpec((1, HW, Cp), lambda b: (b, 0, 0))]
    for op in operands:
        in_specs.append(pl.BlockSpec(op.shape, lambda b, _n=op.ndim: (0,) * _n))

    out_l = pl.pallas_call(
        functools.partial(conv_block_kernel, width=W),
        out_shape=jax.ShapeDtypeStruct((B, HW, Cp), jnp.float32),
        grid=(B,),
        in_specs=in_specs,
        out_specs=pl.BlockSpec((1, HW, Cp), lambda b: (b, 0, 0)),
        compiler_params=pltpu.CompilerParams(dimension_semantics=("parallel",)),
    )(x_l, *operands)

    out = out_l[:, :, :C].reshape(B, H, W, C)
    return jnp.transpose(out, (0, 3, 1, 2))


# ------------------------------ params & reference ---------------------------

def init_params(key, in_channels, num_filters):
    chans_in = [in_channels] + list(num_filters)
    chans_out = list(num_filters) + [in_channels]
    ksizes = [1, 3, 1]
    conv_ws, gammas, betas = [], [], []
    keys = jax.random.split(key, 9)
    for i in range(3):
        cin, cout, k = chans_in[i], chans_out[i], ksizes[i]
        fan_in = cin * k * k
        conv_ws.append(jax.random.normal(keys[3 * i], (cout, cin, k, k), jnp.float32)
                       / np.sqrt(fan_in))
        gammas.append(1.0 + 0.1 * jax.random.normal(keys[3 * i + 1], (cin,), jnp.float32))
        betas.append(0.1 * jax.random.normal(keys[3 * i + 2], (cin,), jnp.float32))
    return conv_ws, gammas, betas


def _group_norm_ref(x, gamma, beta, G, eps=EPS):
    B, C, H, W = x.shape
    xg = x.reshape(B, G, C // G, H, W)
    mean = xg.mean(axis=(2, 3, 4), keepdims=True)
    var = ((xg - mean) ** 2).mean(axis=(2, 3, 4), keepdims=True)
    xn = ((xg - mean) * jax.lax.rsqrt(var + eps)).reshape(B, C, H, W)
    return xn * gamma[None, :, None, None] + beta[None, :, None, None]


def ref_forward(x, params):
    conv_ws, gammas, betas = params
    pads = [0, 1, 0]
    h = x
    for i in range(3):
        C = h.shape[1]
        h = _group_norm_ref(h, gammas[i], betas[i], get_num_groups(C))
        h = jnp.where(h >= 0, h, NEG_SLOPE * h)
        h = jax.lax.conv_general_dilated(
            h, conv_ws[i], window_strides=(1, 1),
            padding=[(pads[i], pads[i])] * 2,
            dimension_numbers=("NCHW", "OIHW", "NCHW"),
            precision=jax.lax.Precision.HIGHEST)
    return h


# ----------------------------------- main -------------------------------------

if __name__ == "__main__":
    key = jax.random.PRNGKey(0)
    k_x, k_p = jax.random.split(key)

    B, C, H, W = 2, 32, 16, 16          # NCHW, matches PyTorch _ConvBlock input
    num_filters = [16, 16]              # -> convs: 1x1 (32->16), 3x3 (16->16), 1x1 (16->32)

    x = jax.random.normal(k_x, (B, C, H, W), jnp.float32)
    params = init_params(k_p, C, num_filters)
    operands = build_kernel_operands(params, H, W)

    out = conv_block_forward(x, operands)
    out = jax.block_until_ready(out)

    ref = ref_forward(x, params)
    # Conv matmuls run in bf16 (f32 accumulation); tolerance reflects bf16 inputs.
    np.testing.assert_allclose(np.asarray(out), np.asarray(ref), rtol=5e-2, atol=5e-2)

    print("KERNEL_OK")
</pallas_src>

<mosaic_0001>
module attributes {stable_mosaic.version = 11 : i64} {
  func.func @conv_block_kernel(%arg0: i32, %arg1: memref<1x256x128xf32, #tpu.memory_space<vmem>>, %arg2: memref<256x2xf32, #tpu.memory_space<vmem>>, %arg3: memref<128x128xf32, #tpu.memory_space<vmem>>, %arg4: memref<1x128xf32, #tpu.memory_space<vmem>>, %arg5: memref<1x128xf32, #tpu.memory_space<vmem>>, %arg6: memref<128x128xbf16, #tpu.memory_space<vmem>>, %arg7: memref<128x128xf32, #tpu.memory_space<vmem>>, %arg8: memref<1x128xf32, #tpu.memory_space<vmem>>, %arg9: memref<1x128xf32, #tpu.memory_space<vmem>>, %arg10: memref<3x3x128x128xbf16, #tpu.memory_space<vmem>>, %arg11: memref<128x128xf32, #tpu.memory_space<vmem>>, %arg12: memref<1x128xf32, #tpu.memory_space<vmem>>, %arg13: memref<1x128xf32, #tpu.memory_space<vmem>>, %arg14: memref<128x128xbf16, #tpu.memory_space<vmem>>, %arg15: memref<1x256x128xf32, #tpu.memory_space<vmem>>) attributes {dimension_semantics = [#tpu.dimension_semantics<parallel>], iteration_bounds = array<i64: 2>, scalar_prefetch = 0 : i64, scratch_operands = 0 : i64, tpu.core_type = #tpu.core_type<tc>, window_params = [{transform_indices = @transform_0, window_bounds = array<i64: 1, 256, 128>}, {pipeline_mode = #tpu.pipeline_mode<synchronous>, transform_indices = @transform_1, window_bounds = array<i64: 256, 2>}, {pipeline_mode = #tpu.pipeline_mode<synchronous>, transform_indices = @transform_2, window_bounds = array<i64: 128, 128>}, {pipeline_mode = #tpu.pipeline_mode<synchronous>, transform_indices = @transform_3, window_bounds = array<i64: 1, 128>}, {pipeline_mode = #tpu.pipeline_mode<synchronous>, transform_indices = @transform_4, window_bounds = array<i64: 1, 128>}, {pipeline_mode = #tpu.pipeline_mode<synchronous>, transform_indices = @transform_5, window_bounds = array<i64: 128, 128>}, {pipeline_mode = #tpu.pipeline_mode<synchronous>, transform_indices = @transform_6, window_bounds = array<i64: 128, 128>}, {pipeline_mode = #tpu.pipeline_mode<synchronous>, transform_indices = @transform_7, window_bounds = array<i64: 1, 128>}, {pipeline_mode = #tpu.pipeline_mode<synchronous>, transform_indices = @transform_8, window_bounds = array<i64: 1, 128>}, {pipeline_mode = #tpu.pipeline_mode<synchronous>, transform_indices = @transform_9, window_bounds = array<i64: 3, 3, 128, 128>}, {pipeline_mode = #tpu.pipeline_mode<synchronous>, transform_indices = @transform_10, window_bounds = array<i64: 128, 128>}, {pipeline_mode = #tpu.pipeline_mode<synchronous>, transform_indices = @transform_11, window_bounds = array<i64: 1, 128>}, {pipeline_mode = #tpu.pipeline_mode<synchronous>, transform_indices = @transform_12, window_bounds = array<i64: 1, 128>}, {pipeline_mode = #tpu.pipeline_mode<synchronous>, transform_indices = @transform_13, window_bounds = array<i64: 128, 128>}, {transform_indices = @transform_14, window_bounds = array<i64: 1, 256, 128>}]} {
    %c0 = arith.constant 0 : index
    %c0_0 = arith.constant 0 : index
    %c0_1 = arith.constant 0 : index
    %0 = vector.load %arg1[%c0, %c0_0, %c0_1] : memref<1x256x128xf32, #tpu.memory_space<vmem>>, vector<1x256x128xf32>
    %1 = vector.shape_cast %0 : vector<1x256x128xf32> to vector<256x128xf32>
    %c0_2 = arith.constant 0 : index
    %c0_3 = arith.constant 0 : index
    %2 = vector.load %arg3[%c0_2, %c0_3] : memref<128x128xf32, #tpu.memory_space<vmem>>, vector<128x128xf32>
    %c0_4 = arith.constant 0 : index
    %c0_5 = arith.constant 0 : index
    %3 = vector.load %arg4[%c0_4, %c0_5] : memref<1x128xf32, #tpu.memory_space<vmem>>, vector<1x128xf32>
    %c0_6 = arith.constant 0 : index
    %c0_7 = arith.constant 0 : index
    %4 = vector.load %arg5[%c0_6, %c0_7] : memref<1x128xf32, #tpu.memory_space<vmem>>, vector<1x128xf32>
    %cst = arith.constant dense<0.000000e+00> : vector<128xf32>
    %5 = vector.multi_reduction <add>, %1, %cst [0] : vector<256x128xf32> to vector<128xf32>
    %6 = vector.shape_cast %5 : vector<128xf32> to vector<1x128xf32>
    %cst_8 = arith.constant 2.560000e+02 : f32
    %7 = vector.broadcast %cst_8 : f32 to vector<1x128xf32>
    %8 = arith.divf %6, %7 : vector<1x128xf32>
    %9 = arith.mulf %1, %1 : vector<256x128xf32>
    %cst_9 = arith.constant dense<0.000000e+00> : vector<128xf32>
    %10 = vector.multi_reduction <add>, %9, %cst_9 [0] : vector<256x128xf32> to vector<128xf32>
    %11 = vector.shape_cast %10 : vector<128xf32> to vector<1x128xf32>
    %cst_10 = arith.constant 2.560000e+02 : f32
    %12 = vector.broadcast %cst_10 : f32 to vector<1x128xf32>
    %13 = arith.divf %11, %12 : vector<1x128xf32>
    %cst_11 = arith.constant dense<0.000000e+00> : vector<1x128xf32>
    %14 = tpu.matmul %8, %2, %cst_11 {dimension_numbers = #tpu.dot_dimension_numbers<[1], [0], [0], [1], [0, 0, 1, 1], [], []>} : vector<1x128xf32>, vector<128x128xf32>, vector<1x128xf32> -> vector<1x128xf32>
    %cst_12 = arith.constant dense<0.000000e+00> : vector<1x128xf32>
    %15 = tpu.matmul %13, %2, %cst_12 {dimension_numbers = #tpu.dot_dimension_numbers<[1], [0], [0], [1], [0, 0, 1, 1], [], []>} : vector<1x128xf32>, vector<128x128xf32>, vector<1x128xf32> -> vector<1x128xf32>
    %16 = arith.mulf %14, %14 : vector<1x128xf32>
    %17 = arith.subf %15, %16 : vector<1x128xf32>
    %cst_13 = arith.constant 0.000000e+00 : f32
    %18 = vector.broadcast %cst_13 : f32 to vector<1x128xf32>
    %19 = arith.maximumf %17, %18 : vector<1x128xf32>
    %20 = vector.broadcast %14 : vector<1x128xf32> to vector<256x128xf32>
    %21 = arith.subf %1, %20 : vector<256x128xf32>
    %cst_14 = arith.constant 9.99999974E-6 : f32
    %22 = vector.broadcast %cst_14 : f32 to vector<1x128xf32>
    %23 = arith.addf %19, %22 : vector<1x128xf32>
    %24 = math.rsqrt %23 : vector<1x128xf32>
    %25 = vector.broadcast %24 : vector<1x128xf32> to vector<256x128xf32>
    %26 = arith.mulf %21, %25 : vector<256x128xf32>
    %27 = vector.broadcast %3 : vector<1x128xf32> to vector<256x128xf32>
    %28 = arith.mulf %26, %27 : vector<256x128xf32>
    %29 = vector.broadcast %4 : vector<1x128xf32> to vector<256x128xf32>
    %30 = arith.addf %28, %29 : vector<256x128xf32>
    %cst_15 = arith.constant 0.000000e+00 : f32
    %31 = vector.broadcast %cst_15 : f32 to vector<256x128xf32>
    %32 = arith.cmpf oge, %30, %31 : vector<256x128xf32>
    %cst_16 = arith.constant 2.000000e-01 : f32
    %33 = vector.broadcast %cst_16 : f32 to vector<256x128xf32>
    %34 = arith.mulf %33, %30 : vector<256x128xf32>
    %35 = arith.select %32, %30, %34 : vector<256x128xi1>, vector<256x128xf32>
    %36 = arith.truncf %35 : vector<256x128xf32> to vector<256x128xbf16>
    %c0_17 = arith.constant 0 : index
    %c0_18 = arith.constant 0 : index
    %37 = vector.load %arg6[%c0_17, %c0_18] : memref<128x128xbf16, #tpu.memory_space<vmem>>, vector<128x128xbf16>
    %cst_19 = arith.constant dense<0.000000e+00> : vector<256x128xf32>
    %38 = tpu.matmul %36, %37, %cst_19 {dimension_numbers = #tpu.dot_dimension_numbers<[1], [0], [0], [1], [0, 0, 1, 1], [], []>} : vector<256x128xbf16>, vector<128x128xbf16>, vector<256x128xf32> -> vector<256x128xf32>
    %c0_20 = arith.constant 0 : index
    %c0_21 = arith.constant 0 : index
    %39 = vector.load %arg7[%c0_20, %c0_21] : memref<128x128xf32, #tpu.memory_space<vmem>>, vector<128x128xf32>
    %c0_22 = arith.constant 0 : index
    %c0_23 = arith.constant 0 : index
    %40 = vector.load %arg8[%c0_22, %c0_23] : memref<1x128xf32, #tpu.memory_space<vmem>>, vector<1x128xf32>
    %c0_24 = arith.constant 0 : index
    %c0_25 = arith.constant 0 : index
    %41 = vector.load %arg9[%c0_24, %c0_25] : memref<1x128xf32, #tpu.memory_space<vmem>>, vector<1x128xf32>
    %cst_26 = arith.constant dense<0.000000e+00> : vector<128xf32>
    %42 = vector.multi_reduction <add>, %38, %cst_26 [0] : vector<256x128xf32> to vector<128xf32>
    %43 = vector.shape_cast %42 : vector<128xf32> to vector<1x128xf32>
    %cst_27 = arith.constant 2.560000e+02 : f32
    %44 = vector.broadcast %cst_27 : f32 to vector<1x128xf32>
    %45 = arith.divf %43, %44 : vector<1x128xf32>
    %46 = arith.mulf %38, %38 : vector<256x128xf32>
    %cst_28 = arith.constant dense<0.000000e+00> : vector<128xf32>
    %47 = vector.multi_reduction <add>, %46, %cst_28 [0] : vector<256x128xf32> to vector<128xf32>
    %48 = vector.shape_cast %47 : vector<128xf32> to vector<1x128xf32>
    %cst_29 = arith.constant 2.560000e+02 : f32
    %49 = vector.broadcast %cst_29 : f32 to vector<1x128xf32>
    %50 = arith.divf %48, %49 : vector<1x128xf32>
    %cst_30 = arith.constant dense<0.000000e+00> : vector<1x128xf32>
    %51 = tpu.matmul %45, %39, %cst_30 {dimension_numbers = #tpu.dot_dimension_numbers<[1], [0], [0], [1], [0, 0, 1, 1], [], []>} : vector<1x128xf32>, vector<128x128xf32>, vector<1x128xf32> -> vector<1x128xf32>
    %cst_31 = arith.constant dense<0.000000e+00> : vector<1x128xf32>
    %52 = tpu.matmul %50, %39, %cst_31 {dimension_numbers = #tpu.dot_dimension_numbers<[1], [0], [0], [1], [0, 0, 1, 1], [], []>} : vector<1x128xf32>, vector<128x128xf32>, vector<1x128xf32> -> vector<1x128xf32>
    %53 = arith.mulf %51, %51 : vector<1x128xf32>
    %54 = arith.subf %52, %53 : vector<1x128xf32>
    %cst_32 = arith.constant 0.000000e+00 : f32
    %55 = vector.broadcast %cst_32 : f32 to vector<1x128xf32>
    %56 = arith.maximumf %54, %55 : vector<1x128xf32>
    %57 = vector.broadcast %51 : vector<1x128xf32> to vector<256x128xf32>
    %58 = arith.subf %38, %57 : vector<256x128xf32>
    %cst_33 = arith.constant 9.99999974E-6 : f32
    %59 = vector.broadcast %cst_33 : f32 to vector<1x128xf32>
    %60 = arith.addf %56, %59 : vector<1x128xf32>
    %61 = math.rsqrt %60 : vector<1x128xf32>
    %62 = vector.broadcast %61 : vector<1x128xf32> to vector<256x128xf32>
    %63 = arith.mulf %58, %62 : vector<256x128xf32>
    %64 = vector.broadcast %40 : vector<1x128xf32> to vector<256x128xf32>
    %65 = arith.mulf %63, %64 : vector<256x128xf32>
    %66 = vector.broadcast %41 : vector<1x128xf32> to vector<256x128xf32>
    %67 = arith.addf %65, %66 : vector<256x128xf32>
    %cst_34 = arith.constant 0.000000e+00 : f32
    %68 = vector.broadcast %cst_34 : f32 to vector<256x128xf32>
    %69 = arith.cmpf oge, %67, %68 : vector<256x128xf32>
    %cst_35 = arith.constant 2.000000e-01 : f32
    %70 = vector.broadcast %cst_35 : f32 to vector<256x128xf32>
    %71 = arith.mulf %70, %67 : vector<256x128xf32>
    %72 = arith.select %69, %67, %71 : vector<256x128xi1>, vector<256x128xf32>
    %c0_36 = arith.constant 0 : index
    %c0_37 = arith.constant 0 : index
    %73 = vector.load %arg2[%c0_36, %c0_37] : memref<256x2xf32, #tpu.memory_space<vmem>>, vector<256x1xf32>
    %c0_38 = arith.constant 0 : index
    %c1 = arith.constant 1 : index
    %74 = vector.load %arg2[%c0_38, %c1] : memref<256x2xf32, #tpu.memory_space<vmem>>, vector<256x1xf32>
    %cst_39 = arith.constant 0.000000e+00 : f32
    %75 = vector.broadcast %cst_39 : f32 to vector<1x128xf32>
    %76 = vector.extract_strided_slice %72 {offsets = [0, 0], sizes = [255, 128], strides = [1, 1]} : vector<256x128xf32> to vector<255x128xf32>
    %77 = tpu.concatenate %75, %76 in 0 : vector<1x128xf32>, vector<255x128xf32> -> vector<256x128xf32>
    %78 = vector.broadcast %73 : vector<256x1xf32> to vector<256x128xf32>
    %79 = arith.mulf %77, %78 : vector<256x128xf32>
    %80 = arith.truncf %79 : vector<256x128xf32> to vector<256x128xbf16>
    %81 = arith.truncf %72 : vector<256x128xf32> to vector<256x128xbf16>
    %cst_40 = arith.constant 0.000000e+00 : f32
    %82 = vector.broadcast %cst_40 : f32 to vector<1x128xf32>
    %83 = vector.extract_strided_slice %72 {offsets = [1, 0], sizes = [255, 128], strides = [1, 1]} : vector<256x128xf32> to vector<255x128xf32>
    %84 = tpu.concatenate %83, %82 in 0 : vector<255x128xf32>, vector<1x128xf32> -> vector<256x128xf32>
    %85 = vector.broadcast %74 : vector<256x1xf32> to vector<256x128xf32>
    %86 = arith.mulf %84, %85 : vector<256x128xf32>
    %87 = arith.truncf %86 : vector<256x128xf32> to vector<256x128xbf16>
    %c1_41 = arith.constant 1 : index
    %c0_42 = arith.constant 0 : index
    %c0_43 = arith.constant 0 : index
    %c0_44 = arith.constant 0 : index
    %88 = vector.load %arg10[%c1_41, %c0_42, %c0_43, %c0_44] : memref<3x3x128x128xbf16, #tpu.memory_space<vmem>>, vector<1x1x128x128xbf16>
    %89 = vector.shape_cast %88 : vector<1x1x128x128xbf16> to vector<128x128xbf16>
    %cst_45 = arith.constant dense<0.000000e+00> : vector<256x128xf32>
    %90 = tpu.matmul %80, %89, %cst_45 {dimension_numbers = #tpu.dot_dimension_numbers<[1], [0], [0], [1], [0, 0, 1, 1], [], []>} : vector<256x128xbf16>, vector<128x128xbf16>, vector<256x128xf32> -> vector<256x128xf32>
    %c1_46 = arith.constant 1 : index
    %c1_47 = arith.constant 1 : index
    %c0_48 = arith.constant 0 : index
    %c0_49 = arith.constant 0 : index
    %91 = vector.load %arg10[%c1_46, %c1_47, %c0_48, %c0_49] : memref<3x3x128x128xbf16, #tpu.memory_space<vmem>>, vector<1x1x128x128xbf16>
    %92 = vector.shape_cast %91 : vector<1x1x128x128xbf16> to vector<128x128xbf16>
    %cst_50 = arith.constant dense<0.000000e+00> : vector<256x128xf32>
    %93 = tpu.matmul %81, %92, %cst_50 {dimension_numbers = #tpu.dot_dimension_numbers<[1], [0], [0], [1], [0, 0, 1, 1], [], []>} : vector<256x128xbf16>, vector<128x128xbf16>, vector<256x128xf32> -> vector<256x128xf32>
    %94 = arith.addf %90, %93 : vector<256x128xf32>
    %c1_51 = arith.constant 1 : index
    %c2 = arith.constant 2 : index
    %c0_52 = arith.constant 0 : index
    %c0_53 = arith.constant 0 : index
    %95 = vector.load %arg10[%c1_51, %c2, %c0_52, %c0_53] : memref<3x3x128x128xbf16, #tpu.memory_space<vmem>>, vector<1x1x128x128xbf16>
    %96 = vector.shape_cast %95 : vector<1x1x128x128xbf16> to vector<128x128xbf16>
    %cst_54 = arith.constant dense<0.000000e+00> : vector<256x128xf32>
    %97 = tpu.matmul %87, %96, %cst_54 {dimension_numbers = #tpu.dot_dimension_numbers<[1], [0], [0], [1], [0, 0, 1, 1], [], []>} : vector<256x128xbf16>, vector<128x128xbf16>, vector<256x128xf32> -> vector<256x128xf32>
    %98 = arith.addf %94, %97 : vector<256x128xf32>
    %c0_55 = arith.constant 0 : index
    %c0_56 = arith.constant 0 : index
    %c0_57 = arith.constant 0 : index
    %c0_58 = arith.constant 0 : index
    %99 = vector.load %arg10[%c0_55, %c0_56, %c0_57, %c0_58] : memref<3x3x128x128xbf16, #tpu.memory_space<vmem>>, vector<1x1x128x128xbf16>
    %100 = vector.shape_cast %99 : vector<1x1x128x128xbf16> to vector<128x128xbf16>
    %cst_59 = arith.constant dense<0.000000e+00> : vector<256x128xf32>
    %101 = tpu.matmul %80, %100, %cst_59 {dimension_numbers = #tpu.dot_dimension_numbers<[1], [0], [0], [1], [0, 0, 1, 1], [], []>} : vector<256x128xbf16>, vector<128x128xbf16>, vector<256x128xf32> -> vector<256x128xf32>
    %c0_60 = arith.constant 0 : index
    %c1_61 = arith.constant 1 : index
    %c0_62 = arith.constant 0 : index
    %c0_63 = arith.constant 0 : index
    %102 = vector.load %arg10[%c0_60, %c1_61, %c0_62, %c0_63] : memref<3x3x128x128xbf16, #tpu.memory_space<vmem>>, vector<1x1x128x128xbf16>
    %103 = vector.shape_cast %102 : vector<1x1x128x128xbf16> to vector<128x128xbf16>
    %cst_64 = arith.constant dense<0.000000e+00> : vector<256x128xf32>
    %104 = tpu.matmul %81, %103, %cst_64 {dimension_numbers = #tpu.dot_dimension_numbers<[1], [0], [0], [1], [0, 0, 1, 1], [], []>} : vector<256x128xbf16>, vector<128x128xbf16>, vector<256x128xf32> -> vector<256x128xf32>
    %105 = arith.addf %101, %104 : vector<256x128xf32>
    %c0_65 = arith.constant 0 : index
    %c2_66 = arith.constant 2 : index
    %c0_67 = arith.constant 0 : index
    %c0_68 = arith.constant 0 : index
    %106 = vector.load %arg10[%c0_65, %c2_66, %c0_67, %c0_68] : memref<3x3x128x128xbf16, #tpu.memory_space<vmem>>, vector<1x1x128x128xbf16>
    %107 = vector.shape_cast %106 : vector<1x1x128x128xbf16> to vector<128x128xbf16>
    %cst_69 = arith.constant dense<0.000000e+00> : vector<256x128xf32>
    %108 = tpu.matmul %87, %107, %cst_69 {dimension_numbers = #tpu.dot_dimension_numbers<[1], [0], [0], [1], [0, 0, 1, 1], [], []>} : vector<256x128xbf16>, vector<128x128xbf16>, vector<256x128xf32> -> vector<256x128xf32>
    %109 = arith.addf %105, %108 : vector<256x128xf32>
    %cst_70 = arith.constant 0.000000e+00 : f32
    %110 = vector.broadcast %cst_70 : f32 to vector<16x128xf32>
    %111 = vector.extract_strided_slice %109 {offsets = [0, 0], sizes = [240, 128], strides = [1, 1]} : vector<256x128xf32> to vector<240x128xf32>
    %112 = tpu.concatenate %110, %111 in 0 : vector<16x128xf32>, vector<240x128xf32> -> vector<256x128xf32>
    %113 = arith.addf %98, %112 : vector<256x128xf32>
    %c2_71 = arith.constant 2 : index
    %c0_72 = arith.constant 0 : index
    %c0_73 = arith.constant 0 : index
    %c0_74 = arith.constant 0 : index
    %114 = vector.load %arg10[%c2_71, %c0_72, %c0_73, %c0_74] : memref<3x3x128x128xbf16, #tpu.memory_space<vmem>>, vector<1x1x128x128xbf16>
    %115 = vector.shape_cast %114 : vector<1x1x128x128xbf16> to vector<128x128xbf16>
    %cst_75 = arith.constant dense<0.000000e+00> : vector<256x128xf32>
    %116 = tpu.matmul %80, %115, %cst_75 {dimension_numbers = #tpu.dot_dimension_numbers<[1], [0], [0], [1], [0, 0, 1, 1], [], []>} : vector<256x128xbf16>, vector<128x128xbf16>, vector<256x128xf32> -> vector<256x128xf32>
    %c2_76 = arith.constant 2 : index
    %c1_77 = arith.constant 1 : index
    %c0_78 = arith.constant 0 : index
    %c0_79 = arith.constant 0 : index
    %117 = vector.load %arg10[%c2_76, %c1_77, %c0_78, %c0_79] : memref<3x3x128x128xbf16, #tpu.memory_space<vmem>>, vector<1x1x128x128xbf16>
    %118 = vector.shape_cast %117 : vector<1x1x128x128xbf16> to vector<128x128xbf16>
    %cst_80 = arith.constant dense<0.000000e+00> : vector<256x128xf32>
    %119 = tpu.matmul %81, %118, %cst_80 {dimension_numbers = #tpu.dot_dimension_numbers<[1], [0], [0], [1], [0, 0, 1, 1], [], []>} : vector<256x128xbf16>, vector<128x128xbf16>, vector<256x128xf32> -> vector<256x128xf32>
    %120 = arith.addf %116, %119 : vector<256x128xf32>
    %c2_81 = arith.constant 2 : index
    %c2_82 = arith.constant 2 : index
    %c0_83 = arith.constant 0 : index
    %c0_84 = arith.constant 0 : index
    %121 = vector.load %arg10[%c2_81, %c2_82, %c0_83, %c0_84] : memref<3x3x128x128xbf16, #tpu.memory_space<vmem>>, vector<1x1x128x128xbf16>
    %122 = vector.shape_cast %121 : vector<1x1x128x128xbf16> to vector<128x128xbf16>
    %cst_85 = arith.constant dense<0.000000e+00> : vector<256x128xf32>
    %123 = tpu.matmul %87, %122, %cst_85 {dimension_numbers = #tpu.dot_dimension_numbers<[1], [0], [0], [1], [0, 0, 1, 1], [], []>} : vector<256x128xbf16>, vector<128x128xbf16>, vector<256x128xf32> -> vector<256x128xf32>
    %124 = arith.addf %120, %123 : vector<256x128xf32>
    %cst_86 = arith.constant 0.000000e+00 : f32
    %125 = vector.broadcast %cst_86 : f32 to vector<16x128xf32>
    %126 = vector.extract_strided_slice %124 {offsets = [16, 0], sizes = [240, 128], strides = [1, 1]} : vector<256x128xf32> to vector<240x128xf32>
    %127 = tpu.concatenate %126, %125 in 0 : vector<240x128xf32>, vector<16x128xf32> -> vector<256x128xf32>
    %128 = arith.addf %113, %127 : vector<256x128xf32>
    %c0_87 = arith.constant 0 : index
    %c0_88 = arith.constant 0 : index
    %129 = vector.load %arg11[%c0_87, %c0_88] : memref<128x128xf32, #tpu.memory_space<vmem>>, vector<128x128xf32>
    %c0_89 = arith.constant 0 : index
    %c0_90 = arith.constant 0 : index
    %130 = vector.load %arg12[%c0_89, %c0_90] : memref<1x128xf32, #tpu.memory_space<vmem>>, vector<1x128xf32>
    %c0_91 = arith.constant 0 : index
    %c0_92 = arith.constant 0 : index
    %131 = vector.load %arg13[%c0_91, %c0_92] : memref<1x128xf32, #tpu.memory_space<vmem>>, vector<1x128xf32>
    %cst_93 = arith.constant dense<0.000000e+00> : vector<128xf32>
    %132 = vector.multi_reduction <add>, %128, %cst_93 [0] : vector<256x128xf32> to vector<128xf32>
    %133 = vector.shape_cast %132 : vector<128xf32> to vector<1x128xf32>
    %cst_94 = arith.constant 2.560000e+02 : f32
    %134 = vector.broadcast %cst_94 : f32 to vector<1x128xf32>
    %135 = arith.divf %133, %134 : vector<1x128xf32>
    %136 = arith.mulf %128, %128 : vector<256x128xf32>
    %cst_95 = arith.constant dense<0.000000e+00> : vector<128xf32>
    %137 = vector.multi_reduction <add>, %136, %cst_95 [0] : vector<256x128xf32> to vector<128xf32>
    %138 = vector.shape_cast %137 : vector<128xf32> to vector<1x128xf32>
    %cst_96 = arith.constant 2.560000e+02 : f32
    %139 = vector.broadcast %cst_96 : f32 to vector<1x128xf32>
    %140 = arith.divf %138, %139 : vector<1x128xf32>
    %cst_97 = arith.constant dense<0.000000e+00> : vector<1x128xf32>
    %141 = tpu.matmul %135, %129, %cst_97 {dimension_numbers = #tpu.dot_dimension_numbers<[1], [0], [0], [1], [0, 0, 1, 1], [], []>} : vector<1x128xf32>, vector<128x128xf32>, vector<1x128xf32> -> vector<1x128xf32>
    %cst_98 = arith.constant dense<0.000000e+00> : vector<1x128xf32>
    %142 = tpu.matmul %140, %129, %cst_98 {dimension_numbers = #tpu.dot_dimension_numbers<[1], [0], [0], [1], [0, 0, 1, 1], [], []>} : vector<1x128xf32>, vector<128x128xf32>, vector<1x128xf32> -> vector<1x128xf32>
    %143 = arith.mulf %141, %141 : vector<1x128xf32>
    %144 = arith.subf %142, %143 : vector<1x128xf32>
    %cst_99 = arith.constant 0.000000e+00 : f32
    %145 = vector.broadcast %cst_99 : f32 to vector<1x128xf32>
    %146 = arith.maximumf %144, %145 : vector<1x128xf32>
    %147 = vector.broadcast %141 : vector<1x128xf32> to vector<256x128xf32>
    %148 = arith.subf %128, %147 : vector<256x128xf32>
    %cst_100 = arith.constant 9.99999974E-6 : f32
    %149 = vector.broadcast %cst_100 : f32 to vector<1x128xf32>
    %150 = arith.addf %146, %149 : vector<1x128xf32>
    %151 = math.rsqrt %150 : vector<1x128xf32>
    %152 = vector.broadcast %151 : vector<1x128xf32> to vector<256x128xf32>
    %153 = arith.mulf %148, %152 : vector<256x128xf32>
    %154 = vector.broadcast %130 : vector<1x128xf32> to vector<256x128xf32>
    %155 = arith.mulf %153, %154 : vector<256x128xf32>
    %156 = vector.broadcast %131 : vector<1x128xf32> to vector<256x128xf32>
    %157 = arith.addf %155, %156 : vector<256x128xf32>
    %cst_101 = arith.constant 0.000000e+00 : f32
    %158 = vector.broadcast %cst_101 : f32 to vector<256x128xf32>
    %159 = arith.cmpf oge, %157, %158 : vector<256x128xf32>
    %cst_102 = arith.constant 2.000000e-01 : f32
    %160 = vector.broadcast %cst_102 : f32 to vector<256x128xf32>
    %161 = arith.mulf %160, %157 : vector<256x128xf32>
    %162 = arith.select %159, %157, %161 : vector<256x128xi1>, vector<256x128xf32>
    %163 = arith.truncf %162 : vector<256x128xf32> to vector<256x128xbf16>
    %c0_103 = arith.constant 0 : index
    %c0_104 = arith.constant 0 : index
    %164 = vector.load %arg14[%c0_103, %c0_104] : memref<128x128xbf16, #tpu.memory_space<vmem>>, vector<128x128xbf16>
    %cst_105 = arith.constant dense<0.000000e+00> : vector<256x128xf32>
    %165 = tpu.matmul %163, %164, %cst_105 {dimension_numbers = #tpu.dot_dimension_numbers<[1], [0], [0], [1], [0, 0, 1, 1], [], []>} : vector<256x128xbf16>, vector<128x128xbf16>, vector<256x128xf32> -> vector<256x128xf32>
    %c0_106 = arith.constant 0 : index
    %c0_107 = arith.constant 0 : index
    %c0_108 = arith.constant 0 : index
    %166 = vector.load %arg15[%c0_106, %c0_107, %c0_108] : memref<1x256x128xf32, #tpu.memory_space<vmem>>, vector<1x256x128xf32>
    %167 = vector.shape_cast %166 : vector<1x256x128xf32> to vector<256x128xf32>
    %168 = vector.shape_cast %165 : vector<256x128xf32> to vector<1x256x128xf32>
    tpu.vector_store %arg15[%c0_106, %c0_107, %c0_108], %168 {strides = array<i32>} : memref<1x256x128xf32, #tpu.memory_space<vmem>>, vector<1x256x128xf32>,
    return
  }
  func.func @transform_0(%arg0: i32) -> (i32, i32, i32) {
    %c0_i32 = arith.constant 0 : i32
    %c0_i32_0 = arith.constant 0 : i32
    %c0_i32_1 = arith.constant 0 : i32
    return %arg0, %c0_i32, %c0_i32_0 : i32, i32, i32
  }
  func.func @transform_1(%arg0: i32) -> (i32, i32) {
    %c0_i32 = arith.constant 0 : i32
    %c0_i32_0 = arith.constant 0 : i32
    %c0_i32_1 = arith.constant 0 : i32
    return %c0_i32, %c0_i32_0 : i32, i32
  }
  func.func @transform_2(%arg0: i32) -> (i32, i32) {
    %c0_i32 = arith.constant 0 : i32
    %c0_i32_0 = arith.constant 0 : i32
    %c0_i32_1 = arith.constant 0 : i32
    return %c0_i32, %c0_i32_0 : i32, i32
  }
  func.func @transform_3(%arg0: i32) -> (i32, i32) {
    %c0_i32 = arith.constant 0 : i32
    %c0_i32_0 = arith.constant 0 : i32
    %c0_i32_1 = arith.constant 0 : i32
    return %c0_i32, %c0_i32_0 : i32, i32
  }
  func.func @transform_4(%arg0: i32) -> (i32, i32) {
    %c0_i32 = arith.constant 0 : i32
    %c0_i32_0 = arith.constant 0 : i32
    %c0_i32_1 = arith.constant 0 : i32
    return %c0_i32, %c0_i32_0 : i32, i32
  }
  func.func @transform_5(%arg0: i32) -> (i32, i32) {
    %c0_i32 = arith.constant 0 : i32
    %c0_i32_0 = arith.constant 0 : i32
    %c0_i32_1 = arith.constant 0 : i32
    return %c0_i32, %c0_i32_0 : i32, i32
  }
  func.func @transform_6(%arg0: i32) -> (i32, i32) {
    %c0_i32 = arith.constant 0 : i32
    %c0_i32_0 = arith.constant 0 : i32
    %c0_i32_1 = arith.constant 0 : i32
    return %c0_i32, %c0_i32_0 : i32, i32
  }
  func.func @transform_7(%arg0: i32) -> (i32, i32) {
    %c0_i32 = arith.constant 0 : i32
    %c0_i32_0 = arith.constant 0 : i32
    %c0_i32_1 = arith.constant 0 : i32
    return %c0_i32, %c0_i32_0 : i32, i32
  }
  func.func @transform_8(%arg0: i32) -> (i32, i32) {
    %c0_i32 = arith.constant 0 : i32
    %c0_i32_0 = arith.constant 0 : i32
    %c0_i32_1 = arith.constant 0 : i32
    return %c0_i32, %c0_i32_0 : i32, i32
  }
  func.func @transform_9(%arg0: i32) -> (i32, i32, i32, i32) {
    %c0_i32 = arith.constant 0 : i32
    %c0_i32_0 = arith.constant 0 : i32
    %c0_i32_1 = arith.constant 0 : i32
    %c0_i32_2 = arith.constant 0 : i32
    %c0_i32_3 = arith.constant 0 : i32
    return %c0_i32, %c0_i32_0, %c0_i32_1, %c0_i32_2 : i32, i32, i32, i32
  }
  func.func @transform_10(%arg0: i32) -> (i32, i32) {
    %c0_i32 = arith.constant 0 : i32
    %c0_i32_0 = arith.constant 0 : i32
    %c0_i32_1 = arith.constant 0 : i32
    return %c0_i32, %c0_i32_0 : i32, i32
  }
  func.func @transform_11(%arg0: i32) -> (i32, i32) {
    %c0_i32 = arith.constant 0 : i32
    %c0_i32_0 = arith.constant 0 : i32
    %c0_i32_1 = arith.constant 0 : i32
    return %c0_i32, %c0_i32_0 : i32, i32
  }
  func.func @transform_12(%arg0: i32) -> (i32, i32) {
    %c0_i32 = arith.constant 0 : i32
    %c0_i32_0 = arith.constant 0 : i32
    %c0_i32_1 = arith.constant 0 : i32
    return %c0_i32, %c0_i32_0 : i32, i32
  }
  func.func @transform_13(%arg0: i32) -> (i32, i32) {
    %c0_i32 = arith.constant 0 : i32
    %c0_i32_0 = arith.constant 0 : i32
    %c0_i32_1 = arith.constant 0 : i32
    return %c0_i32, %c0_i32_0 : i32, i32
  }
  func.func @transform_14(%arg0: i32) -> (i32, i32, i32) {
    %c0_i32 = arith.constant 0 : i32
    %c0_i32_0 = arith.constant 0 : i32
    %c0_i32_1 = arith.constant 0 : i32
    return %arg0, %c0_i32, %c0_i32_0 : i32, i32, i32
  }
}

</mosaic_0001>

<bundles_post_ra>
// kernel: tpu_custom_call.1
= control target key start
LH: loop header
LB: loop body
LE: loop exit
PB: predicated region body
PF: predicated region fallthrough
CT: control target
= control target key end

     0   :  { %s10788_s0 = inlined_call_operand.hbm [shape: f32[2,256,128], index: 0, kind: input, shape index: {}]   ;;  %s10789_s1 = inlined_call_operand.vmem [shape: f32[256,2], index: 1, kind: input, shape index: {}]   ;;  %s10790_s2 = inlined_call_operand.vmem [shape: f32[128,128], index: 2, kind: input, shape index: {}]   ;;  %s10791_s3 = inlined_call_operand.vmem [shape: f32[1,128], index: 3, kind: input, shape index: {}]   ;;  %s10792_s4 = inlined_call_operand.vmem [shape: f32[1,128], index: 4, kind: input, shape index: {}]   ;;  %s10793_s5 = inlined_call_operand.hbm [shape: bf16[128,128], index: 5, kind: input, shape index: {}]   ;;  %s10794_s6 = inlined_call_operand.vmem [shape: f32[128,128], index: 6, kind: input, shape index: {}]   ;;  %s10795_s7 = inlined_call_operand.vmem [shape: f32[1,128], index: 7, kind: input, shape index: {}]   ;;  %s10796_s8 = inlined_call_operand.vmem [shape: f32[1,128], index: 8, kind: input, shape index: {}]   ;;  %s10797_s9 = inlined_call_operand.hbm [shape: bf16[3,3,128,128], index: 9, kind: input, shape index: {}]   ;;  %s10798_s10 = inlined_call_operand.hbm [shape: f32[128,128], index: 10, kind: input, shape index: {}]   ;;  %s10799_s11 = inlined_call_operand.vmem [shape: f32[1,128], index: 11, kind: input, shape index: {}]   ;;  %s10800_s12 = inlined_call_operand.vmem [shape: f32[1,128], index: 12, kind: input, shape index: {}]   ;;  %s10801_s13 = inlined_call_operand.hbm [shape: bf16[128,128], index: 13, kind: input, shape index: {}]   ;;  %s10802_s14 = inlined_call_operand.hbm [shape: f32[2,256,128], index: 14, kind: output, shape index: {}]  }
   0x1   :  { %10903 = sst [smem:[#allocation86_spill]] %s10793_s5 }
   0x2   :  { %10904 = sst [smem:[#allocation87_spill]] %s10797_s9 }
   0x3   :  { %10905 = sst [smem:[#allocation88_spill]] %s10798_s10 }
   0x4   :  { %10906 = sst [smem:[#allocation89_spill]] %s10801_s13 }
   0x5   :  { %19 = vsyncpa [#allocation3], 0 }
   0x6   :  { %21 = vsyncpa [#allocation3 + $0x1], 0 }
   0x7   :  { %22 = vsyncpa [#allocation6], 0 }
   0x8   :  { %23 = vsyncpa [#allocation9], 0 }
   0x9   :  { %24 = vsyncpa [#allocation4], 0 }
   0xa   :  { %26 = vsyncpa [#allocation4 + $0x1], 0  ;;  %s7325_s29 = smov 0   ;;  %s7327_s30 = smov 0  }
   0xb   :  { %s7329_s15 = smov 0   ;;  %s7331_s16 = smov 0  }
   0xc LB: > { %10907 = sst [smem:[#allocation16_spill]] %s7220_s29  ;;  %s7346_s17 = sadd.s32 4294967295, %s7232_s16   ;;  %s7232_s16 = sphi %s7331_s16, %s11287_s16   ;;  %s7228_s15 = sphi %s7329_s15, %s11284_s15   ;;  %s7224_s30 = sphi %s7327_s30, %s11286_s30   ;;  %s7220_s29 = sphi %s7325_s29, %s11285_s29  }
   0xd   : > { %10908 = sst [smem:[#allocation17_spill]] %s7228_s15  ;;  %s5597_s18 = sadd.s32 4294967294, %s7232_s16  }
   0xe   : > { %p52_p0 = scmp.ne.s32.totalorder %s7224_s30, %s7220_s29  ;;  %p10809_p1 = scmp.eq.s32.totalorder %s7346_s17, 0 }
   0xf   : > { %p355_p3 = scmp.eq.s32.totalorder %s5597_s18, 1  ;;  %p5598_p5 = scmp.ge.s32.totalorder %s7232_s16, 1 }
  0x10   : > { %p7355_p4 = por %p10809_p1, %p52_p0  ;;  %p362_p7 = scmp.lt.s32.totalorder %s7232_s16, 3 }
  0x11   : > { %p7360_p6 = por %p355_p3, %p52_p0  ;;  %s7234_s22 = smov [#allocation5]  }
  0x12   : > { %s10909_s19 = scalar_select %p7355_p4, 1, 0 }
  0x13   : > { %s10910_s20 = scalar_select %p7360_p6, 1, 0 }
  0x14   : > { %p7365_p8 = pnand %p5598_p5, %p362_p7  ;;  %s386_s23 = sshll.u32 %s7234_s22, 4  ;;  %s387_s23 = int_to_ptr.vmem [resolvable:$true] %s386_s23 }
  0x15   : > { %10911 = sst [smem:[#allocation18_spill]] %s10910_s20  ;;  %s7235_s25 = smov [#allocation8]  }
  0x16   : > { %s10912_s21 = scalar_select %p7365_p8, 1, 0 }
  0x17   : > { %p6839_p9 = pneg %p7365_p8  ;;  %s421_s26 = sshll.u32 %s7235_s25, 4  ;;  %s422_s26 = int_to_ptr.vmem [resolvable:$true] %s421_s26 }
  0x18   : > { %s7039_s27 = scalar_lea.vmem %s387_s23, 1024  ;;  %p7047_p5 = scmp.lt.s32.totalorder %s387_s23, %s387_s23 }
  0x19   : > { %p7374_p11 = pnand %p6839_p9, %p10809_p1  ;;  %p7040_p13 = scmp.ne.s32.totalorder %s387_s23, %s7039_s27 }
  0x1a   : > { %p7048_p7 = scmp.lt.s32.totalorder %s7039_s27, %s7039_s27 }
  0x1b   : > { %p7030_p12 = pneg %p7374_p11 }
  0x1c   : > { %p7049_p10 = por %p7048_p7, %p7047_p5 }
  0x1d   : > { %p7042_p0 = pnand %p7040_p13, %p7030_p12 }
  0x1f   : > { %p7043_p3 = pneg %p7042_p0 }
  0x21   : > { %p7050_p9 = pnand %p7049_p10, %p7043_p3 }
  0x23   : > { %7053 = shalt.err (!%p7050_p9)
}
  0x24   : > { %s10805_s28 = smov 64   ;;  %s10807_s18 = smov 4  }
  0x25   : > { %s10914_s5 = sld [smem:[#allocation86_spill]]  ;;  %s7065_s20 = scalar_lea.vmem %s422_s26, 2048 }
  0x26   : > { %p7066_p13 = scmp.ne.s32.totalorder %s422_s26, %s7065_s20  ;;  %p7073_p10 = scmp.lt.s32.totalorder %s422_s26, %s422_s26 }
  0x27   : > { %p7074_p3 = scmp.lt.s32.totalorder %s7065_s20, %s7065_s20 }
  0x28   : > { %p7068_p0 = pnand %p7066_p13, %p7030_p12 }
  0x29   : > { %p7075_p7 = por %p7074_p3, %p7073_p10 }
  0x2a   : > { %p7069_p5 = pneg %p7068_p0 }
  0x2b   : > { %6842 = dma.hbm_to_vmem [thread:$0]  (!%p7374_p11), %s10914_s5, 1024, %s387_s23, [#allocation6], %s10805_s28, %s10805_s28, %s10807_s18  }
  0x2c   : > { %p7076_p9 = pnand %p7075_p7, %p7069_p5 }
  0x2e   : > { %7079 = shalt.err (!%p7076_p9)
}
  0x2f   : > { %s10810_s27 = smov 128   ;;  %s10811_s29 = smov 8  }
  0x30   : > { %s10915_s10 = sld [smem:[#allocation88_spill]]  ;;  %s7240_s25 = smov [#allocation7]  }
  0x31   : > { %s408_s28 = sshll.u32 %s7240_s25, 4  ;;  %s7241_s18 = smov [#allocation10]   ;;  %s409_s28 = int_to_ptr.vmem [resolvable:$true] %s408_s28 }
  0x32   : > { %s440_s5 = sshll.u32 %s7241_s18, 4  ;;  %s7091_s20 = scalar_lea.vmem %s409_s28, 9216  ;;  %s441_s5 = int_to_ptr.vmem [resolvable:$true] %s440_s5 }
  0x33   : > { %p7092_p13 = scmp.ne.s32.totalorder %s409_s28, %s7091_s20  ;;  %p7099_p10 = scmp.lt.s32.totalorder %s409_s28, %s409_s28 }
  0x34   : > { %p7100_p3 = scmp.lt.s32.totalorder %s7091_s20, %s7091_s20 }
  0x35   : > { %p7094_p0 = pnand %p7092_p13, %p7030_p12 }
  0x36   : > { %6848 = dma.hbm_to_vmem [thread:$0]  (!%p7374_p11), %s10915_s10, 2048, %s422_s26, [#allocation9], %s10810_s27, %s10810_s27, %s10811_s29  }
  0x37   : > { %p7095_p5 = pneg %p7094_p0  ;;  %p7101_p7 = por %p7100_p3, %p7099_p10 }
  0x39   : > { %p7102_p9 = pnand %p7101_p7, %p7095_p5 }
  0x3b   : > { %7105 = shalt.err (!%p7102_p9)
}
  0x3c   : > { %s10916_s26 = smov 4   ;;  %s10917_s23 = smov 64  }
  0x3d   : > { %s10918_s9 = sld [smem:[#allocation87_spill]]  ;;  %s7117_s25 = scalar_lea.vmem %s441_s5, 1024 }
  0x3e   : > { %p7118_p1 = scmp.ne.s32.totalorder %s441_s5, %s7117_s25  ;;  %p7125_p2 = scmp.lt.s32.totalorder %s441_s5, %s441_s5 }
  0x3f   : > { %p7126_p10 = scmp.lt.s32.totalorder %s7117_s25, %s7117_s25 }
  0x40   : > { %p7120_p13 = pnand %p7118_p1, %p7030_p12 }
  0x41   : > { %p7127_p5 = por %p7126_p10, %p7125_p2 }
  0x42   : > { %p7121_p0 = pneg %p7120_p13 }
  0x43   : > { %6845 = dma.hbm_to_vmem [thread:$0]  (!%p7374_p11), %s10918_s9, 9216, %s409_s28, [#allocation6], %s10917_s23, %s10917_s23, %s10916_s26  }
  0x44   : > { %p7128_p3 = pnand %p7127_p5, %p7121_p0 }
  0x46   : > { %7131 = shalt.err (!%p7128_p3)
}
  0x47   : > { %s10919_s13 = sld [smem:[#allocation89_spill]]  ;;  %s7425_s28 = sadd.s32 1, %s7232_s16  }
  0x48   : > { %s36_s24 = ssub.s32 %s7232_s16, %s7425_s28  ;;  %s39_s18 = sadd.s32 1, %s7228_s15 }
  0x49   : > { %p37_p1 = scmp.eq.s32.totalorder %s36_s24, 0  ;;  %p46_p2 = scmp.ne.s32.totalorder %s7228_s15, %s7224_s30 }
  0x4a   : > { %p47_p12 = scmp.eq.s32.totalorder %s7232_s16, 0  ;;  %p10921_p9 = scmp.eq.s32.totalorder %s7346_s17, 1 }
  0x4b   : > { %s7434_s25 = scalar_select %p37_p1, %s7228_s15, %s39_s18  }
  0x4c   : > { %p48_p7 = por %p47_p12, %p46_p2  ;;  %p7438_p13 = por %p10921_p9, %p46_p2 }
  0x4d   : > { %6851 = dma.hbm_to_vmem [thread:$0]  (!%p7374_p11), %s10919_s13, 1024, %s441_s5, [#allocation9], %s10917_s23, %s10917_s23, %s10916_s26  }
  0x4e   : > { %10920 = sst [smem:[#allocation19_spill]] %s7434_s25  ;;  %p6864_p0 = scmp.lt.s32.totalorder %s7232_s16, 2 }
  0x4f   : > { %s10922_s20 = scalar_select %p7438_p13, 1, 0 }
  0x50   : > { %s454_s22 = sand.u32 1, %s7228_s15   ;;  %s5713_s5 = sshll.u32 %s7232_s16, 12 }
  0x51   : > { %s5604_s27 = sshll.u32 %s454_s22, 8  ;;  %s7448_s29 = scalar_lea.hbm %s10788_s0, %s5713_s5 }
  0x52   : > { %s458_s24 = scalar_lea.vmem [#allocation2], %s5604_s27  ;;  %p7452_p11 = pnand %p6864_p0, %p48_p7 }
  0x53   : > { %s465_s18 = sshll.u32 %s458_s24, 4  ;;  %s7456_s10 = scalar_lea.sflag [#allocation3], %s454_s22  ;;  %s7450_s18 = int_to_ptr.vmem [resolvable:$true] %s465_s18 }
  0x54   : > { %s7132_s13 = scalar_lea.hbm %s7448_s29, 4096  ;;  %p7134_p5 = pneg %p7452_p11 }
  0x55   : > { %p7133_p10 = scmp.ne.s32.totalorder %s7448_s29, %s7132_s13  ;;  %s7137_s27 = scalar_lea.hbm %s10788_s0, 8192 }
  0x56   : > { %p7138_p2 = scmp.lt.s32.totalorder %s7448_s29, %s10788_s0  ;;  %p7139_p12 = scmp.lt.s32.totalorder %s7137_s27, %s7132_s13 }
  0x57   : > { %p7135_p3 = pnand %p7134_p5, %p7133_p10 }
  0x58   : > { %p7140_p7 = por %p7139_p12, %p7138_p2 }
  0x59   : > { %p7136_p1 = pneg %p7135_p3 }
  0x5b   : > { %p7141_p9 = pnand %p7140_p7, %p7136_p1 }
  0x5d   : > { %7144 = shalt.err (!%p7141_p9)
}
  0x5e   : > { %s7145_s22 = scalar_lea.vmem %s7450_s18, 4096  ;;  %s7242_s25 = smov [#allocation2]  }
  0x5f   : > { %p7146_p0 = scmp.ne.s32.totalorder %s7450_s18, %s7145_s22  ;;  %s7150_s15 = sshll.u32 %s7242_s25, 4  ;;  %s7151_s15 = int_to_ptr.vmem [resolvable:$false] %s7150_s15 }
  0x60   : > { %s7152_s5 = scalar_lea.vmem %s7151_s15, 8192  ;;  %p7153_p3 = scmp.lt.s32.totalorder %s7450_s18, %s7151_s15 }
  0x61   : > { %p7148_p6 = pnand %p7146_p0, %p7134_p5  ;;  %p7154_p13 = scmp.lt.s32.totalorder %s7152_s5, %s7145_s22 }
  0x63   : > { %p7149_p10 = pneg %p7148_p6  ;;  %p7155_p4 = por %p7154_p13, %p7153_p3 }
  0x65   : > { %p7156_p8 = pnand %p7155_p4, %p7149_p10 }
  0x67   : > { %7159 = shalt.err (!%p7156_p8)
}
  0x68   : > { %s10924_s13 = smov 8   ;;  %s10925_s26 = smov 128  }
  0x69   : > { %6855 = dma.hbm_to_vmem [thread:$0]  (!%p7452_p11), %s7448_s29, 4096, %s7450_s18, %s7456_s10, %s10925_s26, %s10925_s26, %s10924_s13  }
  0x6a   : > { %p10926_p6 = scmp.ne.s32.totalorder %s10912_s21, 0 }
  0x6c   : > { %477 = sbr.rel (%p10926_p6) target bundleno = 2147 (0x863), region = 76 }
  0x71   : > { %s7483_s25 = sand.u32 1, %s7224_s30   ;;  %p10927_p4 = scmp.ne.s32.totalorder %s10909_s19, 0 }
  0x72   : > { %s5608_s15 = sshll.u32 %s7483_s25, 8  ;;  %s480_s27 = scalar_lea.sflag [#allocation3], %s7483_s25 }
  0x73   : > { %s7489_s9 = scalar_lea.vmem [#allocation2], %s5608_s15 }
  0x74   : > { %7203 = dma.done.wait (%p10927_p4), %s480_s27, 4096  }
  0x75   : > { %7205 = vsyncadd (%p10927_p4), %s480_s27, 4294963200  ;;  %p10928_p8 = scmp.eq.s32.totalorder %s7346_s17, 0 }
  0x77   : > { %7207 = dma.done.wait (%p10928_p8), [#allocation6], 10240   ;;  %p10929_p13 = pmov %p10928_p8 }
  0x78   : > { %p10930_p11 = pmov %p10928_p8 }
  0x79   : > { %7209 = vsyncadd (%p10929_p13), [#allocation6], 4294957056 }
  0x7a   : > { %7211 = dma.done.wait (%p10930_p11), [#allocation9], 3072   ;;  %p10931_p5 = pmov %p10928_p8 }
  0x7b   : > { %v10816_v0 = vmov 0.0   ;;  %vm10833_vm0 = vmmov 0   ;;  %v7509_v1 = vld [vmem:[%s10790_s2 + $0x78] sm:$0xff]  ;;  %v7514_v2 = vld [vmem:[%s10790_s2 + $0x70] sm:$0xff]  ;;  %v7521_v3 = vld [vmem:[%s10790_s2 + $0x68] sm:$0xff]  ;;  %s10704_s27 = scalar_lea.vmem [#allocation11], %s5608_s15 }
  0x7c   : > { %7213 = vsyncadd (%p10931_p5), [#allocation9], 4294964224  ;;  %6081 = vmatprep.subr.mxu1 %v10816_v0  ;;  %6113 = vmatprep.mubr.msk.f32.mxu1 %vm10833_vm0, %v10816_v0  ;;  %v7528_v4 = vld [vmem:[%s10790_s2 + $0x60] sm:$0xff]  ;;  %v7535_v6 = vld [vmem:[%s7489_s9 + $0x8] sm:$0xff]  ;;  %s5714_s15 = sshll.u32 %s7346_s17, 12  ;;  %s5486_s10 = sshll.u32 %s10704_s27, 4  ;;  %s10743_s10 = int_to_ptr.vmem [resolvable:$true] %s5486_s10 }
  0x7d   : > { %6082 = vmatpush3.msra.mxu1 %v7509_v1  ;;  %v7532_v5 = vld [vmem:[%s7489_s9] sm:$0xff]  ;;  %v7541_v7 = vld [vmem:[%s10790_s2 + $0x58] sm:$0xff]  ;;  %v7544_v8 = vld [vmem:[%s7489_s9 + $0x10] sm:$0xff]  ;;  %v635_v11 = vmul.f32 %v7535_v6, %v7535_v6  ;;  %s10741_s21 = scalar_lea.hbm %s10802_s14, %s5714_s15  ;;  %s5473_s18 = scalar_lea.sflag [#allocation4], %s7483_s25 }
  0x7e   : > { %6083 = vmatprep.subr.mxu1 %v10816_v0  ;;  %v595_v9 = vadd.f32 %v7535_v6, %v7532_v5  ;;  %v634_v10 = vmul.f32 %v7532_v5, %v7532_v5  ;;  %v7554_v12 = vld [vmem:[%s7489_s9 + $0x18] sm:$0xff]  ;;  %v636_v13 = vmul.f32 %v7544_v8, %v7544_v8  ;;  %v7562_v14 = vld [vmem:[%s10790_s2 + $0x50] sm:$0xff]  ;;  %v7567_v16 = vld [vmem:[%s7489_s9 + $0x20] sm:$0xff]  ;;  %s7160_s23 = scalar_lea.vmem %s10743_s10, 4096  ;;  %p11278_p2 = scmp.ne.s32.totalorder %s10922_s20, 0 }
  0x7f   : > { %6084 = vmatpush3.msra.mxu1 %v7514_v2  ;;  %v637_v17 = vmul.f32 %v7554_v12, %v7554_v12  ;;  %v7575_v19 = vld [vmem:[%s10790_s2 + $0x48] sm:$0xff]  ;;  %v638_v22 = vmul.f32 %v7567_v16, %v7567_v16  ;;  %v7588_v24 = vld [vmem:[%s10790_s2 + $0x40] sm:$0xff]  ;;  %v7593_v26 = vld [vmem:[%s7489_s9 + $0x30] sm:$0xff]  ;;  %p7161_p1 = scmp.ne.s32.totalorder %s10743_s10, %s7160_s23  ;;  %s7247_s17 = smov [#allocation11]  }
  0x80   : > { %6085 = vmatprep.subr.mxu1 %v10816_v0  ;;  %v596_v15 = vadd.f32 %v595_v9, %v7544_v8  ;;  %v666_v18 = vadd.f32 %v635_v11, %v634_v10  ;;  %v7580_v21 = vld [vmem:[%s7489_s9 + $0x28] sm:$0xff]  ;;  %v7601_v29 = vld [vmem:[%s10790_s2 + $0x38] sm:$0xff]  ;;  %v7608_v31 = vld [vmem:[%s10790_s2 + $0x30] sm:$0xff]  ;;  %v640_v34 = vmul.f32 %v7593_v26, %v7593_v26  ;;  %s7164_s24 = sshll.u32 %s7247_s17, 4  ;;  %s7165_s24 = int_to_ptr.vmem [resolvable:$false] %s7164_s24 }
  0x81   : > { %6086 = vmatpush3.msra.mxu1 %v7521_v3  ;;  %v639_v27 = vmul.f32 %v7580_v21, %v7580_v21  ;;  %v7611_v32 = vld [vmem:[%s7489_s9 + $0x38] sm:$0xff]  ;;  %v7614_v33 = vld [vmem:[%s7489_s9 + $0x40] sm:$0xff]  ;;  %v7622_v36 = vld [vmem:[%s10790_s2 + $0x28] sm:$0xff]  ;;  %p7162_p12 = pnand %p7161_p1, %p11278_p2  ;;  %s7166_s22 = scalar_lea.vmem %s7165_s24, 8192 }
  0x82   : > { %6087 = vmatprep.subr.mxu1 %v10816_v0  ;;  %v597_v20 = vadd.f32 %v596_v15, %v7554_v12  ;;  %v667_v23 = vadd.f32 %v666_v18, %v636_v13  ;;  %v7627_v38 = vld [vmem:[%s7489_s9 + $0x48] sm:$0xff]  ;;  %v641_v39 = vmul.f32 %v7611_v32, %v7611_v32  ;;  %v7635_v41 = vld [vmem:[%s10790_s2 + $0x20] sm:$0xff]  ;;  %v7640_v43 = vld [vmem:[%s7489_s9 + $0x50] sm:$0xff]  ;;  %v642_v44 = vmul.f32 %v7614_v33, %v7614_v33  ;;  %p7167_p9 = scmp.lt.s32.totalorder %s10743_s10, %s7165_s24  ;;  %p7168_p0 = scmp.lt.s32.totalorder %s7166_s22, %s7160_s23 }
  0x83   : > { %6088 = vmatpush3.msra.mxu1 %v7528_v4  ;;  %v7648_v46 = vld [vmem:[%s10790_s2 + $0x18] sm:$0xff]  ;;  %v643_v49 = vmul.f32 %v7627_v38, %v7627_v38  ;;  %v7661_v51 = vld [vmem:[%s10790_s2 + $0x10] sm:$0xff]  ;;  %v7666_v53 = vld [vmem:[%s7489_s9 + $0x60] sm:$0xff]  ;;  %v644_v54 = vmul.f32 %v7640_v43, %v7640_v43  ;;  %p7163_p7 = pneg %p7162_p12 }
  0x84   : > { %6089 = vmatprep.subr.mxu1 %v10816_v0  ;;  %v598_v25 = vadd.f32 %v597_v20, %v7567_v16  ;;  %v668_v28 = vadd.f32 %v667_v23, %v637_v17  ;;  %v7653_v48 = vld [vmem:[%s7489_s9 + $0x58] sm:$0xff]  ;;  %v7674_v56 = vld [vmem:[%s10790_s2 + $0x8] sm:$0xff]  ;;  %v7687_v61 = vld [vmem:[%s10790_s2] sm:$0xff]  ;;  %v646_v9 = vmul.f32 %v7666_v53, %v7666_v53  ;;  %p7169_p10 = por %p7168_p0, %p7167_p9 }
  0x85   : > { %6090 = vmatpush3.msra.mxu1 %v7541_v7  ;;  %v7679_v58 = vld [vmem:[%s7489_s9 + $0x68] sm:$0xff]  ;;  %v645_v59 = vmul.f32 %v7653_v48, %v7653_v48  ;;  %v7692_v63 = vld [vmem:[%s7489_s9 + $0x70] sm:$0xff]  ;;  %v7700_v13 = vld [vmem:[%s7489_s9 + $0x78] sm:$0xff] }
  0x86   : > { %6091 = vmatprep.subr.mxu1 %v10816_v0  ;;  %v599_v30 = vadd.f32 %v598_v25, %v7580_v21  ;;  %v669_v35 = vadd.f32 %v668_v28, %v638_v22  ;;  %v647_v15 = vmul.f32 %v7679_v58, %v7679_v58  ;;  %v7708_v20 = vld [vmem:[%s7489_s9 + $0x80] sm:$0xff]  ;;  %v648_v22 = vmul.f32 %v7692_v63, %v7692_v63  ;;  %p7170_p3 = pnand %p7169_p10, %p7163_p7 }
  0x87   : > { %6092 = vmatpush3.msra.mxu1 %v7562_v14  ;;  %v649_v28 = vmul.f32 %v7700_v13, %v7700_v13 }
  0x88   : > { %6093 = vmatprep.subr.mxu1 %v10816_v0  ;;  %v600_v37 = vadd.f32 %v599_v30, %v7593_v26  ;;  %v670_v40 = vadd.f32 %v669_v35, %v639_v27  ;;  %v7715_v27 = vld [vmem:[%s7489_s9 + $0x88] sm:$0xff]  ;;  %v7721_v35 = vld [vmem:[%s7489_s9 + $0x90] sm:$0xff] }
  0x89   : > { %6094 = vmatpush3.msra.mxu1 %v7575_v19 }
  0x8a   : > { %6095 = vmatprep.subr.mxu1 %v10816_v0  ;;  %v601_v42 = vadd.f32 %v600_v37, %v7611_v32  ;;  %v671_v45 = vadd.f32 %v670_v40, %v640_v34  ;;  %v650_v37 = vmul.f32 %v7708_v20, %v7708_v20 }
  0x8b   : > { %6096 = vmatpush3.msra.mxu1 %v7588_v24 }
  0x8c   : > { %6097 = vmatprep.subr.mxu1 %v10816_v0  ;;  %v602_v47 = vadd.f32 %v601_v42, %v7614_v33  ;;  %v672_v50 = vadd.f32 %v671_v45, %v641_v39  ;;  %v7727_v42 = vld [vmem:[%s7489_s9 + $0x98] sm:$0xff] }
  0x8d   : > { %6098 = vmatpush3.msra.mxu1 %v7601_v29 }
  0x8e   : > { %6099 = vmatprep.subr.mxu1 %v10816_v0  ;;  %v603_v52 = vadd.f32 %v602_v47, %v7627_v38  ;;  %v673_v55 = vadd.f32 %v672_v50, %v642_v44  ;;  %v651_v44 = vmul.f32 %v7715_v27, %v7715_v27  ;;  %v652_v50 = vmul.f32 %v7721_v35, %v7721_v35 }
  0x8f   : > { %6100 = vmatpush3.msra.mxu1 %v7608_v31 }
  0x90   : > { %6101 = vmatprep.subr.mxu1 %v10816_v0  ;;  %v604_v57 = vadd.f32 %v603_v52, %v7640_v43  ;;  %v674_v60 = vadd.f32 %v673_v55, %v643_v49  ;;  %v7733_v49 = vld [vmem:[%s7489_s9 + $0xa0] sm:$0xff]  ;;  %v7739_v55 = vld [vmem:[%s7489_s9 + $0xa8] sm:$0xff] }
  0x91   : > { %6102 = vmatpush3.msra.mxu1 %v7622_v36 }
  0x92   : > { %6103 = vmatprep.subr.mxu1 %v10816_v0  ;;  %v605_v62 = vadd.f32 %v604_v57, %v7653_v48  ;;  %v675_v10 = vadd.f32 %v674_v60, %v644_v54  ;;  %v653_v57 = vmul.f32 %v7727_v42, %v7727_v42 }
  0x93   : > { %6104 = vmatpush3.msra.mxu1 %v7635_v41 }
  0x94   : > { %6105 = vmatprep.subr.mxu1 %v10816_v0  ;;  %v606_v11 = vadd.f32 %v605_v62, %v7666_v53  ;;  %v676_v17 = vadd.f32 %v675_v10, %v645_v59  ;;  %v7745_v62 = vld [vmem:[%s7489_s9 + $0xb0] sm:$0xff] }
  0x95   : > { %6106 = vmatpush3.msra.mxu1 %v7648_v46 }
  0x96   : > { %6107 = vmatprep.subr.mxu1 %v10816_v0  ;;  %v607_v18 = vadd.f32 %v606_v11, %v7679_v58  ;;  %v677_v23 = vadd.f32 %v676_v17, %v646_v9  ;;  %v654_v9 = vmul.f32 %v7733_v49, %v7733_v49  ;;  %v655_v17 = vmul.f32 %v7739_v55, %v7739_v55 }
  0x97   : > { %6108 = vmatpush3.msra.mxu1 %v7661_v51 }
  0x98   : > { %6109 = vmatprep.subr.mxu1 %v10816_v0  ;;  %v608_v25 = vadd.f32 %v607_v18, %v7692_v63  ;;  %v678_v30 = vadd.f32 %v677_v23, %v647_v15  ;;  %v7751_v15 = vld [vmem:[%s7489_s9 + $0xb8] sm:$0xff]  ;;  %v7757_v23 = vld [vmem:[%s7489_s9 + $0xc0] sm:$0xff] }
  0x99   : > { %6110 = vmatpush3.msra.mxu1 %v7674_v56 }
  0x9a   : > { %6111 = vmatprep.subr.mxu1 %v10816_v0  ;;  %v609_v34 = vadd.f32 %v608_v25, %v7700_v13  ;;  %v679_v39 = vadd.f32 %v678_v30, %v648_v22  ;;  %v656_v25 = vmul.f32 %v7745_v62, %v7745_v62 }
  0x9b   : > { %6112 = vmatpush3.msra.mxu1 %v7687_v61 }
  0x9c   : > { %6116 = vmatprep.subr.mxu1 %v10816_v0  ;;  %v610_v40 = vadd.f32 %v609_v34, %v7708_v20  ;;  %v680_v45 = vadd.f32 %v679_v39, %v649_v28  ;;  %v7763_v34 = vld [vmem:[%s7489_s9 + $0xc8] sm:$0xff] }
  0x9e   : > { %v611_v47 = vadd.f32 %v610_v40, %v7715_v27  ;;  %v681_v52 = vadd.f32 %v680_v45, %v650_v37  ;;  %v657_v37 = vmul.f32 %v7751_v15, %v7751_v15  ;;  %v658_v45 = vmul.f32 %v7757_v23, %v7757_v23 }
  0xa0   : > { %v612_v54 = vadd.f32 %v611_v47, %v7721_v35  ;;  %v682_v59 = vadd.f32 %v681_v52, %v651_v44  ;;  %v7769_v44 = vld [vmem:[%s7489_s9 + $0xd0] sm:$0xff]  ;;  %v7775_v52 = vld [vmem:[%s7489_s9 + $0xd8] sm:$0xff] }
  0xa1   : > { %10932 = vst [vmem:[#allocation20_spill] sm:$0xff] %v7775_v52 }
  0xa2   : > { %v613_v60 = vadd.f32 %v612_v54, %v7727_v42  ;;  %v683_v10 = vadd.f32 %v682_v59, %v652_v50  ;;  %v659_v59 = vmul.f32 %v7763_v34, %v7763_v34 }
  0xa4   : > { %v614_v11 = vadd.f32 %v613_v60, %v7733_v49  ;;  %v684_v18 = vadd.f32 %v683_v10, %v653_v57  ;;  %v7781_v60 = vld [vmem:[%s7489_s9 + $0xe0] sm:$0xff] }
  0xa5   : > { %10933 = vst [vmem:[#allocation21_spill] sm:$0xff] %v7781_v60 }
  0xa6   : > { %v615_v22 = vadd.f32 %v614_v11, %v7739_v55  ;;  %v685_v28 = vadd.f32 %v684_v18, %v654_v9  ;;  %v7785_v11 = vld [vmem:[%s7489_s9 + $0xe8] sm:$0xff]  ;;  %v660_v18 = vmul.f32 %v7769_v44, %v7769_v44 }
  0xa8   : > { %v616_v30 = vadd.f32 %v615_v22, %v7745_v62  ;;  %v686_v39 = vadd.f32 %v685_v28, %v655_v17 }
  0xaa   : > { %v617_v40 = vadd.f32 %v616_v30, %v7751_v15  ;;  %v687_v47 = vadd.f32 %v686_v39, %v656_v25  ;;  %v7791_v25 = vld [vmem:[%s7489_s9 + $0xf0] sm:$0xff]  ;;  %v7795_v30 = vld [vmem:[%s7489_s9 + $0xf8] sm:$0xff]  ;;  %v661_v39 = vmul.f32 %v7775_v52, %v7775_v52 }
  0xab   : > { %v664_v0 = vmul.f32 %v7791_v25, %v7791_v25 }
  0xac   : > { %v618_v50 = vadd.f32 %v617_v40, %v7757_v23  ;;  %v688_v54 = vadd.f32 %v687_v47, %v657_v37 }
  0xae   : > { %v619_v57 = vadd.f32 %v618_v50, %v7763_v34  ;;  %v689_v9 = vadd.f32 %v688_v54, %v658_v45  ;;  %v662_v50 = vmul.f32 %v7781_v60, %v7781_v60 }
  0xb0   : > { %v620_v10 = vadd.f32 %v619_v57, %v7769_v44  ;;  %v690_v22 = vadd.f32 %v689_v9, %v659_v59  ;;  %v663_v9 = vmul.f32 %v7785_v11, %v7785_v11 }
  0xb2   : > { %v621_v17 = vadd.f32 %v620_v10, %v7775_v52  ;;  %v691_v40 = vadd.f32 %v690_v22, %v660_v18 }
  0xb4   : > { %v622_v28 = vadd.f32 %v621_v17, %v7781_v60  ;;  %v692_v54 = vadd.f32 %v691_v40, %v661_v39  ;;  %v10934_v40 = vmov 0.0  }
  0xb6   : > { %v623_v37 = vadd.f32 %v622_v28, %v7785_v11  ;;  %v693_v10 = vadd.f32 %v692_v54, %v662_v50 }
  0xb8   : > { %v624_v45 = vadd.f32 %v623_v37, %v7791_v25  ;;  %v694_v18 = vadd.f32 %v693_v10, %v663_v9 }
  0xba   : > { %v625_v47 = vadd.f32 %v624_v45, %v7795_v30  ;;  %v665_v45 = vmul.f32 %v7795_v30, %v7795_v30  ;;  %v695_v52 = vadd.f32 %v694_v18, %v664_v0 }
  0xbc   : > { %v626_v57 = vrot.slane %v625_v47, 4  ;;  %v696_v39 = vadd.f32 %v695_v52, %v665_v45 }
  0xbe   : > { %v627_v59 = vadd.f32 %v626_v57, %v625_v47  ;;  %v697_v47 = vrot.slane %v696_v39, 4 }
  0xc0   : > { %v628_v17 = vrot.slane %v627_v59, 2  ;;  %v698_v0 = vadd.f32 %v697_v47, %v696_v39 }
  0xc2   : > { %v629_v28 = vadd.f32 %v628_v17, %v627_v59 }
  0xc4   : > { %v630_v22 = vrot.slane %v629_v28, 1 }
  0xc6   : > { %v631_v37 = vadd.f32 %v630_v22, %v629_v28 }
  0xc8   : > { %v633_v60 = vmul.f32 0.00390625, %v631_v37 }
  0xca   : > { %6114 = vmatmul.mubr.f32.vlgmr.msra.gmra.mxu1 %v633_v60  ;;  %v847_v60 = vlaneseq }
  0xcb   : > { %6117 = vmatpush3.msra.mxu1 %v7509_v1  ;;  %6148 = vmatprep.mubr.msk.f32.mxu1 %vm10833_vm0, %v10934_v40  ;;  %v699_v1 = vrot.slane %v698_v0, 2 }
  0xcc   : > { %6118 = vmatprep.subr.mxu1 %v10934_v40  ;;  %v848_v59 = vshrl.u32 %v847_v60, 7 }
  0xcd   : > { %6119 = vmatpush3.msra.mxu1 %v7514_v2  ;;  %v700_v2 = vadd.f32 %v699_v1, %v698_v0 }
  0xce   : > { %6120 = vmatprep.subr.mxu1 %v10934_v40  ;;  %v7846_v10 = vsub.s32 0, %v848_v59 }
  0xcf   : > { %6121 = vmatpush3.msra.mxu1 %v7521_v3  ;;  %v701_v3 = vrot.slane %v700_v2, 1 }
  0xd0   : > { %6122 = vmatprep.subr.mxu1 %v10934_v40  ;;  %10935 = vst [vmem:[#allocation22_spill] sm:$0xff] %v7846_v10 }
  0xd1   : > { %6123 = vmatpush3.msra.mxu1 %v7528_v4  ;;  %v702_v4 = vadd.f32 %v701_v3, %v700_v2  ;;  %v7889_v3 = vld [vmem:[%s10791_s3] ss:$0 sm:$0xff] }
  0xd2   : > { %6124 = vmatprep.subr.mxu1 %v10934_v40 }
  0xd3   : > { %6125 = vmatpush3.msra.mxu1 %v7541_v7  ;;  %v703_v7 = vmul.f32 0.00390625, %v702_v4 }
  0xd4   : > { %6126 = vmatprep.subr.mxu1 %v10934_v40 }
  0xd5   : > { %6127 = vmatpush3.msra.mxu1 %v7562_v14  ;;  %v6934_v14 = vld [vmem:[#allocation5 + $0x38] sm:$0xff]  }
  0xd6   : > { %6128 = vmatprep.subr.mxu1 %v10934_v40  ;;  %6151 = vmatprep.subr.bf16.mxu0 %v6934_v14 }
  0xd7   : > { %6129 = vmatpush3.msra.mxu1 %v7575_v19  ;;  %6152 = vmatpush3.bf16.msra.mxu0 %v6934_v14  ;;  %v6935_v19 = vld [vmem:[#allocation5 + $0x30] sm:$0xff]  }
  0xd8   : > { %6130 = vmatprep.subr.mxu1 %v10934_v40  ;;  %6153 = vmatprep.subr.bf16.mxu0 %v6935_v19 }
  0xd9   : > { %6131 = vmatpush3.msra.mxu1 %v7588_v24  ;;  %v6936_v24 = vld [vmem:[#allocation5 + $0x28] sm:$0xff]  }
  0xda   : > { %6132 = vmatprep.subr.mxu1 %v10934_v40 }
  0xdb   : > { %6133 = vmatpush3.msra.mxu1 %v7601_v29  ;;  %6154 = vmatpush3.bf16.msra.mxu0 %v6935_v19  ;;  %v6937_v29 = vld [vmem:[#allocation5 + $0x20] sm:$0xff]  }
  0xdc   : > { %6134 = vmatprep.subr.mxu1 %v10934_v40  ;;  %6155 = vmatprep.subr.bf16.mxu0 %v6936_v24 }
  0xdd   : > { %6135 = vmatpush3.msra.mxu1 %v7608_v31  ;;  %v6938_v31 = vld [vmem:[#allocation5 + $0x18] sm:$0xff]  }
  0xde   : > { %6136 = vmatprep.subr.mxu1 %v10934_v40 }
  0xdf   : > { %6137 = vmatpush3.msra.mxu1 %v7622_v36  ;;  %6156 = vmatpush3.bf16.msra.mxu0 %v6936_v24  ;;  %v6939_v36 = vld [vmem:[#allocation5 + $0x10] sm:$0xff]  }
  0xe0   : > { %6138 = vmatprep.subr.mxu1 %v10934_v40  ;;  %6157 = vmatprep.subr.bf16.mxu0 %v6937_v29 }
  0xe1   : > { %6139 = vmatpush3.msra.mxu1 %v7635_v41  ;;  %v6940_v41 = vld [vmem:[#allocation5 + $0x8] sm:$0xff]  }
  0xe2   : > { %6140 = vmatprep.subr.mxu1 %v10934_v40 }
  0xe3   : > { %6141 = vmatpush3.msra.mxu1 %v7648_v46  ;;  %6158 = vmatpush3.bf16.msra.mxu0 %v6937_v29  ;;  %v6941_v46 = vld [vmem:[#allocation5] sm:$0xff]  }
  0xe4   : > { %6142 = vmatprep.subr.mxu1 %v10934_v40  ;;  %6159 = vmatprep.subr.bf16.mxu0 %v6938_v31 }
  0xe5   : > { %6143 = vmatpush3.msra.mxu1 %v7661_v51 }
  0xe6   : > { %6144 = vmatprep.subr.mxu1 %v10934_v40 }
  0xe7   : > { %6145 = vmatpush3.msra.mxu1 %v7674_v56  ;;  %6160 = vmatpush3.bf16.msra.mxu0 %v6938_v31 }
  0xe8   : > { %6146 = vmatprep.subr.mxu1 %v10934_v40  ;;  %6161 = vmatprep.subr.bf16.mxu0 %v6939_v36 }
  0xe9   : > { %6147 = vmatpush3.msra.mxu1 %v7687_v61 }
  0xea   : > { %6149 = vmatmul.mubr.f32.vlgmr.msra.gmra.mxu1 %v703_v7  ;;  %6199 = vmatprep.subr.mxu1 %v10934_v40 }
  0xeb   : > { %6231 = vmatprep.mubr.msk.f32.mxu1 %vm10833_vm0, %v10934_v40  ;;  %6162 = vmatpush3.bf16.msra.mxu0 %v6939_v36 }
  0xec   : > { %6163 = vmatprep.subr.bf16.mxu0 %v6940_v41 }
  0xef   : > { %6164 = vmatpush3.bf16.msra.mxu0 %v6940_v41  ;;  %v7906_v41 = vld [vmem:[%s10792_s4] ss:$0 sm:$0xff] }
  0xf0   : > { %6165 = vmatprep.subr.bf16.mxu0 %v6941_v46 }
  0xf3   : > { %6166 = vmatpush3.bf16.msra.mxu0 %v6941_v46 }
 0x18a   : > { %v770_v51 = vpop.f32.mrf.mxu1 }
 0x18b   : > { %v844_v61 = vmul.f32 %v770_v51, %v770_v51  ;;  %v7849_v17 = vrot.slane %v770_v51, %v7846_v10 }
 0x18c   : > { %v6115_v56 = vpop.f32.mrf.mxu1 }
 0x18d   : > { %v851_v28 = vsub.f32 %v7532_v5, %v7849_v17  ;;  %v852_v18 = vsub.f32 %v7535_v6, %v7849_v17  ;;  %v853_v22 = vsub.f32 %v7544_v8, %v7849_v17  ;;  %v854_v37 = vsub.f32 %v7554_v12, %v7849_v17 }
 0x18e   : > { %v855_v45 = vsub.f32 %v7567_v16, %v7849_v17  ;;  %v856_v39 = vsub.f32 %v7580_v21, %v7849_v17  ;;  %v857_v47 = vsub.f32 %v7593_v26, %v7849_v17  ;;  %v858_v5 = vsub.f32 %v7611_v32, %v7849_v17 }
 0x18f   : > { %v859_v6 = vsub.f32 %v7614_v33, %v7849_v17  ;;  %v860_v8 = vsub.f32 %v7627_v38, %v7849_v17  ;;  %v861_v12 = vsub.f32 %v7640_v43, %v7849_v17  ;;  %v862_v16 = vsub.f32 %v7653_v48, %v7849_v17 }
 0x190   : > { %v863_v21 = vsub.f32 %v7666_v53, %v7849_v17  ;;  %v864_v32 = vsub.f32 %v7679_v58, %v7849_v17  ;;  %v865_v1 = vsub.f32 %v7692_v63, %v7849_v17  ;;  %v866_v2 = vsub.f32 %v7700_v13, %v7849_v17 }
 0x191   : > { %v867_v4 = vsub.f32 %v7708_v20, %v7849_v17  ;;  %v868_v7 = vsub.f32 %v7715_v27, %v7849_v17  ;;  %v869_v14 = vsub.f32 %v7721_v35, %v7849_v17  ;;  %v870_v19 = vsub.f32 %v7727_v42, %v7849_v17 }
 0x192   : > { %v873_v27 = vsub.f32 %v7745_v62, %v7849_v17 }
 0x1aa   : > { %v840_v52 = vpop.f32.mrf.mxu1 }
 0x1ab   : > { %v845_v50 = vsub.f32 %v840_v52, %v844_v61 }
 0x1ac   : > { %v6150_v54 = vpop.f32.mrf.mxu1 }
 0x1ad   : > { %v846_v57 = vmax.f32 %v845_v50, 0.0 }
 0x1af   : > { %v883_v9 = vadd.f32 1e-05, %v846_v57 }
 0x1b1   : > { %7022 = vrsqrt.f32 %v883_v9 }
 0x1be   : > { %v7023_v0 = vpop.eup %7022 }
 0x1bf   : > { %v7878_v26 = vrot.slane %v7023_v0, %v7846_v10 }
 0x1c1   : > { %v889_v24 = vmul.f32 %v7878_v26, %v851_v28  ;;  %v890_v29 = vmul.f32 %v7878_v26, %v852_v18  ;;  %v891_v31 = vmul.f32 %v7878_v26, %v853_v22  ;;  %v892_v36 = vmul.f32 %v7878_v26, %v854_v37 }
 0x1c2   : > { %v893_v46 = vmul.f32 %v7878_v26, %v855_v45  ;;  %v894_v51 = vmul.f32 %v7878_v26, %v856_v39  ;;  %v895_v56 = vmul.f32 %v7878_v26, %v857_v47  ;;  %v896_v61 = vmul.f32 %v7878_v26, %v858_v5 }
 0x1c3   : > { %v927_v52 = vmul.f32 %v7889_v3, %v889_v24  ;;  %v928_v60 = vmul.f32 %v7889_v3, %v890_v29  ;;  %v929_v50 = vmul.f32 %v7889_v3, %v891_v31  ;;  %v930_v54 = vmul.f32 %v7889_v3, %v892_v36 }
 0x1c4   : > { %v931_v57 = vmul.f32 %v7889_v3, %v893_v46  ;;  %v932_v59 = vmul.f32 %v7889_v3, %v894_v51  ;;  %v933_v9 = vmul.f32 %v7889_v3, %v895_v56  ;;  %v934_v28 = vmul.f32 %v7889_v3, %v896_v61 }
 0x1c5   : > { %v965_v18 = vadd.f32 %v7906_v41, %v927_v52  ;;  %v966_v22 = vadd.f32 %v7906_v41, %v928_v60  ;;  %v967_v37 = vadd.f32 %v7906_v41, %v929_v50  ;;  %v968_v45 = vadd.f32 %v7906_v41, %v930_v54 }
 0x1c6   : > { %v969_v39 = vadd.f32 %v7906_v41, %v931_v57  ;;  %v970_v47 = vadd.f32 %v7906_v41, %v932_v59  ;;  %v971_v5 = vadd.f32 %v7906_v41, %v933_v9  ;;  %v972_v0 = vadd.f32 %v7906_v41, %v934_v28 }
 0x1c7   : > { %vm997_vm1 = vcmp.ge.f32.partialorder %v965_v18, 0.0  ;;  %vm998_vm2 = vcmp.ge.f32.partialorder %v966_v22, 0.0  ;;  %v1029_v24 = vmul.f32 0.2, %v965_v18  ;;  %v1030_v29 = vmul.f32 0.2, %v966_v22 }
 0x1c8   : > { %vm999_vm3 = vcmp.ge.f32.partialorder %v967_v37, 0.0  ;;  %vm1000_vm4 = vcmp.ge.f32.partialorder %v968_v45, 0.0  ;;  %v1031_v31 = vmul.f32 0.2, %v967_v37  ;;  %v1032_v36 = vmul.f32 0.2, %v968_v45 }
 0x1c9   : > { %v1061_v46 = vsel %vm997_vm1, %v965_v18, %v1029_v24  ;;  %v1062_v51 = vsel %vm998_vm2, %v966_v22, %v1030_v29  ;;  %vm1001_vm5 = vcmp.ge.f32.partialorder %v969_v39, 0.0  ;;  %vm1002_vm6 = vcmp.ge.f32.partialorder %v970_v47, 0.0 }
 0x1ca   : > { %v1093_v56 = vpack.c.bf16 %v1062_v51, %v1061_v46  ;;  %v1063_v61 = vsel %vm999_vm3, %v967_v37, %v1031_v31  ;;  %v1064_v52 = vsel %vm1000_vm4, %v968_v45, %v1032_v36  ;;  %v1033_v60 = vmul.f32 0.2, %v969_v39 }
 0x1cb   : > { %v1094_v50 = vpack.c.bf16 %v1064_v52, %v1063_v61  ;;  %v1034_v54 = vmul.f32 0.2, %v970_v47  ;;  %vm1003_vm7 = vcmp.ge.f32.partialorder %v971_v5, 0.0  ;;  %vm1004_vm8 = vcmp.ge.f32.partialorder %v972_v0, 0.0 }
 0x1cc   : > { %6167 = vmatprep.mubr.bf16.mxu0 %v1093_v56  ;;  %v1065_v57 = vsel %vm1001_vm5, %v969_v39, %v1033_v60  ;;  %v1035_v59 = vmul.f32 0.2, %v971_v5  ;;  %v1036_v9 = vmul.f32 0.2, %v972_v0  ;;  %v897_v28 = vmul.f32 %v7878_v26, %v859_v6 }
 0x1cd   : > { %6168 = vmatmul.mubr.bf16.vlgmr.msra.gmra.mxu0 %v1094_v50  ;;  %v1066_v18 = vsel %vm1002_vm6, %v970_v47, %v1034_v54  ;;  %v898_v22 = vmul.f32 %v7878_v26, %v860_v8  ;;  %v899_v37 = vmul.f32 %v7878_v26, %v861_v12  ;;  %v900_v45 = vmul.f32 %v7878_v26, %v862_v16 }
 0x1ce   : > { %v1095_v33 = vpack.c.bf16 %v1066_v18, %v1065_v57  ;;  %v1067_v39 = vsel %vm1003_vm7, %v971_v5, %v1035_v59  ;;  %v1068_v6 = vsel %vm1004_vm8, %v972_v0, %v1036_v9  ;;  %v935_v47 = vmul.f32 %v7889_v3, %v897_v28 }
 0x1cf   : > { %v1096_v24 = vpack.c.bf16 %v1068_v6, %v1067_v39  ;;  %v936_v38 = vmul.f32 %v7889_v3, %v898_v22  ;;  %v937_v8 = vmul.f32 %v7889_v3, %v899_v37  ;;  %v938_v29 = vmul.f32 %v7889_v3, %v900_v45 }
 0x1d0   : > { %6171 = vmatprep.mubr.bf16.mxu0 %v1095_v33  ;;  %v973_v43 = vadd.f32 %v7906_v41, %v935_v47  ;;  %v901_v48 = vmul.f32 %v7878_v26, %v863_v21  ;;  %v902_v12 = vmul.f32 %v7878_v26, %v864_v32  ;;  %v903_v16 = vmul.f32 %v7878_v26, %v865_v1 }
 0x1d1   : > { %v974_v5 = vadd.f32 %v7906_v41, %v936_v38  ;;  %v975_v0 = vadd.f32 %v7906_v41, %v937_v8  ;;  %v976_v31 = vadd.f32 %v7906_v41, %v938_v29  ;;  %v904_v53 = vmul.f32 %v7878_v26, %v866_v2 }
 0x1d2   : > { %vm1005_vm9 = vcmp.ge.f32.partialorder %v973_v43, 0.0  ;;  %v1037_v58 = vmul.f32 0.2, %v973_v43  ;;  %v939_v21 = vmul.f32 %v7889_v3, %v901_v48  ;;  %v940_v32 = vmul.f32 %v7889_v3, %v902_v12 }
 0x1d3   : > { %vm1006_vm10 = vcmp.ge.f32.partialorder %v974_v5, 0.0  ;;  %v1038_v63 = vmul.f32 0.2, %v974_v5  ;;  %vm1007_vm11 = vcmp.ge.f32.partialorder %v975_v0, 0.0  ;;  %vm1008_vm12 = vcmp.ge.f32.partialorder %v976_v31, 0.0 }
 0x1d4   : > { %v1069_v1 = vsel %vm1005_vm9, %v973_v43, %v1037_v58  ;;  %v1039_v36 = vmul.f32 0.2, %v975_v0  ;;  %v1040_v46 = vmul.f32 0.2, %v976_v31  ;;  %v977_v51 = vadd.f32 %v7906_v41, %v939_v21 }
 0x1d5   : > { %6172 = vmatmul.mubr.bf16.gmra.mxu0 %v1096_v24  ;;  %v1070_v56 = vsel %vm1006_vm10, %v974_v5, %v1038_v63  ;;  %v978_v13 = vadd.f32 %v7906_v41, %v940_v32  ;;  %v941_v2 = vmul.f32 %v7889_v3, %v903_v16  ;;  %v942_v61 = vmul.f32 %v7889_v3, %v904_v53 }
 0x1d6   : > { %v1097_v52 = vpack.c.bf16 %v1070_v56, %v1069_v1  ;;  %v1071_v60 = vsel %vm1007_vm11, %v975_v0, %v1039_v36  ;;  %vm1009_vm13 = vcmp.ge.f32.partialorder %v977_v51, 0.0  ;;  %v871_v50 = vsub.f32 %v7733_v49, %v7849_v17 }
 0x1d7   : > { %v1072_v54 = vsel %vm1008_vm12, %v976_v31, %v1040_v46  ;;  %vm1010_vm14 = vcmp.ge.f32.partialorder %v978_v13, 0.0  ;;  %v1041_v57 = vmul.f32 0.2, %v977_v51  ;;  %v1042_v59 = vmul.f32 0.2, %v978_v13  ;;  %v10936_v46 = vld [vmem:[#allocation20_spill] sm:$0xff] }
 0x1d8   : > { %6175 = vmatprep.mubr.bf16.mxu0 %v1097_v52  ;;  %v979_v9 = vadd.f32 %v7906_v41, %v941_v2  ;;  %v980_v28 = vadd.f32 %v7906_v41, %v942_v61  ;;  %v905_v18 = vmul.f32 %v7878_v26, %v867_v4  ;;  %v906_v22 = vmul.f32 %v7878_v26, %v868_v7 }
 0x1d9   : > { %v1073_v49 = vsel %vm1009_vm13, %v977_v51, %v1041_v57  ;;  %v1074_v37 = vsel %vm1010_vm14, %v978_v13, %v1042_v59  ;;  %v907_v45 = vmul.f32 %v7878_v26, %v869_v14  ;;  %v908_v33 = vmul.f32 %v7878_v26, %v870_v19 }
 0x1da   : > { %v1098_v20 = vpack.c.bf16 %v1072_v54, %v1071_v60  ;;  %v1099_v39 = vpack.c.bf16 %v1074_v37, %v1073_v49  ;;  %v872_v4 = vsub.f32 %v7739_v55, %v7849_v17  ;;  %v1043_v7 = vmul.f32 0.2, %v979_v9 }
 0x1db   : > { %v943_v6 = vmul.f32 %v7889_v3, %v905_v18  ;;  %v944_v35 = vmul.f32 %v7889_v3, %v906_v22  ;;  %v945_v14 = vmul.f32 %v7889_v3, %v907_v45  ;;  %v1044_v47 = vmul.f32 0.2, %v980_v28 }
 0x1dc   : > { %v946_v42 = vmul.f32 %v7889_v3, %v908_v33  ;;  %v909_v19 = vmul.f32 %v7878_v26, %v871_v50  ;;  %v910_v24 = vmul.f32 %v7878_v26, %v872_v4  ;;  %vm1011_vm15 = vcmp.ge.f32.partialorder %v979_v9, 0.0 }
 0x1dd   : > { %6176 = vmatmul.mubr.bf16.gmra.mxu0 %v1098_v20  ;;  %vm1012_vm1 = vcmp.ge.f32.partialorder %v980_v28, 0.0  ;;  %v981_v55 = vadd.f32 %v7906_v41, %v943_v6  ;;  %v982_v62 = vadd.f32 %v7906_v41, %v944_v35  ;;  %v983_v38 = vadd.f32 %v7906_v41, %v945_v14 }
 0x1de   : > { %6179 = vmatprep.mubr.bf16.mxu0 %v1099_v39  ;;  %v984_v8 = vadd.f32 %v7906_v41, %v946_v42  ;;  %v947_v29 = vmul.f32 %v7889_v3, %v909_v19  ;;  %v948_v43 = vmul.f32 %v7889_v3, %v910_v24  ;;  %v1075_v16 = vsel %vm1011_vm15, %v979_v9, %v1043_v7 }
 0x1df   : > { %vm1013_vm2 = vcmp.ge.f32.partialorder %v981_v55, 0.0  ;;  %vm1014_vm3 = vcmp.ge.f32.partialorder %v982_v62, 0.0  ;;  %v1045_v48 = vmul.f32 0.2, %v981_v55  ;;  %v1046_v12 = vmul.f32 0.2, %v982_v62 }
 0x1e0   : > { %v1076_v5 = vsel %vm1012_vm1, %v980_v28, %v1044_v47  ;;  %v874_v0 = vsub.f32 %v7751_v15, %v7849_v17  ;;  %v875_v31 = vsub.f32 %v7757_v23, %v7849_v17  ;;  %v985_v21 = vadd.f32 %v7906_v41, %v947_v29  ;;  %v10937_v28 = vld [vmem:[#allocation21_spill] sm:$0xff] }
 0x1e1   : > { %v1077_v53 = vsel %vm1013_vm2, %v981_v55, %v1045_v48  ;;  %v1078_v58 = vsel %vm1014_vm3, %v982_v62, %v1046_v12  ;;  %v986_v32 = vadd.f32 %v7906_v41, %v948_v43  ;;  %v911_v63 = vmul.f32 %v7878_v26, %v873_v27 }
 0x1e2   : > { %v876_v1 = vsub.f32 %v7763_v34, %v7849_v17  ;;  %v877_v36 = vsub.f32 %v7769_v44, %v7849_v17  ;;  %v878_v15 = vsub.f32 %v10936_v46, %v7849_v17  ;;  %v1100_v51 = vpack.c.bf16 %v1076_v5, %v1075_v16 }
 0x1e3   : > { %vm1015_vm4 = vcmp.ge.f32.partialorder %v983_v38, 0.0  ;;  %v1047_v23 = vmul.f32 0.2, %v983_v38  ;;  %v1048_v56 = vmul.f32 0.2, %v984_v8  ;;  %v1101_v13 = vpack.c.bf16 %v1078_v58, %v1077_v53 }
 0x1e4   : > { %v912_v2 = vmul.f32 %v7878_v26, %v874_v0  ;;  %v949_v61 = vmul.f32 %v7889_v3, %v911_v63  ;;  %v913_v52 = vmul.f32 %v7878_v26, %v875_v31  ;;  %vm1016_vm5 = vcmp.ge.f32.partialorder %v984_v8, 0.0 }
 0x1e5   : > { %6180 = vmatmul.mubr.bf16.gmra.mxu0 %v1100_v51  ;;  %v1049_v34 = vmul.f32 0.2, %v985_v21  ;;  %v1050_v60 = vmul.f32 0.2, %v986_v32  ;;  %v914_v44 = vmul.f32 %v7878_v26, %v876_v1  ;;  %vm1017_vm6 = vcmp.ge.f32.partialorder %v985_v21, 0.0 }
 0x1e6   : > { %6183 = vmatprep.mubr.bf16.mxu0 %v1101_v13  ;;  %vm1018_vm7 = vcmp.ge.f32.partialorder %v986_v32, 0.0  ;;  %v950_v50 = vmul.f32 %v7889_v3, %v912_v2  ;;  %v951_v54 = vmul.f32 %v7889_v3, %v913_v52  ;;  %v915_v59 = vmul.f32 %v7878_v26, %v877_v36 }
 0x1e7   : > { %v952_v57 = vmul.f32 %v7889_v3, %v914_v44  ;;  %v916_v9 = vmul.f32 %v7878_v26, %v878_v15  ;;  %v879_v18 = vsub.f32 %v10937_v28, %v7849_v17  ;;  %v1079_v22 = vsel %vm1015_vm4, %v983_v38, %v1047_v23  ;;  %v8095_v28 = vld [vmem:[%s10794_s6 + $0x60] sm:$0xff] }
 0x1e8   : > { %v1080_v49 = vsel %vm1016_vm5, %v984_v8, %v1048_v56  ;;  %v987_v37 = vadd.f32 %v7906_v41, %v949_v61  ;;  %v988_v45 = vadd.f32 %v7906_v41, %v950_v50  ;;  %v1081_v33 = vsel %vm1017_vm6, %v985_v21, %v1049_v34  ;;  %v1851_v50 = vld [vmem:[%s10789_s1 + $0x10] sm:$0xff] }
 0x1e9   : > { %v1082_v20 = vsel %vm1018_vm7, %v986_v32, %v1050_v60  ;;  %v989_v39 = vadd.f32 %v7906_v41, %v951_v54  ;;  %v990_v4 = vadd.f32 %v7906_v41, %v952_v57  ;;  %v882_v27 = vsub.f32 %v7795_v30, %v7849_v17  ;;  %v8075_v57 = vld [vmem:[%s10794_s6 + $0x70] sm:$0xff] }
 0x1ea   : > { %v917_v7 = vmul.f32 %v7878_v26, %v879_v18  ;;  %v1102_v6 = vpack.c.bf16 %v1080_v49, %v1079_v22  ;;  %v953_v35 = vmul.f32 %v7889_v3, %v915_v59  ;;  %v954_v14 = vmul.f32 %v7889_v3, %v916_v9  ;;  %v8080_v59 = vld [vmem:[%s10789_s1 + $0x18] sm:$0xff]  ;;  %v8088_v9 = vld [vmem:[%s10794_s6 + $0x68] sm:$0xff] }
 0x1eb   : > { %v880_v47 = vsub.f32 %v7785_v11, %v7849_v17  ;;  %v1103_v42 = vpack.c.bf16 %v1082_v20, %v1081_v33  ;;  %vm1019_vm8 = vcmp.ge.f32.partialorder %v987_v37, 0.0  ;;  %v1051_v19 = vmul.f32 0.2, %v987_v37  ;;  %v8105_v22 = vld [vmem:[%s10789_s1 + $0x8] sm:$0xff]  ;;  %v8110_v49 = vld [vmem:[%s10794_s6 + $0x58] sm:$0xff]  ;;  %v8130_v33 = vld [vmem:[%s10794_s6 + $0x40] sm:$0xff] }
 0x1ec   : > { %v1052_v24 = vmul.f32 0.2, %v988_v45  ;;  %vm1020_vm9 = vcmp.ge.f32.partialorder %v988_v45, 0.0  ;;  %v1053_v55 = vmul.f32 0.2, %v989_v39  ;;  %vm1021_vm10 = vcmp.ge.f32.partialorder %v989_v39, 0.0 }
 0x1ed   : > { %6184 = vmatmul.mubr.bf16.gmra.mxu0 %v1102_v6  ;;  %v1054_v62 = vmul.f32 0.2, %v990_v4  ;;  %v918_v30 = vmul.f32 %v7878_v26, %v880_v47  ;;  %vm1022_vm11 = vcmp.ge.f32.partialorder %v990_v4, 0.0  ;;  %v955_v38 = vmul.f32 %v7889_v3, %v917_v7  ;;  %v8137_v20 = vld [vmem:[%s10789_s1 + $0x20] sm:$0xff]  ;;  %v8161_v7 = vld [vmem:[%s10794_s6 + $0x28] sm:$0xff]  ;;  %v8167_v6 = vld [vmem:[%s10789_s1 + $0x38] sm:$0xff] }
 0x1ee   : > { %6187 = vmatprep.mubr.bf16.mxu0 %v1103_v42  ;;  %v881_v8 = vsub.f32 %v7791_v25, %v7849_v17  ;;  %v991_v11 = vadd.f32 %v7906_v41, %v953_v35  ;;  %v992_v29 = vadd.f32 %v7906_v41, %v954_v14  ;;  %v1083_v48 = vsel %vm1019_vm8, %v987_v37, %v1051_v19  ;;  %v8115_v37 = vld [vmem:[%s10794_s6 + $0x50] sm:$0xff]  ;;  %v8173_v35 = vld [vmem:[%s10794_s6 + $0x20] sm:$0xff]  ;;  %v8180_v14 = vld [vmem:[%s10794_s6 + $0x18] sm:$0xff] }
 0x1ef   : > { %v956_v43 = vmul.f32 %v7889_v3, %v918_v30  ;;  %v1084_v12 = vsel %vm1020_vm9, %v988_v45, %v1052_v24  ;;  %v920_v5 = vmul.f32 %v7878_v26, %v882_v27  ;;  %v1085_v0 = vsel %vm1021_vm10, %v989_v39, %v1053_v55  ;;  %v8125_v45 = vld [vmem:[%s10794_s6 + $0x48] sm:$0xff]  ;;  %v8143_v39 = vld [vmem:[%s10794_s6 + $0x38] sm:$0xff]  ;;  %v8154_v27 = vld [vmem:[%s10794_s6 + $0x30] sm:$0xff] }
 0x1f0   : > { %v919_v16 = vmul.f32 %v7878_v26, %v881_v8  ;;  %v1086_v31 = vsel %vm1022_vm11, %v990_v4, %v1054_v62  ;;  %v993_v53 = vadd.f32 %v7906_v41, %v955_v38  ;;  %v1104_v25 = vpack.c.bf16 %v1084_v12, %v1083_v48  ;;  %v1855_v4 = vld [vmem:[%s10789_s1 + $0x30] sm:$0xff]  ;;  %v1854_v42 = vld [vmem:[%s10789_s1 + $0x28] sm:$0xff]  ;;  %v8206_v24 = vld [vmem:[%s10794_s6] sm:$0xff] }
 0x1f1   : > { %v994_v58 = vadd.f32 %v7906_v41, %v956_v43  ;;  %v1055_v17 = vmul.f32 0.2, %v991_v11  ;;  %v1105_v21 = vpack.c.bf16 %v1086_v31, %v1085_v0  ;;  %v1056_v32 = vmul.f32 0.2, %v992_v29  ;;  %v8188_v47 = vld [vmem:[%s10794_s6 + $0x10] sm:$0xff]  ;;  %v8198_v19 = vld [vmem:[%s10794_s6 + $0x8] sm:$0xff] }
 0x1f2   : > { %v957_v63 = vmul.f32 %v7889_v3, %v919_v16  ;;  %v958_v1 = vmul.f32 %v7889_v3, %v920_v5  ;;  %vm1023_vm12 = vcmp.ge.f32.partialorder %v991_v11, 0.0  ;;  %vm1024_vm13 = vcmp.ge.f32.partialorder %v992_v29, 0.0  ;;  %v8215_v55 = vld [vmem:[%s10789_s1 + $0x40] sm:$0xff]  ;;  %v1859_v62 = vld [vmem:[%s10789_s1 + $0x50] sm:$0xff]  ;;  %v8225_v30 = vld [vmem:[%s10789_s1 + $0x58] sm:$0xff] }
 0x1f3   : > { %v1057_v36 = vmul.f32 0.2, %v993_v53  ;;  %v1058_v46 = vmul.f32 0.2, %v994_v58  ;;  %vm1025_vm14 = vcmp.ge.f32.partialorder %v993_v53, 0.0  ;;  %vm1026_vm15 = vcmp.ge.f32.partialorder %v994_v58, 0.0 }
 0x1f4   : > { %v1087_v26 = vsel %vm1023_vm12, %v991_v11, %v1055_v17  ;;  %v1088_v15 = vsel %vm1024_vm13, %v992_v29, %v1056_v32  ;;  %v995_v51 = vadd.f32 %v7906_v41, %v957_v63  ;;  %v996_v23 = vadd.f32 %v7906_v41, %v958_v1  ;;  %v8070_v41 = vld [vmem:[%s10794_s6 + $0x78] sm:$0xff]  ;;  %v1858_v38 = vld [vmem:[%s10789_s1 + $0x48] sm:$0xff]  ;;  %v8235_v8 = vld [vmem:[%s10789_s1 + $0x60] sm:$0xff] }
 0x1f5   : > { %6188 = vmatmul.mubr.bf16.gmra.mxu0 %v1104_v25  ;;  %v1089_v56 = vsel %vm1025_vm14, %v993_v53, %v1057_v36  ;;  %v1090_v13 = vsel %vm1026_vm15, %v994_v58, %v1058_v46  ;;  %v1106_v2 = vpack.c.bf16 %v1088_v15, %v1087_v26  ;;  %v10820_v54 = vmov 0   ;;  %6200 = vmatpush3.msra.mxu1 %v8070_v41  ;;  %v8240_v11 = vld [vmem:[%s10789_s1] sm:$0xff]  ;;  %v1863_v29 = vld [vmem:[%s10789_s1 + $0x70] sm:$0xff]  ;;  %v8252_v43 = vld [vmem:[%s10789_s1 + $0x78] sm:$0xff] }
 0x1f6   : > { %6191 = vmatprep.mubr.bf16.mxu0 %v1105_v21  ;;  %v1107_v61 = vpack.c.bf16 %v1090_v13, %v1089_v56  ;;  %v1059_v52 = vmul.f32 0.2, %v995_v51  ;;  %v1060_v3 = vmul.f32 0.2, %v996_v23  ;;  %vm1027_vm1 = vcmp.ge.f32.partialorder %v995_v51, 0.0  ;;  %6917 = vset.pattern.permute.xlu1 %v10820_v54  ;;  %v1862_v48 = vld [vmem:[%s10789_s1 + $0x68] sm:$0xff] }
 0x1f7   : > { %vm1028_vm2 = vcmp.ge.f32.partialorder %v996_v23, 0.0  ;;  %6916 = vset.pattern.permute.xlu0 %v10820_v54  ;;  %2022 = vperm.xlu1 %6917, %v1851_v50   ;;  %v10822_v18 = vmov 1   ;;  %v1866_v0 = vld [vmem:[%s10789_s1 + $0x88] sm:$0xff]  ;;  %v8281_v21 = vld [vmem:[%s10789_s1 + $0x80] sm:$0xff]  ;;  %v1867_v56 = vld [vmem:[%s10789_s1 + $0x90] sm:$0xff]  ;;  %vm1913_vm8 = vcmask 1040384  }
 0x1f8   : > { %v1091_v34 = vsel %vm1027_vm1, %v995_v51, %v1059_v52  ;;  %v1092_v60 = vsel %vm1028_vm2, %v996_v23, %v1060_v3  ;;  %6201 = vmatprep.subr.mxu1 %v10934_v40  ;;  %2012 = vperm.xlu0 %6916, %v8240_v11   ;;  %v8289_v36 = vld [vmem:[%s10789_s1 + $0xa8] sm:$0xff] }
 0x1f9   : > { %v1108_v44 = vpack.c.bf16 %v1092_v60, %v1091_v34  ;;  %6202 = vmatpush3.msra.mxu1 %v8075_v57  ;;  %v8310_v52 = vld [vmem:[%s10789_s1 + $0xc8] sm:$0xff] }
 0x1fa   : > { %6203 = vmatprep.subr.mxu1 %v10934_v40 }
 0x1fb   : > { %2027 = vperm.xlu1 %6917, %v8080_v59   ;;  %6204 = vmatpush3.msra.mxu1 %v8088_v9 }
 0x1fc   : > { %6205 = vmatprep.subr.mxu1 %v10934_v40  ;;  %2017 = vperm.xlu0 %6916, %v8105_v22  }
 0x1fd   : > { %6192 = vmatmul.mubr.bf16.gmra.mxu0 %v1106_v2  ;;  %6206 = vmatpush3.msra.mxu1 %v8095_v28 }
 0x1fe   : > { %6195 = vmatprep.mubr.bf16.mxu0 %v1107_v61  ;;  %6207 = vmatprep.subr.mxu1 %v10934_v40 }
 0x1ff   : > { %6918 = vset.pattern.permute.xlu1 %v10822_v18  ;;  %6208 = vmatpush3.msra.mxu1 %v8110_v49 }
 0x200   : > { %2336 = vperm.xlu1 %6918, %v8105_v22   ;;  %6209 = vmatprep.subr.mxu1 %v10934_v40  ;;  %v8322_v22 = vld [vmem:[%s10789_s1 + $0x98] sm:$0xff] }
 0x201   : > { %6210 = vmatpush3.msra.mxu1 %v8115_v37  ;;  %2037 = vperm.xlu0 %6916, %v1854_v42  }
 0x202   : > { %6211 = vmatprep.subr.mxu1 %v10934_v40 }
 0x203   : > { %6212 = vmatpush3.msra.mxu1 %v8125_v45 }
 0x204   : > { %2340 = vperm.xlu1 %6918, %v1851_v50   ;;  %6213 = vmatprep.subr.mxu1 %v10934_v40 }
 0x205   : > { %6196 = vmatmul.mubr.bf16.gmra.mxu0 %v1108_v44  ;;  %6214 = vmatpush3.msra.mxu1 %v8130_v33 }
 0x206   : > { %6215 = vmatprep.subr.mxu1 %v10934_v40  ;;  %2057 = vperm.xlu0 %6916, %v1858_v38  }
 0x207   : > { %6216 = vmatpush3.msra.mxu1 %v8143_v39 }
 0x208   : > { %6919 = vset.pattern.permute.xlu1 %v10820_v54  ;;  %6217 = vmatprep.subr.mxu1 %v10934_v40 }
 0x209   : > { %2032 = vperm.xlu1 %6919, %v8137_v20   ;;  %6218 = vmatpush3.msra.mxu1 %v8154_v27 }
 0x20a   : > { %6219 = vmatprep.subr.mxu1 %v10934_v40  ;;  %2077 = vperm.xlu0 %6916, %v1862_v48  }
 0x20b   : > { %6220 = vmatpush3.msra.mxu1 %v8161_v7 }
 0x20c   : > { %6221 = vmatprep.subr.mxu1 %v10934_v40 }
 0x20d   : > { %2042 = vperm.xlu1 %6919, %v1855_v4   ;;  %6222 = vmatpush3.msra.mxu1 %v8173_v35 }
 0x20e   : > { %6223 = vmatprep.subr.mxu1 %v10934_v40  ;;  %2097 = vperm.xlu0 %6916, %v1866_v0  }
 0x20f   : > { %6224 = vmatpush3.msra.mxu1 %v8180_v14 }
 0x210   : > { %6225 = vmatprep.subr.mxu1 %v10934_v40 }
 0x211   : > { %2047 = vperm.xlu1 %6919, %v8167_v6   ;;  %6226 = vmatpush3.msra.mxu1 %v8188_v47 }
 0x212   : > { %6227 = vmatprep.subr.mxu1 %v10934_v40  ;;  %2117 = vperm.xlu0 %6916, %v8289_v36  }
 0x213   : > { %6228 = vmatpush3.msra.mxu1 %v8198_v19 }
 0x214   : > { %6229 = vmatprep.subr.mxu1 %v10934_v40 }
 0x215   : > { %6920 = vset.pattern.permute.xlu1 %v10822_v18  ;;  %6230 = vmatpush3.msra.mxu1 %v8206_v24 }
 0x216   : > { %2352 = vperm.xlu1 %6920, %v1854_v42   ;;  %6234 = vmatprep.subr.mxu1 %v10934_v40 }
 0x217   : > { %2137 = vperm.xlu0 %6916, %v8310_v52  }
 0x21a   : > { %2356 = vperm.xlu1 %6920, %v1855_v4  }
 0x21e   : > { %6921 = vset.pattern.permute.xlu1 %v10820_v54 }
 0x21f   : > { %2052 = vperm.xlu1 %6921, %v8215_v55  }
 0x223   : > { %2062 = vperm.xlu1 %6921, %v1859_v62  }
 0x227   : > { %2067 = vperm.xlu1 %6921, %v8225_v30  }
 0x22b   : > { %6922 = vset.pattern.permute.xlu1 %v10822_v18 }
 0x22c   : > { %2368 = vperm.xlu1 %6922, %v1858_v38   ;;  %v8331_v38 = vld [vmem:[%s10789_s1 + $0xe8] sm:$0xff] }
 0x22d   : > { %2157 = vperm.xlu0 %6916, %v8331_v38  }
 0x230   : > { %2372 = vperm.xlu1 %6922, %v1859_v62  }
 0x231   : > { %6932 = vset.pattern.permute.xlu0 %v10822_v18 }
 0x232   : > { %2332 = vperm.xlu0 %6932, %v8240_v11  }
 0x234   : > { %6923 = vset.pattern.permute.xlu1 %v10820_v54 }
 0x235   : > { %2072 = vperm.xlu1 %6923, %v8235_v8  }
 0x236   : > { %2344 = vperm.xlu0 %6932, %v8080_v59  }
 0x239   : > { %2082 = vperm.xlu1 %6923, %v1863_v29  }
 0x23a   : > { %2348 = vperm.xlu0 %6932, %v8137_v20  }
 0x23d   : > { %2087 = vperm.xlu1 %6923, %v8252_v43  }
 0x23e   : > { %2360 = vperm.xlu0 %6932, %v8167_v6  }
 0x241   : > { %6924 = vset.pattern.permute.xlu1 %v10822_v18 }
 0x242   : > { %2384 = vperm.xlu1 %6924, %v1862_v48   ;;  %2364 = vperm.xlu0 %6932, %v8215_v55  }
 0x246   : > { %2388 = vperm.xlu1 %6924, %v1863_v29   ;;  %2376 = vperm.xlu0 %6932, %v8225_v30  }
 0x24a   : > { %6925 = vset.pattern.permute.xlu1 %v10820_v54  ;;  %2380 = vperm.xlu0 %6932, %v8235_v8  }
 0x24b   : > { %2092 = vperm.xlu1 %6925, %v8281_v21  }
 0x24e   : > { %2392 = vperm.xlu0 %6932, %v8252_v43  }
 0x24f   : > { %2102 = vperm.xlu1 %6925, %v1867_v56  }
 0x252   : > { %2396 = vperm.xlu0 %6932, %v8281_v21  }
 0x253   : > { %2107 = vperm.xlu1 %6925, %v8322_v22  }
 0x256   : > { %2408 = vperm.xlu0 %6932, %v8322_v22  }
 0x257   : > { %6926 = vset.pattern.permute.xlu1 %v10822_v18 }
 0x258   : > { %2400 = vperm.xlu1 %6926, %v1866_v0  }
 0x25c   : > { %2404 = vperm.xlu1 %6926, %v1867_v56  }
 0x260   : > { %6927 = vset.pattern.permute.xlu1 %v10820_v54 }
 0x28d   : > { %v8258_v12 = vpop.f32.mrf.mxu0 }
 0x28e   : > { %v1392_v32 = vmul.f32 %v8258_v12, %v8258_v12 }
 0x28f   : > { %v8261_v16 = vpop.f32.mrf.mxu0 }
 0x290   : > { %v1390_v53 = vmul.f32 %v8261_v16, %v8261_v16 }
 0x291   : > { %v8263_v5 = vpop.f32.mrf.mxu0 }
 0x292   : > { %v1393_v26 = vmul.f32 %v8263_v5, %v8263_v5 }
 0x293   : > { %v8268_v31 = vpop.f32.mrf.mxu0 }
 0x294   : > { %v1352_v58 = vadd.f32 %v8268_v31, %v8261_v16  ;;  %v1391_v25 = vmul.f32 %v8268_v31, %v8268_v31 }
 0x295   : > { %v8276_v17 = vpop.f32.mrf.mxu0 }
 0x296   : > { %v1422_v63 = vadd.f32 %v1391_v25, %v1390_v53  ;;  %v1353_v1 = vadd.f32 %v8258_v12, %v1352_v58  ;;  %v1396_v4 = vmul.f32 %v8276_v17, %v8276_v17 }
 0x297   : > { %v8291_v46 = vpop.f32.mrf.mxu0 }
 0x298   : > { %v1354_v15 = vadd.f32 %v8263_v5, %v1353_v1  ;;  %v1423_v51 = vadd.f32 %v1422_v63, %v1392_v32  ;;  %v1394_v2 = vmul.f32 %v8291_v46, %v8291_v46 }
 0x299   : > { %v8298_v23 = vpop.f32.mrf.mxu0 }
 0x29a   : > { %v1355_v13 = vadd.f32 %v1354_v15, %v8291_v46  ;;  %v1424_v61 = vadd.f32 %v1423_v51, %v1393_v26  ;;  %v1397_v48 = vmul.f32 %v8298_v23, %v8298_v23 }
 0x29b   : > { %v8312_v3 = vpop.f32.mrf.mxu0 }
 0x29c   : > { %v1425_v34 = vadd.f32 %v1424_v61, %v1394_v2  ;;  %v1356_v60 = vadd.f32 %v1355_v13, %v8312_v3  ;;  %v1395_v44 = vmul.f32 %v8312_v3, %v8312_v3 }
 0x29d   : > { %v8317_v50 = vpop.f32.mrf.mxu0 }
 0x29e   : > { %v1426_v42 = vadd.f32 %v1425_v34, %v1395_v44  ;;  %v1357_v62 = vadd.f32 %v8276_v17, %v1356_v60  ;;  %v1400_v61 = vmul.f32 %v8317_v50, %v8317_v50 }
 0x29f   : > { %v8333_v29 = vpop.f32.mrf.mxu0 }
 0x2a0   : > { %v1358_v53 = vadd.f32 %v8298_v23, %v1357_v62  ;;  %v1427_v58 = vadd.f32 %v1426_v42, %v1396_v4  ;;  %v1398_v63 = vmul.f32 %v8333_v29, %v8333_v29 }
 0x2a1   : > { %v8339_v25 = vpop.f32.mrf.mxu0 }
 0x2a2   : > { %v1359_v32 = vadd.f32 %v1358_v53, %v8333_v29  ;;  %v1428_v1 = vadd.f32 %v1427_v58, %v1397_v48  ;;  %v1401_v4 = vmul.f32 %v8339_v25, %v8339_v25 }
 0x2a3   : > { %v8345_v26 = vpop.f32.mrf.mxu0 }
 0x2a4   : > { %v1429_v15 = vadd.f32 %v1428_v1, %v1398_v63  ;;  %v1360_v51 = vadd.f32 %v1359_v32, %v8345_v26  ;;  %v1399_v13 = vmul.f32 %v8345_v26, %v8345_v26  ;;  %v8374_v32 = vld [vmem:[%s10789_s1 + $0xa0] sm:$0xff] }
 0x2a5   : > { %v8351_v2 = vpop.f32.mrf.mxu0  ;;  %2112 = vperm.xlu1 %6927, %v8374_v32   ;;  %2412 = vperm.xlu0 %6932, %v8374_v32  }
 0x2a6   : > { %v1430_v34 = vadd.f32 %v1429_v15, %v1399_v13  ;;  %v1361_v60 = vadd.f32 %v8317_v50, %v1360_v51  ;;  %v1404_v59 = vmul.f32 %v8351_v2, %v8351_v2 }
 0x2a7   : > { %v8358_v44 = vpop.f32.mrf.mxu0 }
 0x2a8   : > { %v1362_v42 = vadd.f32 %v8339_v25, %v1361_v60  ;;  %v1431_v62 = vadd.f32 %v1430_v34, %v1400_v61  ;;  %v1402_v53 = vmul.f32 %v8358_v44, %v8358_v44  ;;  %v1871_v34 = vld [vmem:[%s10789_s1 + $0xb0] sm:$0xff] }
 0x2a9   : > { %v8363_v48 = vpop.f32.mrf.mxu0  ;;  %2122 = vperm.xlu1 %6927, %v1871_v34  }
 0x2aa   : > { %v1363_v0 = vadd.f32 %v1362_v42, %v8358_v44  ;;  %v1432_v58 = vadd.f32 %v1431_v62, %v1401_v4  ;;  %v1405_v60 = vmul.f32 %v8363_v48, %v8363_v48 }
 0x2ab   : > { %v8369_v11 = vpop.f32.mrf.mxu0 }
 0x2ac   : > { %v1433_v63 = vadd.f32 %v1432_v58, %v1402_v53  ;;  %v1364_v1 = vadd.f32 %v1363_v0, %v8369_v11  ;;  %v1403_v56 = vmul.f32 %v8369_v11, %v8369_v11 }
 0x2ad   : > { %v8379_v15 = vpop.f32.mrf.mxu0 }
 0x2ae   : > { %v1434_v51 = vadd.f32 %v1433_v63, %v1403_v56  ;;  %v1365_v13 = vadd.f32 %v8351_v2, %v1364_v1  ;;  %v8406_v63 = vld [vmem:[%s10789_s1 + $0xb8] sm:$0xff] }
 0x2af   : > { %v8387_v61 = vpop.f32.mrf.mxu0  ;;  %2127 = vperm.xlu1 %6927, %v8406_v63   ;;  %2424 = vperm.xlu0 %6932, %v8406_v63  }
 0x2b0   : > { %v1366_v4 = vadd.f32 %v8363_v48, %v1365_v13  ;;  %v1435_v42 = vadd.f32 %v1434_v51, %v1404_v59  ;;  %v1406_v53 = vmul.f32 %v8387_v61, %v8387_v61  ;;  %v1408_v13 = vmul.f32 %v8379_v15, %v8379_v15 }
 0x2b1   : > { %v8395_v62 = vpop.f32.mrf.mxu0 }
 0x2b2   : > { %v1367_v0 = vadd.f32 %v1366_v4, %v8387_v61  ;;  %v1436_v20 = vadd.f32 %v1435_v42, %v1405_v60  ;;  %v1409_v42 = vmul.f32 %v8395_v62, %v8395_v62 }
 0x2b3   : > { %v8401_v58 = vpop.f32.mrf.mxu0  ;;  %6928 = vset.pattern.permute.xlu1 %v10822_v18  ;;  %v1873_v18 = vld [vmem:[%s10789_s1 + $0xc0] sm:$0xff] }
 0x2b4   : > { %v1437_v1 = vadd.f32 %v1436_v20, %v1406_v53  ;;  %v1368_v56 = vadd.f32 %v1367_v0, %v8401_v58  ;;  %v1407_v59 = vmul.f32 %v8401_v58, %v8401_v58  ;;  %2416 = vperm.xlu1 %6928, %v8289_v36   ;;  %2428 = vperm.xlu0 %6932, %v1873_v18  }
 0x2b5   : > { %v8411_v51 = vpop.f32.mrf.mxu0 }
 0x2b6   : > { %10938 = vst [vmem:[#allocation20_spill] sm:$0xff] %v8411_v51  ;;  %v1438_v60 = vadd.f32 %v1437_v1, %v1407_v59  ;;  %v1369_v6 = vadd.f32 %v8379_v15, %v1368_v56 }
 0x2b7   : > { %v8418_v4 = vpop.f32.mrf.mxu0 }
 0x2b8   : > { %10939 = vst [vmem:[#allocation21_spill] sm:$0xff] %v8418_v4  ;;  %v1370_v0 = vadd.f32 %v8395_v62, %v1369_v6  ;;  %v1439_v53 = vadd.f32 %v1438_v60, %v1408_v13  ;;  %v1410_v1 = vmul.f32 %v8418_v4, %v8418_v4  ;;  %2420 = vperm.xlu1 %6928, %v1871_v34   ;;  %v10943_v34 = vmov 0  }
 0x2b9   : > { %v8423_v20 = vpop.f32.mrf.mxu0 }
 0x2ba   : > { %10940 = vst [vmem:[#allocation23_spill] sm:$0xff] %v8423_v20  ;;  %v1371_v54 = vadd.f32 %v1370_v0, %v8418_v4  ;;  %v1440_v56 = vadd.f32 %v1439_v53, %v1409_v42  ;;  %v1412_v0 = vmul.f32 %v8411_v51, %v8411_v51  ;;  %v1413_v36 = vmul.f32 %v8423_v20, %v8423_v20 }
 0x2bb   : > { %v8430_v55 = vpop.f32.mrf.mxu0 }
 0x2bc   : > { %10941 = vst [vmem:[#allocation24_spill] sm:$0xff] %v8430_v55  ;;  %v1441_v59 = vadd.f32 %v1440_v56, %v1410_v1  ;;  %v1372_v6 = vadd.f32 %v1371_v54, %v8430_v55  ;;  %v1411_v13 = vmul.f32 %v8430_v55, %v8430_v55  ;;  %6929 = vset.pattern.permute.xlu1 %v10943_v34 }
 0x2bd   : > { %v8436_v60 = vpop.f32.mrf.mxu0  ;;  %2132 = vperm.xlu1 %6929, %v1873_v18  }
 0x2be   : > { %v1442_v42 = vadd.f32 %v1441_v59, %v1411_v13  ;;  %v1373_v53 = vadd.f32 %v8411_v51, %v1372_v6  ;;  %v1416_v21 = vmul.f32 %v8436_v60, %v8436_v60 }
 0x2bf   : > { %v8442_v30 = vpop.f32.mrf.mxu0 }
 0x2c0   : > { %10942 = vst [vmem:[#allocation25_spill] sm:$0xff] %v8442_v30  ;;  %v1374_v54 = vadd.f32 %v8423_v20, %v1373_v53  ;;  %v1443_v1 = vadd.f32 %v1442_v42, %v1412_v0  ;;  %v1414_v13 = vmul.f32 %v8442_v30, %v8442_v30  ;;  %v1875_v53 = vld [vmem:[%s10789_s1 + $0xd0] sm:$0xff]  ;;  %v1876_v20 = vld [vmem:[%s10789_s1 + $0xd8] sm:$0xff] }
 0x2c1   : > { %v8447_v56 = vpop.f32.mrf.mxu0  ;;  %2142 = vperm.xlu1 %6929, %v1875_v53   ;;  %2440 = vperm.xlu0 %6932, %v1876_v20  }
 0x2c2   : > { %v1375_v59 = vadd.f32 %v1374_v54, %v8442_v30  ;;  %v1444_v6 = vadd.f32 %v1443_v1, %v1413_v36 }
 0x2c3   : > { %v8454_v8 = vpop.f32.mrf.mxu0 }
 0x2c4   : > { %v1376_v0 = vadd.f32 %v1375_v59, %v8454_v8  ;;  %v1445_v54 = vadd.f32 %v1444_v6, %v1414_v13  ;;  %v1415_v43 = vmul.f32 %v8454_v8, %v8454_v8 }
 0x2c5   : > { %v8460_v42 = vpop.f32.mrf.mxu0  ;;  %2147 = vperm.xlu1 %6929, %v1876_v20  }
 0x2c6   : > { %v1377_v36 = vadd.f32 %v8436_v60, %v1376_v0  ;;  %v1446_v51 = vadd.f32 %v1445_v54, %v1415_v43  ;;  %v1417_v54 = vmul.f32 %v8447_v56, %v8447_v56  ;;  %v10944_v43 = vmov 1  }
 0x2c7   : > { %v8469_v1 = vpop.f32.mrf.mxu0 }
 0x2c8   : > { %v1378_v30 = vadd.f32 %v8447_v56, %v1377_v36  ;;  %v1447_v36 = vadd.f32 %v1446_v51, %v1416_v21  ;;  %v1418_v51 = vmul.f32 %v8469_v1, %v8469_v1 }
 0x2c9   : > { %v8472_v59 = vpop.f32.mrf.mxu0  ;;  %6930 = vset.pattern.permute.xlu1 %v10944_v43 }
 0x2ca   : > { %v1379_v6 = vadd.f32 %v1378_v30, %v8469_v1  ;;  %2432 = vperm.xlu1 %6930, %v8310_v52   ;;  %v1448_v22 = vadd.f32 %v1447_v36, %v1417_v54 }
 0x2cb   : > { %v8479_v13 = vpop.f32.mrf.mxu0 }
 0x2cc   : > { %v1380_v0 = vadd.f32 %v1379_v6, %v8479_v13  ;;  %v1449_v21 = vadd.f32 %v1448_v22, %v1418_v51  ;;  %v1419_v32 = vmul.f32 %v8479_v13, %v8479_v13  ;;  %v1421_v22 = vmul.f32 %v8472_v59, %v8472_v59 }
 0x2ce   : > { %v1381_v55 = vadd.f32 %v8460_v42, %v1380_v0  ;;  %2436 = vperm.xlu1 %6930, %v1875_v53   ;;  %v1450_v36 = vadd.f32 %v1449_v21, %v1419_v32  ;;  %v1420_v53 = vmul.f32 %v8460_v42, %v8460_v42 }
 0x2d0   : > { %v1382_v30 = vadd.f32 %v8472_v59, %v1381_v55  ;;  %v1877_v55 = vld [vmem:[%s10789_s1 + $0xe0] sm:$0xff]  ;;  %v1451_v18 = vadd.f32 %v1450_v36, %v1420_v53  ;;  %v6949_v36 = vld [vmem:[#allocation7 + $0xf0] sm:$0xff]   ;;  %v6950_v53 = vld [vmem:[#allocation7 + $0xe8] sm:$0xff]  }
 0x2d1   : > { %2444 = vperm.xlu0 %6932, %v1877_v55  }
 0x2d2   : > { %v1383_v4 = vrot.slane %v1382_v30, 4  ;;  %6931 = vset.pattern.permute.xlu1 %v10943_v34  ;;  %v1880_v34 = vld [vmem:[%s10789_s1 + $0xf8] sm:$0xff]  ;;  %v1452_v20 = vadd.f32 %v1451_v18, %v1421_v22  ;;  %v6952_v18 = vld [vmem:[#allocation7 + $0xe0] sm:$0xff]  }
 0x2d3   : > { %2152 = vperm.xlu1 %6931, %v1877_v55  }
 0x2d4   : > { %v1384_v6 = vadd.f32 %v1383_v4, %v1382_v30  ;;  %v1879_v4 = vld [vmem:[%s10789_s1 + $0xf0] sm:$0xff]  ;;  %v1453_v51 = vrot.slane %v1452_v20, 4 }
 0x2d5   : > { %2456 = vperm.xlu0 %6932, %v1880_v34  }
 0x2d6   : > { %v1385_v0 = vrot.slane %v1384_v6, 2 }
 0x2d7   : > { %2162 = vperm.xlu1 %6931, %v1879_v4  }
 0x2d8   : > { %v1386_v52 = vadd.f32 %v1385_v0, %v1384_v6  ;;  %v6947_v0 = vld [vmem:[#allocation7 + $0xf8] sm:$0xff]  }
 0x2da   : > { %v1387_v63 = vrot.slane %v1386_v52, 1 }
 0x2db   : > { %2167 = vperm.xlu1 %6931, %v1880_v34   ;;  %v6948_v34 = vld [vmem:[#allocation7 + $0x110] sm:$0xff]  }
 0x2dc   : > { %v1388_v54 = vadd.f32 %v1387_v63, %v1386_v52  ;;  %v6946_v52 = vld [vmem:[#allocation7 + $0x118] sm:$0xff]  }
 0x2de   : > { %v1389_v30 = vmul.f32 0.00390625, %v1388_v54 }
 0x2df   : > { %6933 = vset.pattern.permute.xlu1 %v10944_v43 }
 0x2e0   : > { %6232 = vmatmul.mubr.f32.vlgmr.msra.gmra.mxu1 %v1389_v30  ;;  %2448 = vperm.xlu1 %6933, %v8331_v38  }
 0x2e1   : > { %6235 = vmatpush3.msra.mxu1 %v8070_v41  ;;  %6266 = vmatprep.mubr.msk.f32.mxu1 %vm10833_vm0, %v10934_v40  ;;  %v1454_v41 = vadd.f32 %v1453_v51, %v1452_v20  ;;  %v6951_v20 = vld [vmem:[#allocation7 + $0x108] sm:$0xff]   ;;  %v8575_v51 = vpop.permute.xlu0 %2012 }
 0x2e2   : > { %6236 = vmatprep.subr.mxu1 %v10934_v40 }
 0x2e3   : > { %6237 = vmatpush3.msra.mxu1 %v8075_v57  ;;  %v1455_v57 = vrot.slane %v1454_v41, 2 }
 0x2e4   : > { %6238 = vmatprep.subr.mxu1 %v10934_v40  ;;  %2452 = vperm.xlu1 %6933, %v1879_v4  }
 0x2e5   : > { %6239 = vmatpush3.msra.mxu1 %v8088_v9  ;;  %v1456_v9 = vadd.f32 %v1455_v57, %v1454_v41  ;;  %v6953_v41 = vld [vmem:[#allocation7 + $0xd8] sm:$0xff]  }
 0x2e6   : > { %6240 = vmatprep.subr.mxu1 %v10934_v40 }
 0x2e7   : > { %6241 = vmatpush3.msra.mxu1 %v8095_v28  ;;  %v1457_v28 = vrot.slane %v1456_v9, 1 }
 0x2e8   : > { %6242 = vmatprep.subr.mxu1 %v10934_v40 }
 0x2e9   : > { %6243 = vmatpush3.msra.mxu1 %v8110_v49  ;;  %v1458_v49 = vadd.f32 %v1457_v28, %v1456_v9  ;;  %v8579_v9 = vpop.permute.xlu0 %2017  ;;  %v6955_v28 = vld [vmem:[#allocation7 + $0xd0] sm:$0xff]  }
 0x2ea   : > { %6244 = vmatprep.subr.mxu1 %v10934_v40 }
 0x2eb   : > { %6245 = vmatpush3.msra.mxu1 %v8115_v37  ;;  %v1459_v37 = vmul.f32 0.00390625, %v1458_v49 }
 0x2ec   : > { %6246 = vmatprep.subr.mxu1 %v10934_v40 }
 0x2ed   : > { %6247 = vmatpush3.msra.mxu1 %v8125_v45  ;;  %v6942_v45 = vld [vmem:[#allocation7 + $0x138] sm:$0xff]  }
 0x2ee   : > { %6248 = vmatprep.subr.mxu1 %v10934_v40  ;;  %6269 = vmatprep.subr.bf16.mxu0 %v6942_v45 }
 0x2ef   : > { %6249 = vmatpush3.msra.mxu1 %v8130_v33  ;;  %v6943_v33 = vld [vmem:[#allocation7 + $0x130] sm:$0xff]   ;;  %6270 = vmatpush3.bf16.msra.mxu0 %v6942_v45  ;;  %v8583_v45 = vpop.permute.xlu0 %2037 }
 0x2f0   : > { %6250 = vmatprep.subr.mxu1 %v10934_v40  ;;  %6271 = vmatprep.subr.bf16.mxu0 %v6943_v33 }
 0x2f1   : > { %6251 = vmatpush3.msra.mxu1 %v8143_v39  ;;  %v6944_v39 = vld [vmem:[#allocation7 + $0x128] sm:$0xff]  }
 0x2f2   : > { %6252 = vmatprep.subr.mxu1 %v10934_v40 }
 0x2f3   : > { %6253 = vmatpush3.msra.mxu1 %v8154_v27  ;;  %6272 = vmatpush3.bf16.msra.mxu0 %v6943_v33  ;;  %v6945_v27 = vld [vmem:[#allocation7 + $0x120] sm:$0xff]   ;;  %v6956_v33 = vld [vmem:[#allocation7 + $0xc8] sm:$0xff]  }
 0x2f4   : > { %6254 = vmatprep.subr.mxu1 %v10934_v40  ;;  %6273 = vmatprep.subr.bf16.mxu0 %v6944_v39 }
 0x2f5   : > { %6255 = vmatpush3.msra.mxu1 %v8161_v7  ;;  %v8545_v7 = vpop.permute.xlu1 %2022 }
 0x2f6   : > { %6256 = vmatprep.subr.mxu1 %v10934_v40 }
 0x2f7   : > { %6257 = vmatpush3.msra.mxu1 %v8173_v35  ;;  %6274 = vmatpush3.bf16.msra.mxu0 %v6944_v39 }
 0x2f8   : > { %6258 = vmatprep.subr.mxu1 %v10934_v40  ;;  %6275 = vmatprep.subr.bf16.mxu0 %v6945_v27 }
 0x2f9   : > { %6259 = vmatpush3.msra.mxu1 %v8180_v14  ;;  %v8547_v35 = vpop.permute.xlu1 %2027 }
 0x2fa   : > { %6260 = vmatprep.subr.mxu1 %v10934_v40 }
 0x2fb   : > { %6261 = vmatpush3.msra.mxu1 %v8188_v47  ;;  %6276 = vmatpush3.bf16.msra.mxu0 %v6945_v27  ;;  %v8587_v27 = vpop.permute.xlu0 %2057 }
 0x2fc   : > { %6262 = vmatprep.subr.mxu1 %v10934_v40  ;;  %6277 = vmatprep.subr.bf16.mxu0 %v6946_v52 }
 0x2fd   : > { %6263 = vmatpush3.msra.mxu1 %v8198_v19  ;;  %v8549_v14 = vpop.permute.xlu1 %2336 }
 0x2fe   : > { %6264 = vmatprep.subr.mxu1 %v10934_v40  ;;  %10945 = vst [vmem:[#allocation26_spill] sm:$0xff] %v8549_v14 }
 0x2ff   : > { %6265 = vmatpush3.msra.mxu1 %v8206_v24  ;;  %6278 = vmatpush3.bf16.msra.mxu0 %v6946_v52  ;;  %v6958_v52 = vld [vmem:[#allocation7 + $0xc0] sm:$0xff]  }
 0x300   : > { %6267 = vmatmul.mubr.f32.vlgmr.msra.gmra.mxu1 %v1459_v37  ;;  %6317 = vmatprep.subr.bf16.mxu1 %v6947_v0  ;;  %v6954_v37 = vld [vmem:[#allocation7 + $0x100] sm:$0xff]  }
 0x301   : > { %v8551_v47 = vpop.permute.xlu1 %2340  ;;  %6318 = vmatpush3.bf16.msra.mxu1 %v6947_v0  ;;  %6279 = vmatprep.subr.bf16.mxu0 %v6948_v34 }
 0x302   : > { %10946 = vst [vmem:[#allocation27_spill] sm:$0xff] %v8551_v47  ;;  %6319 = vmatprep.subr.bf16.mxu1 %v6949_v36 }
 0x303   : > { %6280 = vmatpush3.bf16.msra.mxu0 %v6948_v34 }
 0x304   : > { %6281 = vmatprep.subr.bf16.mxu0 %v6951_v20 }
 0x305   : > { %v8553_v19 = vpop.permute.xlu1 %2032  ;;  %6320 = vmatpush3.bf16.msra.mxu1 %v6949_v36 }
 0x306   : > { %6321 = vmatprep.subr.bf16.mxu1 %v6950_v53 }
 0x307   : > { %6282 = vmatpush3.bf16.msra.mxu0 %v6951_v20 }
 0x308   : > { %6283 = vmatprep.subr.bf16.mxu0 %v6954_v37 }
 0x309   : > { %v8555_v24 = vpop.permute.xlu1 %2042  ;;  %6322 = vmatpush3.bf16.msra.mxu1 %v6950_v53 }
 0x30a   : > { %6323 = vmatprep.subr.bf16.mxu1 %v6952_v18 }
 0x30b   : > { %6284 = vmatpush3.bf16.msra.mxu0 %v6954_v37 }
 0x30d   : > { %v8557_v38 = vpop.permute.xlu1 %2047  ;;  %6324 = vmatpush3.bf16.msra.mxu1 %v6952_v18  ;;  %v8589_v18 = vld [vmem:[#allocation7 + $0x178] sm:$0xff]  }
 0x30e   : > { %6325 = vmatprep.subr.bf16.mxu1 %v6953_v41  ;;  %10955 = vst [vmem:[#allocation36_spill] sm:$0xff] %v8589_v18  ;;  %6365 = vmatprep.subr.bf16.mxu0 %v8589_v18 }
 0x311   : > { %v8559_v43 = vpop.permute.xlu1 %2352  ;;  %6326 = vmatpush3.bf16.msra.mxu1 %v6953_v41  ;;  %v8594_v41 = vpop.permute.xlu0 %2077 }
 0x312   : > { %10947 = vst [vmem:[#allocation28_spill] sm:$0xff] %v8559_v43  ;;  %6327 = vmatprep.subr.bf16.mxu1 %v6955_v28  ;;  %10957 = vst [vmem:[#allocation38_spill] sm:$0xff] %v8594_v41 }
 0x315   : > { %v8561_v6 = vpop.permute.xlu1 %2356  ;;  %6328 = vmatpush3.bf16.msra.mxu1 %v6955_v28 }
 0x316   : > { %10948 = vst [vmem:[#allocation29_spill] sm:$0xff] %v8561_v6  ;;  %6329 = vmatprep.subr.bf16.mxu1 %v6956_v33 }
 0x319   : > { %v8563_v21 = vpop.permute.xlu1 %2052  ;;  %6330 = vmatpush3.bf16.msra.mxu1 %v6956_v33  ;;  %v8598_v33 = vpop.permute.xlu0 %2097 }
 0x31a   : > { %6331 = vmatprep.subr.bf16.mxu1 %v6958_v52  ;;  %10959 = vst [vmem:[#allocation40_spill] sm:$0xff] %v8598_v33 }
 0x31d   : > { %v8565_v32 = vpop.permute.xlu1 %2062  ;;  %6332 = vmatpush3.bf16.msra.mxu1 %v6958_v52 }
 0x321   : > { %v8567_v55 = vpop.permute.xlu1 %2067 }
 0x325   : > { %v8569_v63 = vpop.permute.xlu1 %2368 }
 0x326   : > { %10949 = vst [vmem:[#allocation30_spill] sm:$0xff] %v8569_v63 }
 0x329   : > { %v8571_v30 = vpop.permute.xlu1 %2372 }
 0x32a   : > { %10950 = vst [vmem:[#allocation31_spill] sm:$0xff] %v8571_v30 }
 0x32d   : > { %v8573_v22 = vpop.permute.xlu1 %2072 }
 0x32e   : > { %10951 = vst [vmem:[#allocation32_spill] sm:$0xff] %v8573_v22 }
 0x331   : > { %v8577_v57 = vpop.permute.xlu1 %2082 }
 0x332   : > { %10952 = vst [vmem:[#allocation33_spill] sm:$0xff] %v8577_v57 }
 0x335   : > { %v8581_v49 = vpop.permute.xlu1 %2087 }
 0x336   : > { %10953 = vst [vmem:[#allocation34_spill] sm:$0xff] %v8581_v49 }
 0x339   : > { %v8585_v39 = vpop.permute.xlu1 %2384 }
 0x33a   : > { %10954 = vst [vmem:[#allocation35_spill] sm:$0xff] %v8585_v39 }
 0x33d   : > { %v8591_v34 = vpop.permute.xlu1 %2388 }
 0x33e   : > { %10956 = vst [vmem:[#allocation37_spill] sm:$0xff] %v8591_v34 }
 0x341   : > { %v8596_v37 = vpop.permute.xlu1 %2092 }
 0x342   : > { %10958 = vst [vmem:[#allocation39_spill] sm:$0xff] %v8596_v37 }
 0x345   : > { %v8600_v40 = vpop.permute.xlu1 %2102 }
 0x346   : > { %10960 = vst [vmem:[#allocation41_spill] sm:$0xff] %v8600_v40 }
 0x3a0   : > { %v1526_v4 = vpop.f32.mrf.mxu1 }
 0x3a1   : > { %v1600_v0 = vmul.f32 %v1526_v4, %v1526_v4 }
 0x3a2   : > { %v6233_v54 = vpop.f32.mrf.mxu1 }
 0x3c0   : > { %v1596_v36 = vpop.f32.mrf.mxu1 }
 0x3c1   : > { %v1601_v53 = vsub.f32 %v1596_v36, %v1600_v0  ;;  %v8602_v0 = vpop.permute.xlu0 %2117  ;;  %v8604_v36 = vpop.permute.xlu1 %2107 }
 0x3c2   : > { %v6268_v54 = vpop.f32.mrf.mxu1  ;;  %10961 = vst [vmem:[#allocation42_spill] sm:$0xff] %v8602_v0  ;;  %10962 = vst [vmem:[#allocation43_spill] sm:$0xff] %v8604_v36 }
 0x3c3   : > { %v1602_v20 = vmax.f32 %v1601_v53, 0.0  ;;  %v8609_v53 = vrot.slane %v1526_v4, %v7846_v10 }
 0x3c5   : > { %v1639_v28 = vadd.f32 1e-05, %v1602_v20  ;;  %v8606_v52 = vpop.permute.xlu0 %2137  ;;  %v1607_v20 = vsub.f32 %v8261_v16, %v8609_v53  ;;  %v1608_v34 = vsub.f32 %v8268_v31, %v8609_v53  ;;  %v1610_v18 = vsub.f32 %v8263_v5, %v8609_v53  ;;  %v8625_v36 = vpop.permute.xlu1 %2400 }
 0x3c6   : > { %10963 = vst [vmem:[#allocation44_spill] sm:$0xff] %v8606_v52  ;;  %v1611_v0 = vsub.f32 %v8291_v46, %v8609_v53  ;;  %v1612_v4 = vsub.f32 %v8312_v3, %v8609_v53  ;;  %v1613_v52 = vsub.f32 %v8276_v17, %v8609_v53  ;;  %10964 = vst [vmem:[#allocation45_spill] sm:$0xff] %v8625_v36 }
 0x3c7   : > { %7024 = vrsqrt.f32 %v1639_v28  ;;  %v1609_v28 = vsub.f32 %v8258_v12, %v8609_v53  ;;  %v1614_v12 = vsub.f32 %v8298_v23, %v8609_v53  ;;  %v1615_v5 = vsub.f32 %v8333_v29, %v8609_v53 }
 0x3c8   : > { %v1616_v31 = vsub.f32 %v8345_v26, %v8609_v53  ;;  %v1617_v46 = vsub.f32 %v8317_v50, %v8609_v53  ;;  %v1618_v17 = vsub.f32 %v8339_v25, %v8609_v53  ;;  %v1620_v23 = vsub.f32 %v8369_v11, %v8609_v53 }
 0x3c9   : > { %v8638_v3 = vpop.permute.xlu0 %2157  ;;  %v1632_v29 = vsub.f32 %v8454_v8, %v8609_v53  ;;  %v1621_v26 = vsub.f32 %v8351_v2, %v8609_v53  ;;  %v1622_v50 = vsub.f32 %v8363_v48, %v8609_v53  ;;  %v1623_v25 = vsub.f32 %v8387_v61, %v8609_v53  ;;  %v8669_v48 = vld [vmem:[%s10795_s7] ss:$0 sm:$0xff]  ;;  %v10967_v61 = vld [vmem:[#allocation21_spill] sm:$0xff]  ;;  %v8685_v30 = vpop.permute.xlu1 %2404 }
 0x3ca   : > { %10965 = vst [vmem:[#allocation46_spill] sm:$0xff] %v8638_v3  ;;  %v1625_v11 = vsub.f32 %v8379_v15, %v8609_v53  ;;  %v1626_v8 = vsub.f32 %v8395_v62, %v8609_v53  ;;  %v1633_v3 = vsub.f32 %v8436_v60, %v8609_v53  ;;  %v10968_v15 = vld [vmem:[#allocation24_spill] sm:$0xff]  ;;  %v10970_v60 = vld [vmem:[#allocation23_spill] sm:$0xff]  ;;  %v1634_v39 = vsub.f32 %v8447_v56, %v8609_v53 }
 0x3cb   : > { %v1628_v40 = vsub.f32 %v10968_v15, %v8609_v53  ;;  %v10969_v62 = vld [vmem:[#allocation20_spill] sm:$0xff]  ;;  %v1630_v37 = vsub.f32 %v10970_v60, %v8609_v53  ;;  %v1635_v49 = vsub.f32 %v8469_v1, %v8609_v53  ;;  %10972 = vst [vmem:[#allocation21_spill] sm:$0xff] %v8685_v30  ;;  %v1636_v15 = vsub.f32 %v8479_v13, %v8609_v53 }
 0x3cc   : > { %v1629_v33 = vsub.f32 %v10969_v62, %v8609_v53  ;;  %v1637_v62 = vsub.f32 %v8460_v42, %v8609_v53  ;;  %v1638_v60 = vsub.f32 %v8472_v59, %v8609_v53  ;;  %v8704_v13 = vld [vmem:[%s10796_s8] ss:$0 sm:$0xff] }
 0x3cd   : > { %v8718_v47 = vpop.permute.xlu1 %2112 }
 0x3ce   : > { %10974 = vst [vmem:[#allocation20_spill] sm:$0xff] %v8718_v47 }
 0x3d4   : > { %v7025_v54 = vpop.eup %7024 }
 0x3d5   : > { %v8628_v16 = vrot.slane %v7025_v54, %v7846_v10  ;;  %v1619_v54 = vsub.f32 %v8358_v44, %v8609_v53  ;;  %v8648_v10 = vld [vmem:[#allocation7 + $0x78] sm:$0xff]   ;;  %v1624_v44 = vsub.f32 %v8401_v58, %v8609_v53  ;;  %v1627_v58 = vsub.f32 %v10967_v61, %v8609_v53 }
 0x3d6   : > { %10966 = vst [vmem:[#allocation47_spill] sm:$0xff] %v8648_v10  ;;  %6413 = vmatprep.subr.bf16.mxu1 %v8648_v10 }
 0x3d7   : > { %v1670_v2 = vmul.f32 %v8628_v16, %v1632_v29  ;;  %v10971_v29 = vld [vmem:[#allocation25_spill] sm:$0xff]  ;;  %v1671_v61 = vmul.f32 %v8628_v16, %v1633_v3  ;;  %v1645_v56 = vmul.f32 %v8628_v16, %v1607_v20  ;;  %v1646_v63 = vmul.f32 %v8628_v16, %v1608_v34 }
 0x3d8   : > { %v1631_v36 = vsub.f32 %v10971_v29, %v8609_v53  ;;  %v8694_v29 = vpop.permute.xlu0 %2332  ;;  %v1647_v1 = vmul.f32 %v8628_v16, %v1609_v28  ;;  %v1648_v30 = vmul.f32 %v8628_v16, %v1610_v18  ;;  %v1649_v42 = vmul.f32 %v8628_v16, %v1611_v0 }
 0x3d9   : > { %10973 = vst [vmem:[#allocation24_spill] sm:$0xff] %v8694_v29  ;;  %v1708_v3 = vmul.f32 %v8669_v48, %v1670_v2  ;;  %v1650_v59 = vmul.f32 %v8628_v16, %v1612_v4  ;;  %v1651_v53 = vmul.f32 %v8628_v16, %v1613_v52  ;;  %v1652_v20 = vmul.f32 %v8628_v16, %v1614_v12 }
 0x3da   : > { %v1653_v34 = vmul.f32 %v8628_v16, %v1615_v5  ;;  %v1654_v28 = vmul.f32 %v8628_v16, %v1616_v31  ;;  %v1655_v18 = vmul.f32 %v8628_v16, %v1617_v46  ;;  %v1709_v2 = vmul.f32 %v8669_v48, %v1671_v61 }
 0x3db   : > { %v1656_v6 = vmul.f32 %v8628_v16, %v1618_v17  ;;  %v1657_v43 = vmul.f32 %v8628_v16, %v1619_v54  ;;  %v1658_v0 = vmul.f32 %v8628_v16, %v1620_v23  ;;  %v1659_v4 = vmul.f32 %v8628_v16, %v1621_v26 }
 0x3dc   : > { %v1660_v52 = vmul.f32 %v8628_v16, %v1622_v50  ;;  %v1661_v12 = vmul.f32 %v8628_v16, %v1623_v25  ;;  %v1662_v5 = vmul.f32 %v8628_v16, %v1624_v44  ;;  %v1746_v31 = vadd.f32 %v8704_v13, %v1708_v3  ;;  %v8724_v46 = vpop.permute.xlu0 %2344 }
 0x3dd   : > { %10975 = vst [vmem:[#allocation23_spill] sm:$0xff] %v8724_v46  ;;  %v1663_v17 = vmul.f32 %v8628_v16, %v1625_v11  ;;  %v1664_v54 = vmul.f32 %v8628_v16, %v1626_v8  ;;  %v1665_v23 = vmul.f32 %v8628_v16, %v1627_v58  ;;  %v1666_v26 = vmul.f32 %v8628_v16, %v1628_v40 }
 0x3de   : > { %v1667_v61 = vmul.f32 %v8628_v16, %v1629_v33  ;;  %v1668_v50 = vmul.f32 %v8628_v16, %v1630_v37  ;;  %v1669_v25 = vmul.f32 %v8628_v16, %v1631_v36  ;;  %v1747_v44 = vadd.f32 %v8704_v13, %v1709_v2  ;;  %v8744_v2 = vpop.permute.xlu1 %2122 }
 0x3df   : > { %v1672_v3 = vmul.f32 %v8628_v16, %v1634_v39  ;;  %v1673_v47 = vmul.f32 %v8628_v16, %v1635_v49  ;;  %v1674_v11 = vmul.f32 %v8628_v16, %v1636_v15  ;;  %v1675_v8 = vmul.f32 %v8628_v16, %v1637_v62  ;;  %10976 = vst [vmem:[#allocation25_spill] sm:$0xff] %v8744_v2 }
 0x3e0   : > { %v1676_v58 = vmul.f32 %v8628_v16, %v1638_v60  ;;  %v1810_v46 = vmul.f32 0.2, %v1746_v31  ;;  %v1697_v40 = vmul.f32 %v8669_v48, %v1659_v4  ;;  %v1699_v33 = vmul.f32 %v8669_v48, %v1661_v12  ;;  %v8749_v60 = vpop.permute.xlu0 %2348 }
 0x3e1   : > { %vm1778_vm3 = vcmp.ge.f32.partialorder %v1746_v31, 0.0  ;;  %v1683_v37 = vmul.f32 %v8669_v48, %v1645_v56  ;;  %v1684_v36 = vmul.f32 %v8669_v48, %v1646_v63  ;;  %v1685_v39 = vmul.f32 %v8669_v48, %v1647_v1  ;;  %10977 = vst [vmem:[#allocation48_spill] sm:$0xff] %v8749_v60 }
 0x3e2   : > { %v1811_v49 = vmul.f32 0.2, %v1747_v44  ;;  %v1686_v15 = vmul.f32 %v8669_v48, %v1648_v30  ;;  %v1687_v62 = vmul.f32 %v8669_v48, %v1649_v42  ;;  %v1698_v16 = vmul.f32 %v8669_v48, %v1660_v52 }
 0x3e3   : > { %vm1779_vm4 = vcmp.ge.f32.partialorder %v1747_v44, 0.0  ;;  %v1688_v4 = vmul.f32 %v8669_v48, %v1650_v59  ;;  %v1689_v56 = vmul.f32 %v8669_v48, %v1651_v53  ;;  %v1690_v63 = vmul.f32 %v8669_v48, %v1652_v20 }
 0x3e4   : > { %v8754_v12 = vsel %vm1778_vm3, %v1746_v31, %v1810_v46  ;;  %v1691_v1 = vmul.f32 %v8669_v48, %v1653_v34  ;;  %v1735_v2 = vadd.f32 %v8704_v13, %v1697_v40  ;;  %v1737_v30 = vadd.f32 %v8704_v13, %v1699_v33  ;;  %v8772_v40 = vpop.permute.xlu1 %2127  ;;  %v8776_v33 = vpop.permute.xlu0 %2360 }
 0x3e5   : > { %10978 = vst [vmem:[#allocation49_spill] sm:$0xff] %v8754_v12  ;;  %v1692_v42 = vmul.f32 %v8669_v48, %v1654_v28  ;;  %v1693_v52 = vmul.f32 %v8669_v48, %v1655_v18  ;;  %v1694_v60 = vmul.f32 %v8669_v48, %v1656_v6  ;;  %v1695_v59 = vmul.f32 %v8669_v48, %v1657_v43 }
 0x3e6   : > { %v8763_v14 = vsel %vm1779_vm4, %v1747_v44, %v1811_v49  ;;  %v1696_v53 = vmul.f32 %v8669_v48, %v1658_v0  ;;  %v1700_v20 = vmul.f32 %v8669_v48, %v1662_v5  ;;  %v1736_v34 = vadd.f32 %v8704_v13, %v1698_v16  ;;  %10980 = vst [vmem:[#allocation51_spill] sm:$0xff] %v8772_v40 }
 0x3e7   : > { %10979 = vst [vmem:[#allocation50_spill] sm:$0xff] %v8763_v14  ;;  %v1701_v46 = vmul.f32 %v8669_v48, %v1663_v17  ;;  %v1702_v28 = vmul.f32 %v8669_v48, %v1664_v54  ;;  %v1703_v18 = vmul.f32 %v8669_v48, %v1665_v23  ;;  %v1704_v43 = vmul.f32 %v8669_v48, %v1666_v26 }
 0x3e8   : > { %v1705_v6 = vmul.f32 %v8669_v48, %v1667_v61  ;;  %v1799_v44 = vmul.f32 0.2, %v1735_v2  ;;  %v1801_v0 = vmul.f32 0.2, %v1737_v30  ;;  %10981 = vst [vmem:[#allocation52_spill] sm:$0xff] %v8776_v33  ;;  %v1706_v5 = vmul.f32 %v8669_v48, %v1668_v50 }
 0x3e9   : > { %v1707_v49 = vmul.f32 %v8669_v48, %v1669_v25  ;;  %vm1767_vm5 = vcmp.ge.f32.partialorder %v1735_v2, 0.0  ;;  %vm1769_vm6 = vcmp.ge.f32.partialorder %v1737_v30, 0.0  ;;  %v1710_v17 = vmul.f32 %v8669_v48, %v1672_v3 }
 0x3ea   : > { %v1711_v54 = vmul.f32 %v8669_v48, %v1673_v47  ;;  %v1712_v23 = vmul.f32 %v8669_v48, %v1674_v11  ;;  %v1800_v16 = vmul.f32 0.2, %v1736_v34  ;;  %v1713_v26 = vmul.f32 %v8669_v48, %v1675_v8 }
 0x3eb   : > { %v1714_v61 = vmul.f32 %v8669_v48, %v1676_v58  ;;  %vm1768_vm7 = vcmp.ge.f32.partialorder %v1736_v34, 0.0  ;;  %v8786_v31 = vadd.f32 %v8704_v13, %v1683_v37  ;;  %v8788_v50 = vsel %vm1767_vm5, %v1735_v2, %v1799_v44  ;;  %v8810_v58 = vpop.permute.xlu1 %2416 }
 0x3ec   : > { %10982 = vst [vmem:[#allocation53_spill] sm:$0xff] %v8788_v50  ;;  %v8790_v25 = vsel %vm1769_vm6, %v1737_v30, %v1801_v0  ;;  %v8793_v40 = vadd.f32 %v8704_v13, %v1684_v36  ;;  %v8796_v47 = vadd.f32 %v8704_v13, %v1685_v39  ;;  %v8799_v3 = vadd.f32 %v8704_v13, %v1686_v15  ;;  %v8823_v15 = vpop.permute.xlu0 %2364 }
 0x3ed   : > { %v8802_v11 = vadd.f32 %v8704_v13, %v1687_v62  ;;  %v8805_v48 = vadd.f32 %v8704_v13, %v1688_v4  ;;  %v8808_v8 = vadd.f32 %v8704_v13, %v1689_v56  ;;  %10983 = vst [vmem:[#allocation54_spill] sm:$0xff] %v8810_v58  ;;  %v8812_v37 = vsel %vm1768_vm7, %v1736_v34, %v1800_v16 }
 0x3ee   : > { %10984 = vst [vmem:[#allocation55_spill] sm:$0xff] %v8812_v37  ;;  %v8815_v36 = vadd.f32 %v8704_v13, %v1690_v63  ;;  %v8818_v39 = vadd.f32 %v8704_v13, %v1691_v1  ;;  %v8821_v2 = vadd.f32 %v8704_v13, %v1692_v42  ;;  %10985 = vst [vmem:[#allocation56_spill] sm:$0xff] %v8823_v15  ;;  %v1943_v0 = vrot.slane %v8812_v37, 7 }
 0x3ef   : > { %v8828_v56 = vadd.f32 %v8704_v13, %v1693_v52  ;;  %v8831_v30 = vadd.f32 %v8704_v13, %v1694_v60  ;;  %v8834_v63 = vadd.f32 %v8704_v13, %v1695_v59  ;;  %v8837_v1 = vadd.f32 %v8704_v13, %v1696_v53 }
 0x3f0   : > { %v8840_v42 = vadd.f32 %v8704_v13, %v1700_v20  ;;  %v8843_v34 = vadd.f32 %v8704_v13, %v1701_v46  ;;  %v8846_v44 = vadd.f32 %v8704_v13, %v1702_v28  ;;  %v8849_v52 = vadd.f32 %v8704_v13, %v1703_v18 }
 0x3f1   : > { %v8852_v60 = vadd.f32 %v8704_v13, %v1704_v43  ;;  %v8855_v59 = vadd.f32 %v8704_v13, %v1705_v6  ;;  %v8858_v53 = vadd.f32 %v8704_v13, %v1706_v5  ;;  %v8861_v20 = vadd.f32 %v8704_v13, %v1707_v49  ;;  %v8877_v5 = vpop.permute.xlu1 %2420 }
 0x3f2   : > { %v8864_v46 = vadd.f32 %v8704_v13, %v1710_v17  ;;  %v8867_v28 = vadd.f32 %v8704_v13, %v1711_v54  ;;  %v8870_v18 = vadd.f32 %v8704_v13, %v1712_v23  ;;  %v8873_v43 = vadd.f32 %v8704_v13, %v1713_v26  ;;  %10988 = vst [vmem:[#allocation59_spill] sm:$0xff] %v8877_v5  ;;  %v8883_v17 = vpop.permute.xlu0 %2376 }
 0x3f3   : > { %vm1753_vm9 = vcmp.ge.f32.partialorder %v8786_v31, 0.0  ;;  %vm1754_vm10 = vcmp.ge.f32.partialorder %v8793_v40, 0.0  ;;  %vm1755_vm11 = vcmp.ge.f32.partialorder %v8796_v47, 0.0  ;;  %10989 = vst [vmem:[#allocation60_spill] sm:$0xff] %v8883_v17  ;;  %vm1756_vm12 = vcmp.ge.f32.partialorder %v8799_v3, 0.0 }
 0x3f4   : > { %10986 = vst [vmem:[#allocation57_spill] sm:$0xff] %v8864_v46  ;;  %10987 = vst [vmem:[#allocation58_spill] sm:$0xff] %v8873_v43  ;;  %vm1757_vm13 = vcmp.ge.f32.partialorder %v8802_v11, 0.0  ;;  %vm1760_vm1 = vcmp.ge.f32.partialorder %v8815_v36, 0.0  ;;  %vm1761_vm2 = vcmp.ge.f32.partialorder %v8818_v39, 0.0  ;;  %vm1762_vm3 = vcmp.ge.f32.partialorder %v8821_v2, 0.0 }
 0x3f5   : > { %vm1764_vm5 = vcmp.ge.f32.partialorder %v8831_v30, 0.0  ;;  %vm1765_vm6 = vcmp.ge.f32.partialorder %v8834_v63, 0.0  ;;  %v1785_v54 = vmul.f32 0.2, %v8786_v31  ;;  %v1786_v23 = vmul.f32 0.2, %v8793_v40  ;;  %v8908_v49 = vpop.permute.xlu1 %2132 }
 0x3f6   : > { %v8902_v16 = vadd.f32 %v8704_v13, %v1714_v61  ;;  %vm1773_vm4 = vcmp.ge.f32.partialorder %v8849_v52, 0.0  ;;  %v1787_v26 = vmul.f32 0.2, %v8796_v47  ;;  %v1788_v4 = vmul.f32 0.2, %v8799_v3  ;;  %10991 = vst [vmem:[#allocation62_spill] sm:$0xff] %v8908_v49  ;;  %v8922_v49 = vpop.permute.xlu0 %2380 }
 0x3f7   : > { %v1789_v62 = vmul.f32 0.2, %v8802_v11  ;;  %vm1775_vm15 = vcmp.ge.f32.partialorder %v8855_v59, 0.0  ;;  %vm1776_vm0 = vcmp.ge.f32.partialorder %v8858_v53, 0.0  ;;  %v1790_v13 = vmul.f32 0.2, %v8805_v48 }
 0x3f8   : > { %10990 = vst [vmem:[#allocation61_spill] sm:$0xff] %v8902_v16  ;;  %v1791_v61 = vmul.f32 0.2, %v8808_v8  ;;  %v1792_v6 = vmul.f32 0.2, %v8815_v36  ;;  %v10992_v37 = vrot.slane %v8788_v50, 7 }
 0x3f9   : > { %10994 = vst [vmem:[#allocation64_spill] sm:$0xff] %v8922_v49  ;;  %vm1781_vm14 = vcmp.ge.f32.partialorder %v8867_v28, 0.0  ;;  %v1793_v16 = vmul.f32 0.2, %v8818_v39  ;;  %v1794_v5 = vmul.f32 0.2, %v8821_v2 }
 0x3fa   : > { %v8920_v12 = vsel %vm1913_vm8, %v10992_v37, %v1943_v0  ;;  %v1795_v43 = vmul.f32 0.2, %v8828_v56  ;;  %v10995_v14 = vrot.slane %v8790_v25, 7  ;;  %vm1782_vm7 = vcmp.ge.f32.partialorder %v8870_v18, 0.0 }
 0x3fb   : > { %10993 = vst [vmem:[#allocation63_spill] sm:$0xff] %v8920_v12  ;;  %v1796_v37 = vmul.f32 0.2, %v8831_v30  ;;  %v1797_v46 = vmul.f32 0.2, %v8834_v63  ;;  %v8940_v12 = vsel %vm1753_vm9, %v8786_v31, %v1785_v54  ;;  %v8956_v31 = vsel %vm1755_vm11, %v8796_v47, %v1787_v26 }
 0x3fc   : > { %v8931_v58 = vsel %vm1913_vm8, %v1943_v0, %v10995_v14  ;;  %v1798_v49 = vmul.f32 0.2, %v8837_v1  ;;  %v1802_v17 = vmul.f32 0.2, %v8840_v42  ;;  %v1803_v15 = vmul.f32 0.2, %v8843_v34 }
 0x3fd   : > { %10996 = vst [vmem:[#allocation65_spill] sm:$0xff] %v8931_v58  ;;  %v1804_v14 = vmul.f32 0.2, %v8846_v44  ;;  %v8948_v0 = vsel %vm1754_vm10, %v8793_v40, %v1786_v23  ;;  %v1805_v58 = vmul.f32 0.2, %v8849_v52  ;;  %v8964_v40 = vsel %vm1756_vm12, %v8799_v3, %v1788_v4  ;;  %v8966_v23 = vpop.permute.xlu1 %2142  ;;  %v8984_v3 = vpop.permute.xlu0 %2392 }
 0x3fe   : > { %v1806_v33 = vmul.f32 0.2, %v8852_v60  ;;  %v1807_v29 = vmul.f32 0.2, %v8855_v59  ;;  %v1808_v54 = vmul.f32 0.2, %v8858_v53  ;;  %v8972_v47 = vsel %vm1757_vm13, %v8802_v11, %v1789_v62 }
 0x3ff   : > { %v1809_v10 = vmul.f32 0.2, %v8861_v20  ;;  %v1813_v57 = vmul.f32 0.2, %v8867_v28  ;;  %10997 = vst [vmem:[#allocation66_spill] sm:$0xff] %v8966_v23  ;;  %vm10998_vm9 = vcmp.ge.f32.partialorder %v8805_v48, 0.0  ;;  %v8989_v4 = vsel %vm1760_vm1, %v8815_v36, %v1792_v6 }
 0x400   : > { %v1814_v41 = vmul.f32 0.2, %v8870_v18  ;;  %v8977_v26 = vsel %vm10998_vm9, %v8805_v48, %v1790_v13  ;;  %vm11000_vm10 = vcmp.ge.f32.partialorder %v8808_v8, 0.0  ;;  %11002 = vst [vmem:[#allocation69_spill] sm:$0xff] %v8984_v3  ;;  %11003 = vst [vmem:[#allocation70_spill] sm:$0xff] %v8989_v4  ;;  %v8994_v11 = vsel %vm1761_vm2, %v8818_v39, %v1793_v16 }
 0x401   : > { %10999 = vst [vmem:[#allocation67_spill] sm:$0xff] %v8977_v26  ;;  %v8982_v22 = vsel %vm11000_vm10, %v8808_v8, %v1791_v61  ;;  %11004 = vst [vmem:[#allocation71_spill] sm:$0xff] %v8994_v11  ;;  %v8999_v48 = vsel %vm1762_vm3, %v8821_v2, %v1794_v5  ;;  %vm11006_vm11 = vcmp.ge.f32.partialorder %v8828_v56, 0.0  ;;  %v9009_v36 = vsel %vm1764_vm5, %v8831_v30, %v1796_v37  ;;  %v9074_v6 = vpop.permute.xlu1 %2147 }
 0x402   : > { %11001 = vst [vmem:[#allocation68_spill] sm:$0xff] %v8982_v22  ;;  %11005 = vst [vmem:[#allocation72_spill] sm:$0xff] %v8999_v48  ;;  %v9004_v8 = vsel %vm11006_vm11, %v8828_v56, %v1795_v43  ;;  %v9014_v39 = vsel %vm1765_vm6, %v8834_v63, %v1797_v46  ;;  %vm11010_vm12 = vcmp.ge.f32.partialorder %v8837_v1, 0.0  ;;  %vm11012_vm13 = vcmp.ge.f32.partialorder %v8840_v42, 0.0 }
 0x403   : > { %11007 = vst [vmem:[#allocation73_spill] sm:$0xff] %v9004_v8  ;;  %11008 = vst [vmem:[#allocation74_spill] sm:$0xff] %v9009_v36  ;;  %v9019_v2 = vsel %vm11010_vm12, %v8837_v1, %v1798_v49  ;;  %v9024_v62 = vsel %vm11012_vm13, %v8840_v42, %v1802_v17  ;;  %vm11014_vm1 = vcmp.ge.f32.partialorder %v8843_v34, 0.0  ;;  %vm11016_vm2 = vcmp.ge.f32.partialorder %v8846_v44, 0.0 }
 0x404   : > { %11009 = vst [vmem:[#allocation75_spill] sm:$0xff] %v9014_v39  ;;  %11011 = vst [vmem:[#allocation76_spill] sm:$0xff] %v9019_v2  ;;  %v9029_v56 = vsel %vm11014_vm1, %v8843_v34, %v1803_v15  ;;  %v9034_v30 = vsel %vm11016_vm2, %v8846_v44, %v1804_v14  ;;  %v1914_v63 = vrot.slane %v8940_v12, 7  ;;  %v1915_v1 = vrot.slane %v8948_v0, 7 }
 0x405   : > { %11013 = vst [vmem:[#allocation77_spill] sm:$0xff] %v9024_v62  ;;  %11015 = vst [vmem:[#allocation78_spill] sm:$0xff] %v9029_v56  ;;  %v9041_v46 = vsel %vm1773_vm4, %v8849_v52, %v1805_v58  ;;  %v1917_v42 = vrot.slane %v8956_v31, 7  ;;  %v1919_v43 = vrot.slane %v8964_v40, 7  ;;  %v1921_v15 = vrot.slane %v8972_v47, 7 }
 0x406   : > { %vm11017_vm3 = vcmp.ge.f32.partialorder %v8852_v60, 0.0  ;;  %v9054_v44 = vsel %vm1775_vm15, %v8855_v59, %v1807_v29  ;;  %v9059_v58 = vsel %vm1776_vm0, %v8858_v53, %v1808_v54  ;;  %vm11018_vm4 = vcmp.ge.f32.partialorder %v8861_v20, 0.0  ;;  %11021 = vst [vmem:[#allocation81_spill] sm:$0xff] %v9074_v6 }
 0x407   : > { %v9049_v34 = vsel %vm11017_vm3, %v8852_v60, %v1806_v33  ;;  %v9064_v52 = vsel %vm11018_vm4, %v8861_v20, %v1809_v10  ;;  %v9069_v33 = vsel %vm1781_vm14, %v8867_v28, %v1813_v57  ;;  %v1923_v60 = vrot.slane %v8977_v26, 7  ;;  %v9084_v28 = vpop.permute.xlu0 %2396 }
 0x408   : > { %11019 = vst [vmem:[#allocation79_spill] sm:$0xff] %v9064_v52  ;;  %11020 = vst [vmem:[#allocation80_spill] sm:$0xff] %v9069_v33  ;;  %v1925_v29 = vrot.slane %v8982_v22, 7  ;;  %v1927_v59 = vrot.slane %v8989_v4, 7  ;;  %v9079_v53 = vsel %vm1782_vm7, %v8870_v18, %v1814_v41  ;;  %v1916_v10 = vsel %vm1913_vm8, %v1914_v63, %v1915_v1 }
 0x409   : > { %11022 = vst [vmem:[#allocation82_spill] sm:$0xff] %v9079_v53  ;;  %v1929_v20 = vrot.slane %v8994_v11, 7  ;;  %v1931_v57 = vrot.slane %v8999_v48, 7  ;;  %v1918_v5 = vsel %vm1913_vm8, %v1915_v1, %v1917_v42  ;;  %v1920_v49 = vsel %vm1913_vm8, %v1917_v42, %v1919_v43  ;;  %v9106_v53 = vpop.permute.xlu1 %2432 }
 0x40a   : > { %v1922_v17 = vsel %vm1913_vm8, %v1919_v43, %v1921_v15  ;;  %v1933_v16 = vrot.slane %v9004_v8, 7  ;;  %v1935_v13 = vrot.slane %v9009_v36, 7  ;;  %v1937_v41 = vrot.slane %v9014_v39, 7  ;;  %11023 = vst [vmem:[#allocation83_spill] sm:$0xff] %v9106_v53 }
 0x40b   : > { %v1939_v18 = vrot.slane %v9019_v2, 7  ;;  %v2009_v61 = vsel %vm1913_vm8, 0.0, %v1914_v63  ;;  %vm2234_vm0 = vcmask 1046528   ;;  %v1924_v37 = vsel %vm1913_vm8, %v1921_v15, %v1923_v60  ;;  %v9112_v52 = vpop.permute.xlu0 %2408 }
 0x40c   : > { %v1926_v14 = vsel %vm1913_vm8, %v1923_v60, %v1925_v29  ;;  %v1928_v54 = vsel %vm1913_vm8, %v1925_v29, %v1927_v59  ;;  %v1947_v1 = vrot.slane %v9024_v62, 7  ;;  %v1930_v42 = vsel %vm1913_vm8, %v1927_v59, %v1929_v20 }
 0x40d   : > { %v1932_v43 = vsel %vm1913_vm8, %v1929_v20, %v1931_v57  ;;  %v1949_v3 = vrot.slane %v9029_v56, 7  ;;  %v10847_v6 = vrot.slane %v9034_v30, 7  ;;  %v2170_v23 = vmul.f32 %v8575_v51, %v2009_v61 }
 0x40e   : > { %v2171_v63 = vmul.f32 %v8579_v9, %v1916_v10  ;;  %v2172_v15 = vmul.f32 %v8545_v7, %v1918_v5  ;;  %v2173_v60 = vmul.f32 %v8547_v35, %v1920_v49  ;;  %v1934_v29 = vsel %vm1913_vm8, %v1931_v57, %v1933_v16 }
 0x40f   : > { %v1936_v59 = vsel %vm1913_vm8, %v1933_v16, %v1935_v13  ;;  %v1938_v20 = vsel %vm1913_vm8, %v1935_v13, %v1937_v41  ;;  %v1940_v33 = vsel %vm1913_vm8, %v1937_v41, %v1939_v18  ;;  %v11024_v51 = vrot.slane %v8788_v50, 7 }
 0x410   : > { %v11025_v7 = vrot.slane %v8790_v25, 7  ;;  %v2174_v10 = vmul.f32 %v8553_v19, %v1922_v17  ;;  %v2175_v57 = vmul.f32 %v8583_v45, %v1924_v37  ;;  %v2176_v5 = vmul.f32 %v8555_v24, %v1926_v14  ;;  %v11028_v17 = vld [vmem:[#allocation32_spill] sm:$0xff] }
 0x411   : > { %v1942_v9 = vsel %vm1913_vm8, %v1939_v18, %v11024_v51  ;;  %v2177_v49 = vmul.f32 %v8557_v38, %v1928_v54  ;;  %v2178_v16 = vmul.f32 %v8563_v21, %v1930_v42  ;;  %v2179_v13 = vmul.f32 %v8587_v27, %v1932_v43  ;;  %v6965_v27 = vld [vmem:[#allocation7 + $0x70] sm:$0xff]   ;;  %v9159_v42 = vpop.permute.xlu1 %2436  ;;  %v6968_v24 = vld [vmem:[#allocation7 + $0x60] sm:$0xff]  }
 0x412   : > { %v9120_v35 = vsel %vm1913_vm8, %v11025_v7, %v1947_v1  ;;  %v9129_v41 = vsel %vm1913_vm8, %v1947_v1, %v1949_v3  ;;  %v9134_v18 = vsel %vm1913_vm8, %v1949_v3, %v10847_v6  ;;  %v9136_v61 = vpack.c.bf16 %v2171_v63, %v2170_v23  ;;  %v11029_v3 = vld [vmem:[#allocation38_spill] sm:$0xff]  ;;  %v11030_v23 = vld [vmem:[#allocation33_spill] sm:$0xff] }
 0x413   : > { %v9138_v19 = vpack.c.bf16 %v2173_v60, %v2172_v15  ;;  %v9143_v21 = vmul.f32 %v8565_v32, %v1934_v29  ;;  %v9146_v45 = vmul.f32 %v8567_v55, %v1936_v59  ;;  %v9149_v37 = vmul.f32 %v11028_v17, %v1938_v20  ;;  %v9168_v15 = vpop.permute.xlu0 %2412  ;;  %v11034_v20 = vld [vmem:[#allocation47_spill] sm:$0xff] }
 0x414   : > { %11026 = vst [vmem:[#allocation84_spill] sm:$0xff] %v9136_v61  ;;  %v9152_v14 = vmul.f32 %v11029_v3, %v1940_v33  ;;  %v9155_v54 = vmul.f32 %v11030_v23, %v1942_v9  ;;  %v9157_v1 = vpack.c.bf16 %v2175_v57, %v2174_v10  ;;  %6333 = vmatprep.mubr.bf16.mxu1 %v9136_v61  ;;  %v2235_v43 = vrot.slane %v8940_v12, 1  ;;  %v6966_v57 = vld [vmem:[#allocation7 + $0x68] sm:$0xff]  }
 0x415   : > { %11027 = vst [vmem:[#allocation85_spill] sm:$0xff] %v9138_v19  ;;  %v9162_v32 = vpack.c.bf16 %v2177_v49, %v2176_v5  ;;  %v9164_v55 = vpack.c.bf16 %v2179_v13, %v2178_v16  ;;  %v2236_v63 = vrot.slane %v8948_v0, 1  ;;  %6334 = vmatmul.mubr.bf16.vlgmr.msra.gmra.mxu1 %v9138_v19  ;;  %v2238_v33 = vrot.slane %v8956_v31, 1  ;;  %v9193_v6 = vpop.permute.xlu1 %2152 }
 0x416   : > { %11031 = vst [vmem:[#allocation32_spill] sm:$0xff] %v9157_v1  ;;  %v2240_v60 = vrot.slane %v8964_v40, 1  ;;  %v2242_v29 = vrot.slane %v8972_v47, 1  ;;  %v2244_v59 = vrot.slane %v8977_v26, 1  ;;  %6337 = vmatprep.mubr.bf16.mxu1 %v9157_v1  ;;  %6414 = vmatpush3.bf16.msra.mxu1 %v11034_v20  ;;  %v2246_v9 = vrot.slane %v8982_v22, 1  ;;  %11035 = vst [vmem:[#allocation47_spill] sm:$0xff] %v9193_v6 }
 0x417   : > { %11032 = vst [vmem:[#allocation38_spill] sm:$0xff] %v9162_v32  ;;  %11033 = vst [vmem:[#allocation33_spill] sm:$0xff] %v9164_v55  ;;  %v2237_v51 = vsel %vm2234_vm0, %v2235_v43, %v2236_v63  ;;  %v2248_v7 = vrot.slane %v8989_v4, 1  ;;  %v2250_v10 = vrot.slane %v8994_v11, 1  ;;  %6415 = vmatprep.subr.bf16.mxu1 %v6965_v27  ;;  %v2239_v5 = vsel %vm2234_vm0, %v2236_v63, %v2238_v33  ;;  %v11052_v22 = vld [vmem:[#allocation34_spill] sm:$0xff] }
 0x418   : > { %v2241_v49 = vsel %vm2234_vm0, %v2238_v33, %v2240_v60  ;;  %v2243_v16 = vsel %vm2234_vm0, %v2240_v60, %v2242_v29  ;;  %v2245_v13 = vsel %vm2234_vm0, %v2242_v29, %v2244_v59  ;;  %v2247_v17 = vsel %vm2234_vm0, %v2244_v59, %v2246_v9 }
 0x419   : > { %v2249_v3 = vsel %vm2234_vm0, %v2246_v9, %v2248_v7  ;;  %v2251_v23 = vsel %vm2234_vm0, %v2248_v7, %v2250_v10  ;;  %v2252_v43 = vrot.slane %v8999_v48, 1  ;;  %v2254_v20 = vrot.slane %v9004_v8, 1  ;;  %v9199_v7 = vpop.permute.xlu0 %2424 }
 0x41a   : > { %v2256_v38 = vrot.slane %v9009_v36, 1  ;;  %v2258_v63 = vrot.slane %v9014_v39, 1  ;;  %v2260_v33 = vrot.slane %v9019_v2, 1  ;;  %6416 = vmatpush3.bf16.msra.mxu1 %v6965_v27  ;;  %v2268_v29 = vrot.slane %v9024_v62, 1  ;;  %v11038_v39 = vld [vmem:[#allocation26_spill] sm:$0xff]  ;;  %v11040_v36 = vld [vmem:[#allocation23_spill] sm:$0xff] }
 0x41b   : > { %v2253_v60 = vsel %vm2234_vm0, %v2250_v10, %v2252_v43  ;;  %v2270_v59 = vrot.slane %v9029_v56, 1  ;;  %v10862_v9 = vrot.slane %v9034_v30, 1  ;;  %6417 = vmatprep.subr.bf16.mxu1 %v6966_v57  ;;  %v2255_v1 = vsel %vm2234_vm0, %v2252_v43, %v2254_v20  ;;  %v11042_v2 = vld [vmem:[#allocation28_spill] sm:$0xff] }
 0x41c   : > { %v2257_v19 = vsel %vm2234_vm0, %v2254_v20, %v2256_v38  ;;  %v2259_v61 = vsel %vm2234_vm0, %v2256_v38, %v2258_v63  ;;  %v2261_v27 = vsel %vm2234_vm0, %v2258_v63, %v2260_v33  ;;  %v11036_v10 = vrot.slane %v8788_v50, 1  ;;  %v11037_v20 = vld [vmem:[#allocation24_spill] sm:$0xff] }
 0x41d   : > { %v2271_v56 = vsel %vm2234_vm0, %v2268_v29, %v2270_v59  ;;  %v2273_v62 = vsel %vm2234_vm0, %v2270_v59, %v10862_v9  ;;  %6338 = vmatmul.mubr.bf16.gmra.mxu1 %v9162_v32  ;;  %v2278_v43 = vrot.slane %v9054_v44, 1  ;;  %v2459_v63 = vmul.f32 %v11037_v20, %v2237_v51  ;;  %v11041_v59 = vld [vmem:[#allocation48_spill] sm:$0xff]  ;;  %v6969_v32 = vld [vmem:[#allocation7 + $0x58] sm:$0xff]   ;;  %v9237_v4 = vpop.permute.xlu0 %2428 }
 0x41e   : > { %v2263_v53 = vsel %vm2234_vm0, %v2260_v33, %v11036_v10  ;;  %v2460_v50 = vmul.f32 %v11038_v39, %v2239_v5  ;;  %6341 = vmatprep.mubr.bf16.mxu1 %v9164_v55  ;;  %6418 = vmatpush3.bf16.msra.mxu1 %v6966_v57  ;;  %v11039_v33 = vld [vmem:[#allocation27_spill] sm:$0xff]  ;;  %v2462_v8 = vmul.f32 %v11040_v36, %v2243_v16  ;;  %v11043_v48 = vrot.slane %v9049_v34, 1  ;;  %v11045_v5 = vld [vmem:[#allocation29_spill] sm:$0xff]  ;;  %v11046_v20 = vld [vmem:[#allocation52_spill] sm:$0xff] }
 0x41f   : > { %v2461_v10 = vmul.f32 %v11039_v33, %v2241_v49  ;;  %v2463_v9 = vmul.f32 %v11041_v59, %v2245_v13  ;;  %v2464_v6 = vmul.f32 %v11042_v2, %v2247_v17  ;;  %6419 = vmatprep.subr.bf16.mxu1 %v6968_v24  ;;  %v11044_v51 = vrot.slane %v9059_v58, 1  ;;  %v9231_v33 = vpop.permute.xlu1 %2162  ;;  %v11047_v36 = vld [vmem:[#allocation56_spill] sm:$0xff]  ;;  %v11048_v13 = vld [vmem:[#allocation30_spill] sm:$0xff]  ;;  %v11049_v17 = vld [vmem:[#allocation31_spill] sm:$0xff] }
 0x420   : > { %v2279_v38 = vsel %vm2234_vm0, %v11043_v48, %v2278_v43  ;;  %v2465_v57 = vmul.f32 %v11045_v5, %v2249_v3  ;;  %v2466_v49 = vmul.f32 %v11046_v20, %v2251_v23  ;;  %v2467_v16 = vmul.f32 %v11047_v36, %v2253_v60  ;;  %v11050_v55 = vld [vmem:[#allocation60_spill] sm:$0xff]  ;;  %v11051_v48 = vld [vmem:[#allocation63_spill] sm:$0xff] }
 0x421   : > { %v2281_v39 = vsel %vm2234_vm0, %v2278_v43, %v11044_v51  ;;  %v2468_v2 = vmul.f32 %v11048_v13, %v2255_v1  ;;  %v2469_v59 = vmul.f32 %v11049_v17, %v2257_v19  ;;  %v2470_v11 = vmul.f32 %v11050_v55, %v2259_v61  ;;  %v11053_v23 = vld [vmem:[#allocation64_spill] sm:$0xff]  ;;  %v11054_v51 = vld [vmem:[#allocation35_spill] sm:$0xff]  ;;  %v11055_v19 = vld [vmem:[#allocation45_spill] sm:$0xff] }
 0x422   : > { %v2185_v26 = vmul.f32 %v11052_v22, %v11051_v48  ;;  %v9243_v3 = vpack.c.bf16 %v9146_v45, %v9143_v21  ;;  %v2471_v43 = vmul.f32 %v11053_v23, %v2261_v27  ;;  %v2472_v5 = vmul.f32 %v11054_v51, %v2263_v53  ;;  %6420 = vmatpush3.bf16.msra.mxu1 %v6968_v24  ;;  %v6971_v22 = vld [vmem:[#allocation7 + $0x50] sm:$0xff]   ;;  %v11060_v27 = vld [vmem:[#allocation40_spill] sm:$0xff] }
 0x423   : > { %v9249_v1 = vpack.c.bf16 %v9152_v14, %v9149_v37  ;;  %v2476_v61 = vmul.f32 %v11055_v19, %v2271_v56  ;;  %v9252_v55 = vpack.c.bf16 %v2460_v50, %v2459_v63  ;;  %v9254_v60 = vpack.c.bf16 %v2462_v8, %v2461_v10  ;;  %6421 = vmatprep.subr.bf16.mxu1 %v6969_v32  ;;  %v11056_v37 = vld [vmem:[#allocation57_spill] sm:$0xff]  ;;  %v11059_v14 = vld [vmem:[#allocation39_spill] sm:$0xff]  ;;  %v11064_v48 = vld [vmem:[#allocation50_spill] sm:$0xff] }
 0x424   : > { %v9256_v20 = vpack.c.bf16 %v2464_v6, %v2463_v9  ;;  %v9258_v21 = vpack.c.bf16 %v2466_v49, %v2465_v57  ;;  %v9260_v45 = vpack.c.bf16 %v2468_v2, %v2467_v16  ;;  %v9262_v53 = vpack.c.bf16 %v2470_v11, %v2469_v59  ;;  %v11058_v6 = vld [vmem:[#allocation65_spill] sm:$0xff]  ;;  %v9278_v57 = vpop.permute.xlu1 %2167  ;;  %v11063_v2 = vld [vmem:[#allocation79_spill] sm:$0xff]  ;;  %v2441_v59 = vpop.permute.xlu0 %2440  ;;  %v11066_v51 = vld [vmem:[#allocation58_spill] sm:$0xff] }
 0x425   : > { %v9264_v24 = vpack.c.bf16 %v2472_v5, %v2471_v43  ;;  %vm1780_vm14 = vcmp.ge.f32.partialorder %v11056_v37, 0.0  ;;  %v1812_v56 = vmul.f32 0.2, %v11056_v37  ;;  %v11057_v50 = vrot.slane %v8790_v25, 1  ;;  %6342 = vmatmul.mubr.bf16.gmra.mxu1 %v9243_v3  ;;  %v11061_v49 = vld [vmem:[#allocation21_spill] sm:$0xff] }
 0x426   : > { %v2186_v9 = vmul.f32 %v11059_v14, %v11058_v6  ;;  %v2187_v63 = vmul.f32 %v11060_v27, %v9120_v35  ;;  %v2274_v10 = vrot.slane %v9041_v46, 1  ;;  %6345 = vmatprep.mubr.bf16.mxu1 %v9249_v1  ;;  %6422 = vmatpush3.bf16.msra.mxu1 %v6969_v32  ;;  %v2477_v36 = vmul.f32 %v11061_v49, %v2273_v62  ;;  %v6972_v35 = vld [vmem:[#allocation7 + $0x48] sm:$0xff]  }
 0x427   : > { %v2269_v8 = vsel %vm2234_vm0, %v11057_v50, %v2268_v29  ;;  %v11062_v29 = vld [vmem:[#allocation54_spill] sm:$0xff]  ;;  %v9284_v13 = vsel %vm1780_vm14, %v11056_v37, %v1812_v56  ;;  %v10872_v17 = vrot.slane %v11063_v2, 1  ;;  %6423 = vmatprep.subr.bf16.mxu1 %v6971_v22  ;;  %v10873_v23 = vrot.slane %v11064_v48, 1  ;;  %v11068_v56 = vld [vmem:[#allocation59_spill] sm:$0xff] }
 0x428   : > { %v2475_v11 = vmul.f32 %v9084_v28, %v2269_v8  ;;  %v2480_v16 = vmul.f32 %v11062_v29, %v2279_v38  ;;  %v11065_v43 = vrot.slane %v9034_v30, 1  ;;  %v1815_v62 = vmul.f32 0.2, %v11066_v51 }
 0x429   : > { %v2288_v5 = vrot.slane %v9284_v13, 1  ;;  %v11067_v19 = vrot.slane %v9049_v34, 1  ;;  %vm1783_vm15 = vcmp.ge.f32.partialorder %v11066_v51, 0.0  ;;  %v2481_v50 = vmul.f32 %v11068_v56, %v2281_v39  ;;  %v6974_v39 = vld [vmem:[#allocation7 + $0x40] sm:$0xff]   ;;  %v11077_v56 = vld [vmem:[#allocation61_spill] sm:$0xff] }
 0x42a   : > { %v9287_v28 = vpack.c.bf16 %v2476_v61, %v2475_v11  ;;  %v2275_v32 = vsel %vm2234_vm0, %v11065_v43, %v2274_v10  ;;  %v1957_v61 = vrot.slane %v9054_v44, 7  ;;  %v11069_v6 = vrot.slane %v9059_v58, 1  ;;  %6424 = vmatpush3.bf16.msra.mxu1 %v6971_v22  ;;  %v2449_v22 = vpop.permute.xlu1 %2448 }
 0x42b   : > { %v2478_v38 = vmul.f32 %v9112_v52, %v2275_v32  ;;  %v2277_v37 = vsel %vm2234_vm0, %v2274_v10, %v11067_v19  ;;  %v1959_v14 = vrot.slane %v9059_v58, 7  ;;  %v1961_v27 = vrot.slane %v11063_v2, 7  ;;  %6425 = vmatprep.subr.bf16.mxu1 %v6972_v35 }
 0x42c   : > { %v2479_v8 = vmul.f32 %v9168_v15, %v2277_v37  ;;  %v2283_v52 = vsel %vm2234_vm0, %v11069_v6, %v10872_v17  ;;  %v9311_v11 = vpack.c.bf16 %v2185_v26, %v9155_v54  ;;  %v9315_v49 = vpack.c.bf16 %v2187_v63, %v2186_v9  ;;  %v11075_v63 = vld [vmem:[#allocation41_spill] sm:$0xff]  ;;  %v11078_v6 = vld [vmem:[#allocation80_spill] sm:$0xff] }
 0x42d   : > { %v9313_v10 = vpack.c.bf16 %v2478_v38, %v2477_v36  ;;  %v2482_v29 = vmul.f32 %v9199_v7, %v2283_v52  ;;  %v9321_v43 = vsel %vm1783_vm15, %v11066_v51, %v1815_v62  ;;  %v11071_v32 = vrot.slane %v9041_v46, 7  ;;  %v2445_v51 = vpop.permute.xlu0 %2444  ;;  %v11076_v62 = vld [vmem:[#allocation43_spill] sm:$0xff] }
 0x42e   : > { %11070 = vst [vmem:[#allocation24_spill] sm:$0xff] %v9315_v49  ;;  %v9317_v15 = vpack.c.bf16 %v2480_v16, %v2479_v8  ;;  %v11072_v19 = vrot.slane %v9034_v30, 7  ;;  %v11073_v54 = vrot.slane %v9049_v34, 7  ;;  %v2188_v16 = vmul.f32 %v11075_v63, %v9129_v41  ;;  %6346 = vmatmul.mubr.bf16.gmra.mxu1 %v9311_v11 }
 0x42f   : > { %v11074_v36 = vmov %v11071_v32  ;;  %v2289_v7 = vsel %vm2234_vm0, %v10873_v23, %v2288_v5  ;;  %v2189_v38 = vmul.f32 %v11076_v62, %v9134_v18  ;;  %v9341_v37 = vpack.c.bf16 %v2482_v29, %v2481_v50  ;;  %6349 = vmatprep.mubr.bf16.mxu1 %v9315_v49  ;;  %6426 = vmatpush3.bf16.msra.mxu1 %v6972_v35  ;;  %v11080_v18 = vld [vmem:[#allocation20_spill] sm:$0xff]  ;;  %v6959_v23 = vld [vmem:[#allocation7 + $0x170] sm:$0xff]  }
 0x430   : > { %v1954_v26 = vsel %vm1913_vm8, %v11072_v19, %v11071_v32  ;;  %v1956_v9 = vsel %vm1913_vm8, %v11074_v36, %v11073_v54  ;;  %vm1784_vm5 = vcmp.ge.f32.partialorder %v11077_v56, 0.0  ;;  %v1816_v8 = vmul.f32 0.2, %v11077_v56  ;;  %v11079_v32 = vld [vmem:[#allocation82_spill] sm:$0xff]  ;;  %6427 = vmatprep.subr.bf16.mxu1 %v6974_v39 }
 0x431   : > { %v9348_v41 = vpack.c.bf16 %v8964_v40, %v8956_v31  ;;  %v2290_v52 = vrot.slane %v11078_v6, 1  ;;  %v2292_v19 = vrot.slane %v11079_v32, 1  ;;  %v2294_v54 = vrot.slane %v9321_v43, 1  ;;  %v11081_v31 = vld [vmem:[#allocation42_spill] sm:$0xff] }
 0x432   : > { %v2190_v50 = vmul.f32 %v11080_v18, %v1954_v26  ;;  %v2485_v29 = vmul.f32 %v9159_v42, %v2289_v7  ;;  %v9356_v36 = vsel %vm1784_vm5, %v11077_v56, %v1816_v8  ;;  %v9360_v35 = vpack.c.bf16 %v8948_v0, %v8940_v12  ;;  %v2453_v42 = vpop.permute.xlu1 %2452 }
 0x433   : > { %v2191_v40 = vmul.f32 %v11081_v31, %v1956_v9  ;;  %v2291_v63 = vsel %vm2234_vm0, %v2288_v5, %v2290_v52  ;;  %v2295_v62 = vsel %vm2234_vm0, %v2292_v19, %v2294_v54  ;;  %v2293_v17 = vsel %vm2234_vm0, %v2290_v52, %v2292_v19  ;;  %6428 = vmatpush3.bf16.msra.mxu1 %v6974_v39  ;;  %v2457_v9 = vpop.permute.xlu0 %2456  ;;  %v11083_v5 = vld [vmem:[#allocation67_spill] sm:$0xff]  ;;  %v11084_v39 = vld [vmem:[#allocation36_spill] sm:$0xff] }
 0x434   : > { %v2486_v49 = vmul.f32 %v2441_v59, %v2291_v63  ;;  %v2488_v26 = vmul.f32 %v2449_v22, %v2295_v62  ;;  %v2487_v18 = vmul.f32 %v2445_v51, %v2293_v17  ;;  %v2296_v7 = vrot.slane %v9356_v36, 1  ;;  %6285 = vmatprep.mubr.bf16.mxu0 %v9360_v35  ;;  %v11088_v62 = vld [vmem:[#allocation25_spill] sm:$0xff] }
 0x435   : > { %v11082_v12 = vrot.slane %v9049_v34, 7  ;;  %6286 = vmatmul.mubr.bf16.vlgmr.msra.gmra.mxu0 %v9348_v41  ;;  %v9374_v56 = vpack.c.bf16 %v11083_v5, %v8972_v47  ;;  %v9376_v59 = vpack.c.bf16 %v2189_v38, %v2188_v16  ;;  %v1960_v8 = vsel %vm1913_vm8, %v1957_v61, %v1959_v14  ;;  %v6960_v47 = vld [vmem:[#allocation7 + $0x168] sm:$0xff]   ;;  %v9389_v16 = vld [vmem:[#allocation7 + $0xb8] sm:$0xff]  }
 0x436   : > { %v9378_v17 = vpack.c.bf16 %v2486_v49, %v2485_v29  ;;  %v9380_v22 = vpack.c.bf16 %v2488_v26, %v2487_v18  ;;  %v2297_v51 = vsel %vm2234_vm0, %v2294_v54, %v2296_v7  ;;  %6366 = vmatpush3.bf16.msra.mxu0 %v11084_v39  ;;  %v9385_v52 = vpack.c.bf16 %v2191_v40, %v2190_v50  ;;  %v11086_v38 = vld [vmem:[#allocation49_spill] sm:$0xff]  ;;  %v11089_v18 = vld [vmem:[#allocation51_spill] sm:$0xff]  ;;  %v11094_v39 = vld [vmem:[#allocation70_spill] sm:$0xff] }
 0x437   : > { %v1958_v0 = vsel %vm1913_vm8, %v11082_v12, %v1957_v61  ;;  %v2489_v19 = vmul.f32 %v2453_v42, %v2297_v51  ;;  %v2330_v31 = vsel %vm2234_vm0, %v2296_v7, 0.0  ;;  %6289 = vmatprep.mubr.bf16.mxu0 %v9374_v56  ;;  %6367 = vmatprep.subr.bf16.mxu0 %v6959_v23  ;;  %v1962_v49 = vsel %vm1913_vm8, %v1959_v14, %v1961_v27  ;;  %v11091_v7 = vld [vmem:[#allocation62_spill] sm:$0xff]  ;;  %v11092_v12 = vld [vmem:[#allocation44_spill] sm:$0xff] }
 0x438   : > { %11085 = vst [vmem:[#allocation26_spill] sm:$0xff] %v9385_v52  ;;  %v11087_v29 = vrot.slane %v11086_v38, 7  ;;  %v2490_v63 = vmul.f32 %v2457_v9, %v2330_v31  ;;  %6350 = vmatmul.mubr.bf16.gmra.mxu1 %v9376_v59  ;;  %v1965_v61 = vrot.slane %v11064_v48, 7  ;;  %v1969_v50 = vrot.slane %v11078_v6, 7  ;;  %v11093_v51 = vld [vmem:[#allocation68_spill] sm:$0xff]  ;;  %6509 = vmatprep.subr.bf16.mxu1 %v9389_v16 }
 0x439   : > { %6353 = vmatprep.mubr.bf16.mxu1 %v9385_v52  ;;  %v1971_v40 = vrot.slane %v11079_v32, 7  ;;  %v2192_v26 = vmul.f32 %v11088_v62, %v1958_v0  ;;  %v2193_v42 = vmul.f32 %v11089_v18, %v1960_v8  ;;  %v1967_v5 = vrot.slane %v9284_v13, 7  ;;  %v11095_v0 = vld [vmem:[#allocation71_spill] sm:$0xff]  ;;  %v11096_v62 = vld [vmem:[#allocation72_spill] sm:$0xff]  ;;  %v11105_v52 = vld [vmem:[#allocation74_spill] sm:$0xff] }
 0x43a   : > { %v1964_v54 = vsel %vm1913_vm8, %v1961_v27, %v11087_v29  ;;  %v9402_v14 = vpack.c.bf16 %v2490_v63, %v2489_v19  ;;  %6368 = vmatpush3.bf16.msra.mxu0 %v6959_v23  ;;  %v2194_v27 = vmul.f32 %v11091_v7, %v1962_v49  ;;  %v9409_v31 = vpack.c.bf16 %v11094_v39, %v11093_v51  ;;  %v6961_v29 = vld [vmem:[#allocation7 + $0x160] sm:$0xff]   ;;  %v6962_v7 = vld [vmem:[#allocation7 + $0x158] sm:$0xff]   ;;  %v11102_v39 = vld [vmem:[#allocation81_spill] sm:$0xff] }
 0x43b   : > { %v2195_v9 = vmul.f32 %v11092_v12, %v1964_v54  ;;  %6369 = vmatprep.subr.bf16.mxu0 %v6960_v47  ;;  %v9414_v8 = vpack.c.bf16 %v11096_v62, %v11095_v0  ;;  %v9417_v23 = vpack.c.bf16 %v2193_v42, %v2192_v26  ;;  %v11098_v19 = vrot.slane %v11086_v38, 7  ;;  %v11100_v26 = vld [vmem:[#allocation66_spill] sm:$0xff]  ;;  %v11103_v62 = vld [vmem:[#allocation47_spill] sm:$0xff] }
 0x43c   : > { %11090 = vst [vmem:[#allocation27_spill] sm:$0xff] %v9402_v14  ;;  %v1972_v54 = vsel %vm1913_vm8, %v1969_v50, %v1971_v40  ;;  %v1968_v18 = vsel %vm1913_vm8, %v1965_v61, %v1967_v5  ;;  %v1970_v12 = vsel %vm1913_vm8, %v1967_v5, %v1969_v50  ;;  %v11101_v42 = vld [vmem:[#allocation46_spill] sm:$0xff] }
 0x43d   : > { %6290 = vmatmul.mubr.bf16.gmra.mxu0 %v9409_v31  ;;  %11097 = vst [vmem:[#allocation23_spill] sm:$0xff] %v9417_v23  ;;  %v1966_v49 = vsel %vm1913_vm8, %v11098_v19, %v1965_v61  ;;  %v9424_v63 = vpack.c.bf16 %v2195_v9, %v2194_v27  ;;  %v2199_v51 = vmul.f32 %v11101_v42, %v1972_v54  ;;  %v1973_v9 = vrot.slane %v9321_v43, 7  ;;  %v11104_v19 = vld [vmem:[#allocation73_spill] sm:$0xff]  ;;  %v6964_v5 = vld [vmem:[#allocation7 + $0x150] sm:$0xff]   ;;  %v6970_v42 = vld [vmem:[#allocation7 + $0x140] sm:$0xff]  }
 0x43e   : > { %6293 = vmatprep.mubr.bf16.mxu0 %v9414_v8  ;;  %6370 = vmatpush3.bf16.msra.mxu0 %v6960_v47  ;;  %v2196_v47 = vmul.f32 %v11100_v26, %v1966_v49  ;;  %v2197_v0 = vmul.f32 %v11102_v39, %v1968_v18  ;;  %v2198_v27 = vmul.f32 %v11103_v62, %v1970_v12  ;;  %v1975_v61 = vrot.slane %v9356_v36, 7  ;;  %v6967_v12 = vld [vmem:[#allocation7 + $0x148] sm:$0xff]  }
 0x43f   : > { %11099 = vst [vmem:[#allocation48_spill] sm:$0xff] %v9424_v63  ;;  %6371 = vmatprep.subr.bf16.mxu0 %v6961_v29  ;;  %v9438_v50 = vpack.c.bf16 %v11105_v52, %v11104_v19  ;;  %v1974_v18 = vsel %vm1913_vm8, %v1971_v40, %v1973_v9  ;;  %v11108_v26 = vld [vmem:[#allocation53_spill] sm:$0xff]  ;;  %v9476_v62 = vpack.c.bf16 %v9049_v34, %v9041_v46  ;;  %v6984_v34 = vld [vmem:[#allocation7 + $0xa0] sm:$0xff]  }
 0x440   : > { %6354 = vmatmul.mubr.bf16.gmra.mxu1 %v9417_v23  ;;  %v11107_v23 = vld [vmem:[#allocation76_spill] sm:$0xff]  ;;  %v9445_v54 = vpack.c.bf16 %v2197_v0, %v2196_v47  ;;  %v1976_v52 = vsel %vm1913_vm8, %v1973_v9, %v1975_v61  ;;  %v11109_v47 = vld [vmem:[#allocation55_spill] sm:$0xff]  ;;  %v11110_v40 = vld [vmem:[#allocation77_spill] sm:$0xff]  ;;  %v9489_v46 = vpack.c.bf16 %v11086_v38, %v11063_v2  ;;  %vm11130_vm8 = vmmov 0  }
 0x441   : > { %6357 = vmatprep.mubr.bf16.mxu1 %v9424_v63  ;;  %v11106_v63 = vld [vmem:[#allocation75_spill] sm:$0xff]  ;;  %v6982_v9 = vld [vmem:[#allocation7 + $0xa8] sm:$0xff]   ;;  %v6987_v61 = vld [vmem:[#allocation7 + $0x90] sm:$0xff]  }
 0x442   : > { %6372 = vmatpush3.bf16.msra.mxu0 %v6961_v29  ;;  %v9442_v49 = vpack.c.bf16 %v11107_v23, %v11106_v63  ;;  %v9448_v29 = vpack.c.bf16 %v2199_v51, %v2198_v27  ;;  %v2200_v23 = vmul.f32 %v9231_v33, %v1974_v18  ;;  %v2201_v63 = vmul.f32 %v9278_v57, %v1976_v52  ;;  %v6973_v33 = vld [vmem:[#allocation7 + $0x38] sm:$0xff]   ;;  %v11111_v57 = vld [vmem:[#allocation78_spill] sm:$0xff]  ;;  %v6988_v19 = vld [vmem:[#allocation7 + $0x88] sm:$0xff]  }
 0x443   : > { %6373 = vmatprep.subr.bf16.mxu0 %v6962_v7  ;;  %v9462_v51 = vpack.c.bf16 %v11110_v40, %v8790_v25  ;;  %v9472_v0 = vpack.c.bf16 %v9034_v30, %v11111_v57  ;;  %v6981_v27 = vld [vmem:[#allocation7 + $0xb0] sm:$0xff]   ;;  %v9485_v30 = vpack.c.bf16 %v9059_v58, %v9054_v44  ;;  %v9497_v44 = vpack.c.bf16 %v9284_v13, %v11064_v48  ;;  %v6978_v18 = vld [vmem:[#allocation7 + $0x18] sm:$0xff]   ;;  %v11115_v57 = vld [vmem:[#allocation69_spill] sm:$0xff] }
 0x444   : > { %v9465_v39 = vpack.c.bf16 %v2201_v63, %v2200_v23  ;;  %v9501_v58 = vpack.c.bf16 %v11079_v32, %v11078_v6  ;;  %v9509_v13 = vpack.c.bf16 %v9356_v36, %v9321_v43  ;;  %v6990_v6 = vld [vmem:[#allocation7 + $0x80] sm:$0xff]   ;;  %v6975_v32 = vld [vmem:[#allocation7 + $0x30] sm:$0xff]   ;;  %v6976_v43 = vld [vmem:[#allocation7 + $0x28] sm:$0xff]   ;;  %v2264_v52 = vrot.slane %v11109_v47, 1 }
 0x445   : > { %6294 = vmatmul.mubr.bf16.gmra.mxu0 %v9438_v50  ;;  %v6977_v36 = vld [vmem:[#allocation7 + $0x20] sm:$0xff]   ;;  %v11112_v23 = vrot.slane %v11108_v26, 1 }
 0x446   : > { %6297 = vmatprep.mubr.bf16.mxu0 %v9442_v49  ;;  %6374 = vmatpush3.bf16.msra.mxu0 %v6962_v7  ;;  %v9458_v7 = vpack.c.bf16 %v11109_v47, %v11108_v26  ;;  %v11114_v47 = vld [vmem:[#allocation37_spill] sm:$0xff] }
 0x447   : > { %6375 = vmatprep.subr.bf16.mxu0 %v6964_v5  ;;  %v2265_v63 = vsel %vm2234_vm0, %v11112_v23, %v2264_v52  ;;  %v11119_v23 = vld [vmem:[#allocation84_spill] sm:$0xff] }
 0x448   : > { %6358 = vmatmul.mubr.bf16.gmra.mxu1 %v9445_v54 }
 0x449   : > { %6361 = vmatprep.mubr.bf16.mxu1 %v9448_v29 }
 0x44a   : > { %6376 = vmatpush3.bf16.msra.mxu0 %v6964_v5  ;;  %v6995_v5 = vld [vmem:[#allocation7 + $0x1b8] sm:$0xff]  }
 0x44b   : > { %6377 = vmatprep.subr.bf16.mxu0 %v6967_v12 }
 0x44d   : > { %6298 = vmatmul.mubr.bf16.gmra.mxu0 %v9458_v7 }
 0x44e   : > { %6301 = vmatprep.mubr.bf16.mxu0 %v9462_v51  ;;  %6378 = vmatpush3.bf16.msra.mxu0 %v6967_v12  ;;  %v6980_v12 = vld [vmem:[#allocation7 + $0x10] sm:$0xff]  }
 0x44f   : > { %6379 = vmatprep.subr.bf16.mxu0 %v6970_v42 }
 0x450   : > { %6362 = vmatmul.mubr.bf16.gmra.mxu1 %v9465_v39 }
 0x451   : > { %6429 = vmatprep.mubr.bf16.mxu1 %v9360_v35 }
 0x452   : > { %6380 = vmatpush3.bf16.msra.mxu0 %v6970_v42  ;;  %v11113_v42 = vrot.slane %v8790_v25, 1  ;;  %v6986_v25 = vld [vmem:[#allocation7] sm:$0xff]  }
 0x453   : > { %6461 = vmatprep.subr.bf16.mxu0 %v6973_v33 }
 0x454   : > { %v2267_v40 = vsel %vm2234_vm0, %v2264_v52, %v11113_v42  ;;  %v6991_v42 = vld [vmem:[#allocation7 + $0x1f0] sm:$0xff]  }
 0x455   : > { %6302 = vmatmul.mubr.bf16.gmra.mxu0 %v9472_v0 }
 0x456   : > { %6305 = vmatprep.mubr.bf16.mxu0 %v9476_v62 }
 0x458   : > { %6430 = vmatmul.mubr.bf16.vlgmr.msra.gmra.mxu1 %v9348_v41 }
 0x459   : > { %6433 = vmatprep.mubr.bf16.mxu1 %v9374_v56  ;;  %6510 = vmatpush3.bf16.msra.mxu1 %v9389_v16  ;;  %v6985_v16 = vld [vmem:[#allocation7 + $0x98] sm:$0xff]  }
 0x45a   : > { %6511 = vmatprep.subr.bf16.mxu1 %v6981_v27 }
 0x45d   : > { %6306 = vmatmul.mubr.bf16.gmra.mxu0 %v9485_v30  ;;  %6512 = vmatpush3.bf16.msra.mxu1 %v6981_v27  ;;  %v2474_v27 = vmul.f32 %v11115_v57, %v2267_v40  ;;  %v11120_v40 = vld [vmem:[#allocation85_spill] sm:$0xff]  ;;  %v11122_v57 = vmov 0.0  }
 0x45e   : > { %6309 = vmatprep.mubr.bf16.mxu0 %v9489_v46  ;;  %6513 = vmatprep.subr.bf16.mxu1 %v6982_v9 }
 0x460   : > { %6434 = vmatmul.mubr.bf16.gmra.mxu1 %v9409_v31 }
 0x461   : > { %6437 = vmatprep.mubr.bf16.mxu1 %v9414_v8  ;;  %6514 = vmatpush3.bf16.msra.mxu1 %v6982_v9  ;;  %v6983_v9 = vld [vmem:[#allocation7 + $0x8] sm:$0xff]  }
 0x462   : > { %6515 = vmatprep.subr.bf16.mxu1 %v6984_v34 }
 0x465   : > { %6310 = vmatmul.mubr.bf16.gmra.mxu0 %v9497_v44  ;;  %6516 = vmatpush3.bf16.msra.mxu1 %v6984_v34  ;;  %v6989_v34 = vld [vmem:[#allocation7 + $0x1f8] sm:$0xff]  }
 0x466   : > { %6313 = vmatprep.mubr.bf16.mxu0 %v9501_v58  ;;  %6517 = vmatprep.subr.bf16.mxu1 %v6985_v16 }
 0x468   : > { %6438 = vmatmul.mubr.bf16.gmra.mxu1 %v9438_v50 }
 0x469   : > { %6441 = vmatprep.mubr.bf16.mxu1 %v9442_v49  ;;  %6518 = vmatpush3.bf16.msra.mxu1 %v6985_v16  ;;  %v2284_v16 = vrot.slane %v11086_v38, 1 }
 0x46a   : > { %6519 = vmatprep.subr.bf16.mxu1 %v6987_v61 }
 0x46d   : > { %6314 = vmatmul.mubr.bf16.gmra.mxu0 %v9509_v13  ;;  %6520 = vmatpush3.bf16.msra.mxu1 %v6987_v61  ;;  %v11116_v61 = vrot.slane %v11064_v48, 1  ;;  %v6998_v48 = vld [vmem:[#allocation7 + $0x1a8] sm:$0xff]  }
 0x46e   : > { %6381 = vmatprep.mubr.bf16.mxu0 %v9252_v55  ;;  %6521 = vmatprep.subr.bf16.mxu1 %v6988_v19 }
 0x470   : > { %6442 = vmatmul.mubr.bf16.gmra.mxu1 %v9458_v7 }
 0x471   : > { %6445 = vmatprep.mubr.bf16.mxu1 %v9462_v51  ;;  %6522 = vmatpush3.bf16.msra.mxu1 %v6988_v19  ;;  %v2287_v19 = vsel %vm2234_vm0, %v2284_v16, %v11116_v61  ;;  %v6999_v61 = vld [vmem:[#allocation7 + $0x1c8] sm:$0xff]  }
 0x472   : > { %6523 = vmatprep.subr.bf16.mxu1 %v6990_v6 }
 0x475   : > { %6382 = vmatmul.mubr.bf16.vlgmr.msra.gmra.mxu0 %v9254_v60  ;;  %6524 = vmatpush3.bf16.msra.mxu1 %v6990_v6  ;;  %v11117_v6 = vrot.slane %v11063_v2, 1  ;;  %v7000_v2 = vld [vmem:[#allocation7 + $0x1a0] sm:$0xff]  }
 0x476   : > { %6462 = vmatpush3.bf16.msra.mxu0 %v6973_v33  ;;  %6385 = vmatprep.mubr.bf16.mxu0 %v9256_v20  ;;  %v2473_v33 = vmul.f32 %v11114_v47, %v2265_v63  ;;  %v7006_v63 = vld [vmem:[#allocation7 + $0x180] sm:$0xff]  }
 0x477   : > { %6463 = vmatprep.subr.bf16.mxu0 %v6975_v32  ;;  %6605 = vmatprep.subr.bf16.mxu1 %v6995_v5  ;;  %v11121_v47 = vld [vmem:[#allocation32_spill] sm:$0xff] }
 0x478   : > { %6446 = vmatmul.mubr.bf16.gmra.mxu1 %v9472_v0  ;;  %v9536_v26 = vpack.c.bf16 %v2474_v27, %v2473_v33  ;;  %v6992_v33 = vld [vmem:[#allocation7 + $0x1e8] sm:$0xff]   ;;  %v6993_v27 = vld [vmem:[#allocation7 + $0x1e0] sm:$0xff]  }
 0x479   : > { %6449 = vmatprep.mubr.bf16.mxu1 %v9476_v62 }
 0x47a   : > { %6464 = vmatpush3.bf16.msra.mxu0 %v6975_v32  ;;  %v2285_v32 = vsel %vm2234_vm0, %v11117_v6, %v2284_v16  ;;  %v6996_v16 = vld [vmem:[#allocation7 + $0x1d0] sm:$0xff]   ;;  %v11125_v6 = vld [vmem:[#allocation24_spill] sm:$0xff] }
 0x47b   : > { %6465 = vmatprep.subr.bf16.mxu0 %v6976_v43  ;;  %v2483_v38 = vmul.f32 %v9237_v4, %v2285_v32  ;;  %v7001_v4 = vld [vmem:[#allocation7 + $0x198] sm:$0xff]  }
 0x47c   : > { %v7005_v32 = vld [vmem:[#allocation7 + $0x238] sm:$0xff]  }
 0x47d   : > { %6386 = vmatmul.mubr.bf16.gmra.mxu0 %v9258_v21 }
 0x47e   : > { %6389 = vmatprep.mubr.bf16.mxu0 %v9260_v45  ;;  %6466 = vmatpush3.bf16.msra.mxu0 %v6976_v43  ;;  %v6997_v43 = vld [vmem:[#allocation7 + $0x1b0] sm:$0xff]  }
 0x47f   : > { %6467 = vmatprep.subr.bf16.mxu0 %v6977_v36 }
 0x480   : > { %6450 = vmatmul.mubr.bf16.gmra.mxu1 %v9485_v30 }
 0x481   : > { %6453 = vmatprep.mubr.bf16.mxu1 %v9489_v46 }
 0x482   : > { %6468 = vmatpush3.bf16.msra.mxu0 %v6977_v36  ;;  %v11118_v36 = vld [vmem:[#allocation83_spill] sm:$0xff] }
 0x483   : > { %6469 = vmatprep.subr.bf16.mxu0 %v6978_v18 }
 0x485   : > { %6390 = vmatmul.mubr.bf16.gmra.mxu0 %v9262_v53 }
 0x486   : > { %6393 = vmatprep.mubr.bf16.mxu0 %v9264_v24  ;;  %6470 = vmatpush3.bf16.msra.mxu0 %v6978_v18  ;;  %v2484_v18 = vmul.f32 %v11118_v36, %v2287_v19  ;;  %v7002_v19 = vld [vmem:[#allocation7 + $0x1c0] sm:$0xff]  }
 0x487   : > { %6471 = vmatprep.subr.bf16.mxu0 %v6980_v12 }
 0x488   : > { %6454 = vmatmul.mubr.bf16.gmra.mxu1 %v9497_v44  ;;  %v9555_v52 = vpack.c.bf16 %v2484_v18, %v2483_v38 }
 0x489   : > { %6457 = vmatprep.mubr.bf16.mxu1 %v9501_v58 }
 0x48a   : > { %6472 = vmatpush3.bf16.msra.mxu0 %v6980_v12  ;;  %v7004_v12 = vld [vmem:[#allocation7 + $0x188] sm:$0xff]  }
 0x48b   : > { %6473 = vmatprep.subr.bf16.mxu0 %v6983_v9 }
 0x48d   : > { %6394 = vmatmul.mubr.bf16.gmra.mxu0 %v9536_v26 }
 0x48e   : > { %6397 = vmatprep.mubr.bf16.mxu0 %v9287_v28  ;;  %6474 = vmatpush3.bf16.msra.mxu0 %v6983_v9  ;;  %v11123_v9 = vld [vmem:[#allocation38_spill] sm:$0xff] }
 0x48f   : > { %6475 = vmatprep.subr.bf16.mxu0 %v6986_v25 }
 0x490   : > { %6458 = vmatmul.mubr.bf16.gmra.mxu1 %v9509_v13 }
 0x491   : > { %6525 = vmatprep.mubr.bf16.mxu1 %v9252_v55 }
 0x492   : > { %6476 = vmatpush3.bf16.msra.mxu0 %v6986_v25  ;;  %v11124_v25 = vld [vmem:[#allocation33_spill] sm:$0xff] }
 0x493   : > { %6557 = vmatprep.subr.bf16.mxu0 %v6989_v34 }
 0x495   : > { %6398 = vmatmul.mubr.bf16.gmra.mxu0 %v9313_v10 }
 0x496   : > { %6401 = vmatprep.mubr.bf16.mxu0 %v9317_v15 }
 0x498   : > { %6526 = vmatmul.mubr.bf16.vlgmr.msra.gmra.mxu1 %v9254_v60 }
 0x499   : > { %6529 = vmatprep.mubr.bf16.mxu1 %v9256_v20  ;;  %6606 = vmatpush3.bf16.msra.mxu1 %v6995_v5  ;;  %v7003_v5 = vld [vmem:[#allocation7 + $0x190] sm:$0xff]  }
 0x49a   : > { %6607 = vmatprep.subr.bf16.mxu1 %v6997_v43 }
 0x49d   : > { %6402 = vmatmul.mubr.bf16.gmra.mxu0 %v9341_v37  ;;  %6608 = vmatpush3.bf16.msra.mxu1 %v6997_v43  ;;  %v11126_v43 = vld [vmem:[#allocation26_spill] sm:$0xff] }
 0x49e   : > { %6405 = vmatprep.mubr.bf16.mxu0 %v9555_v52  ;;  %6609 = vmatprep.subr.bf16.mxu1 %v6998_v48 }
 0x4a0   : > { %6530 = vmatmul.mubr.bf16.gmra.mxu1 %v9258_v21 }
 0x4a1   : > { %6533 = vmatprep.mubr.bf16.mxu1 %v9260_v45  ;;  %6610 = vmatpush3.bf16.msra.mxu1 %v6998_v48  ;;  %v11127_v48 = vld [vmem:[#allocation23_spill] sm:$0xff] }
 0x4a2   : > { %6611 = vmatprep.subr.bf16.mxu1 %v7000_v2 }
 0x4a5   : > { %6406 = vmatmul.mubr.bf16.gmra.mxu0 %v9378_v17  ;;  %6612 = vmatpush3.bf16.msra.mxu1 %v7000_v2 }
 0x4a6   : > { %6409 = vmatprep.mubr.bf16.mxu0 %v9380_v22  ;;  %6613 = vmatprep.subr.bf16.mxu1 %v7001_v4 }
 0x4a8   : > { %6534 = vmatmul.mubr.bf16.gmra.mxu1 %v9262_v53 }
 0x4a9   : > { %6537 = vmatprep.mubr.bf16.mxu1 %v9264_v24  ;;  %6614 = vmatpush3.bf16.msra.mxu1 %v7001_v4  ;;  %v11128_v4 = vld [vmem:[#allocation48_spill] sm:$0xff] }
 0x4aa   : > { %6615 = vmatprep.subr.bf16.mxu1 %v7003_v5 }
 0x4ad   : > { %6410 = vmatmul.mubr.bf16.gmra.mxu0 %v9402_v14  ;;  %6616 = vmatpush3.bf16.msra.mxu1 %v7003_v5 }
 0x4ae   : > { %6477 = vmatprep.mubr.bf16.mxu0 %v11119_v23  ;;  %6617 = vmatprep.subr.bf16.mxu1 %v7004_v12 }
 0x4b0   : > { %6538 = vmatmul.mubr.bf16.gmra.mxu1 %v9536_v26 }
 0x4b1   : > { %6541 = vmatprep.mubr.bf16.mxu1 %v9287_v28  ;;  %6618 = vmatpush3.bf16.msra.mxu1 %v7004_v12 }
 0x4b2   : > { %6619 = vmatprep.subr.bf16.mxu1 %v7006_v63 }
 0x4b5   : > { %6478 = vmatmul.mubr.bf16.vlgmr.msra.gmra.mxu0 %v11120_v40  ;;  %6620 = vmatpush3.bf16.msra.mxu1 %v7006_v63 }
 0x4b6   : > { %6558 = vmatpush3.bf16.msra.mxu0 %v6989_v34  ;;  %6481 = vmatprep.mubr.bf16.mxu0 %v11121_v47  ;;  %v6994_v34 = vld [vmem:[#allocation7 + $0x1d8] sm:$0xff]  }
 0x4b7   : > { %6559 = vmatprep.subr.bf16.mxu0 %v6991_v42  ;;  %6701 = vmatprep.subr.mxu1 %v11122_v57 }
 0x4b8   : > { %6542 = vmatmul.mubr.bf16.gmra.mxu1 %v9313_v10 }
 0x4b9   : > { %6545 = vmatprep.mubr.bf16.mxu1 %v9317_v15 }
 0x4ba   : > { %6560 = vmatpush3.bf16.msra.mxu0 %v6991_v42 }
 0x4bb   : > { %6561 = vmatprep.subr.bf16.mxu0 %v6992_v33 }
 0x4bd   : > { %6482 = vmatmul.mubr.bf16.gmra.mxu0 %v11123_v9 }
 0x4be   : > { %6485 = vmatprep.mubr.bf16.mxu0 %v11124_v25  ;;  %6562 = vmatpush3.bf16.msra.mxu0 %v6992_v33 }
 0x4bf   : > { %6563 = vmatprep.subr.bf16.mxu0 %v6993_v27 }
 0x4c0   : > { %6546 = vmatmul.mubr.bf16.gmra.mxu1 %v9341_v37 }
 0x4c1   : > { %6549 = vmatprep.mubr.bf16.mxu1 %v9555_v52 }
 0x4c2   : > { %6564 = vmatpush3.bf16.msra.mxu0 %v6993_v27 }
 0x4c3   : > { %6565 = vmatprep.subr.bf16.mxu0 %v6994_v34 }
 0x4c5   : > { %6486 = vmatmul.mubr.bf16.gmra.mxu0 %v9243_v3 }
 0x4c6   : > { %6489 = vmatprep.mubr.bf16.mxu0 %v9249_v1  ;;  %6566 = vmatpush3.bf16.msra.mxu0 %v6994_v34 }
 0x4c7   : > { %6567 = vmatprep.subr.bf16.mxu0 %v6996_v16 }
 0x4c8   : > { %6550 = vmatmul.mubr.bf16.gmra.mxu1 %v9378_v17 }
 0x4c9   : > { %6553 = vmatprep.mubr.bf16.mxu1 %v9380_v22 }
 0x4ca   : > { %6568 = vmatpush3.bf16.msra.mxu0 %v6996_v16 }
 0x4cb   : > { %6569 = vmatprep.subr.bf16.mxu0 %v6999_v61 }
 0x4cd   : > { %6490 = vmatmul.mubr.bf16.gmra.mxu0 %v9311_v11 }
 0x4ce   : > { %6493 = vmatprep.mubr.bf16.mxu0 %v11125_v6  ;;  %6570 = vmatpush3.bf16.msra.mxu0 %v6999_v61 }
 0x4cf   : > { %6571 = vmatprep.subr.bf16.mxu0 %v7002_v19 }
 0x4d0   : > { %6554 = vmatmul.mubr.bf16.gmra.mxu1 %v9402_v14 }
 0x4d1   : > { %6621 = vmatprep.mubr.bf16.mxu1 %v11119_v23 }
 0x4d2   : > { %6572 = vmatpush3.bf16.msra.mxu0 %v7002_v19 }
 0x4d3   : > { %6653 = vmatprep.subr.bf16.mxu0 %v7005_v32 }
 0x4d5   : > { %6494 = vmatmul.mubr.bf16.gmra.mxu0 %v9376_v59  ;;  %v6335_v36 = vpop.f32.mrf.mxu1 }
 0x4d6   : > { %6497 = vmatprep.mubr.bf16.mxu0 %v11126_v43 }
 0x4d7   : > { %v2832_v18 = vpop.f32.mrf.mxu1 }
 0x4d8   : > { %6622 = vmatmul.mubr.bf16.vlgmr.msra.gmra.mxu1 %v11120_v40 }
 0x4d9   : > { %6625 = vmatprep.mubr.bf16.mxu1 %v11121_v47  ;;  %v6336_v38 = vpop.f32.mrf.mxu1 }
 0x4db   : > { %v2835_v2 = vpop.f32.mrf.mxu1 }
 0x4dd   : > { %6498 = vmatmul.mubr.bf16.gmra.mxu0 %v11127_v48  ;;  %v6339_v5 = vpop.f32.mrf.mxu1 }
 0x4de   : > { %6501 = vmatprep.mubr.bf16.mxu0 %v11128_v4 }
 0x4df   : > { %v2848_v12 = vpop.f32.mrf.mxu1 }
 0x4e0   : > { %6626 = vmatmul.mubr.bf16.gmra.mxu1 %v11123_v9 }
 0x4e1   : > { %6629 = vmatprep.mubr.bf16.mxu1 %v11124_v25  ;;  %v6340_v23 = vpop.f32.mrf.mxu1 }
 0x4e3   : > { %v2851_v63 = vpop.f32.mrf.mxu1 }
 0x4e5   : > { %6502 = vmatmul.mubr.bf16.gmra.mxu0 %v9445_v54  ;;  %v6343_v42 = vpop.f32.mrf.mxu1 }
 0x4e6   : > { %6505 = vmatprep.mubr.bf16.mxu0 %v9448_v29 }
 0x4e7   : > { %v9598_v40 = vpop.f32.mrf.mxu1 }
 0x4e8   : > { %6630 = vmatmul.mubr.bf16.gmra.mxu1 %v9243_v3  ;;  %v7007_v3 = vld [vmem:[#allocation7 + $0x230] sm:$0xff]  }
 0x4e9   : > { %6633 = vmatprep.mubr.bf16.mxu1 %v9249_v1  ;;  %v9600_v47 = vpop.f32.mrf.mxu1 }
 0x4eb   : > { %v9603_v33 = vpop.f32.mrf.mxu1 }
 0x4ed   : > { %6506 = vmatmul.mubr.bf16.gmra.mxu0 %v9465_v39 }
 0x4ee   : > { %6573 = vmatprep.mubr.bf16.mxu0 %v9360_v35  ;;  %v9606_v27 = vpop.f32.mrf.mxu1 }
 0x4f0   : > { %6634 = vmatmul.mubr.bf16.gmra.mxu1 %v9311_v11  ;;  %v9610_v9 = vpop.f32.mrf.mxu1  ;;  %v7008_v11 = vld [vmem:[#allocation7 + $0x228] sm:$0xff]  }
 0x4f1   : > { %6637 = vmatprep.mubr.bf16.mxu1 %v11125_v6 }
 0x4f2   : > { %v9612_v1 = vpop.f32.mrf.mxu1 }
 0x4f4   : > { %v9615_v34 = vpop.f32.mrf.mxu1 }
 0x4f5   : > { %v6287_v25 = vpop.f32.mrf.mxu0  ;;  %6574 = vmatmul.mubr.bf16.vlgmr.msra.gmra.mxu0 %v9348_v41 }
 0x4f6   : > { %6654 = vmatpush3.bf16.msra.mxu0 %v7005_v32  ;;  %6577 = vmatprep.mubr.bf16.mxu0 %v9374_v56  ;;  %v9618_v35 = vadd.f32 %v6335_v36, %v6287_v25  ;;  %v7009_v36 = vld [vmem:[#allocation7 + $0x220] sm:$0xff]  }
 0x4f7   : > { %v2623_v16 = vpop.f32.mrf.mxu0  ;;  %6655 = vmatprep.subr.bf16.mxu0 %v7007_v3 }
 0x4f8   : > { %v9620_v61 = vadd.f32 %v2832_v18, %v2623_v16  ;;  %v9622_v19 = vpop.f32.mrf.mxu1  ;;  %6638 = vmatmul.mubr.bf16.gmra.mxu1 %v9376_v59 }
 0x4f9   : > { %v6288_v6 = vpop.f32.mrf.mxu0  ;;  %6641 = vmatprep.mubr.bf16.mxu1 %v11126_v43 }
 0x4fa   : > { %6656 = vmatpush3.bf16.msra.mxu0 %v7007_v3  ;;  %v9626_v41 = vadd.f32 %v6336_v38, %v6288_v6  ;;  %v9628_v32 = vpop.f32.mrf.mxu1  ;;  %v7010_v3 = vld [vmem:[#allocation7 + $0x218] sm:$0xff]  }
 0x4fb   : > { %v2626_v56 = vpop.f32.mrf.mxu0  ;;  %6657 = vmatprep.subr.bf16.mxu0 %v7008_v11 }
 0x4fc   : > { %v9630_v25 = vadd.f32 %v2835_v2, %v2626_v56  ;;  %v9632_v14 = vpop.f32.mrf.mxu1 }
 0x4fd   : > { %v6291_v18 = vpop.f32.mrf.mxu0  ;;  %6578 = vmatmul.mubr.bf16.gmra.mxu0 %v9409_v31 }
 0x4fe   : > { %6581 = vmatprep.mubr.bf16.mxu0 %v9414_v8  ;;  %v9636_v59 = vadd.f32 %v6339_v5, %v6291_v18  ;;  %6658 = vmatpush3.bf16.msra.mxu0 %v7008_v11  ;;  %v9638_v43 = vpop.f32.mrf.mxu1  ;;  %v7011_v11 = vld [vmem:[#allocation7 + $0x210] sm:$0xff]  }
 0x4ff   : > { %11129 = vst [vmem:[#allocation28_spill] sm:$0xff] %v9638_v43  ;;  %v2639_v38 = vpop.f32.mrf.mxu0  ;;  %6659 = vmatprep.subr.bf16.mxu0 %v7009_v36 }
 0x500   : > { %v9640_v16 = vadd.f32 %v2848_v12, %v2639_v38  ;;  %v9642_v6 = vpop.f32.mrf.mxu1  ;;  %6642 = vmatmul.mubr.bf16.gmra.mxu1 %v11127_v48 }
 0x501   : > { %v6292_v2 = vpop.f32.mrf.mxu0  ;;  %6645 = vmatprep.mubr.bf16.mxu1 %v11128_v4 }
 0x502   : > { %v9646_v31 = vadd.f32 %v6340_v23, %v6292_v2  ;;  %6660 = vmatpush3.bf16.msra.mxu0 %v7009_v36  ;;  %v9648_v8 = vpop.f32.mrf.mxu1  ;;  %v7012_v36 = vld [vmem:[#allocation7 + $0x208] sm:$0xff]  }
 0x503   : > { %v2642_v5 = vpop.f32.mrf.mxu0  ;;  %6661 = vmatprep.subr.bf16.mxu0 %v7010_v3 }
 0x504   : > { %v9650_v56 = vadd.f32 %v2851_v63, %v2642_v5  ;;  %v9652_v18 = vpop.f32.mrf.mxu1 }
 0x505   : > { %v6295_v12 = vpop.f32.mrf.mxu0  ;;  %6582 = vmatmul.mubr.bf16.gmra.mxu0 %v9438_v50 }
 0x506   : > { %6585 = vmatprep.mubr.bf16.mxu0 %v9442_v49  ;;  %v9656_v48 = vadd.f32 %v6343_v42, %v6295_v12  ;;  %6662 = vmatpush3.bf16.msra.mxu0 %v7010_v3  ;;  %v2915_v4 = vpop.f32.mrf.mxu1  ;;  %v7013_v3 = vld [vmem:[#allocation7 + $0x200] sm:$0xff]  }
 0x507   : > { %v2655_v23 = vpop.f32.mrf.mxu0  ;;  %6663 = vmatprep.subr.bf16.mxu0 %v7011_v11 }
 0x508   : > { %v9659_v38 = vadd.f32 %v9598_v40, %v2655_v23  ;;  %v6359_v2 = vpop.f32.mrf.mxu1  ;;  %6646 = vmatmul.mubr.bf16.gmra.mxu1 %v9445_v54 }
 0x509   : > { %v6296_v63 = vpop.f32.mrf.mxu0  ;;  %6649 = vmatprep.mubr.bf16.mxu1 %v9448_v29 }
 0x50a   : > { %v9664_v50 = vadd.f32 %v9600_v47, %v6296_v63  ;;  %6664 = vmatpush3.bf16.msra.mxu0 %v7011_v11  ;;  %v2928_v49 = vpop.f32.mrf.mxu1 }
 0x50b   : > { %v2658_v42 = vpop.f32.mrf.mxu0  ;;  %6665 = vmatprep.subr.bf16.mxu0 %v7012_v36 }
 0x50c   : > { %v9667_v5 = vadd.f32 %v9603_v33, %v2658_v42  ;;  %v6360_v12 = vpop.f32.mrf.mxu1 }
 0x50d   : > { %v6299_v40 = vpop.f32.mrf.mxu0  ;;  %6586 = vmatmul.mubr.bf16.gmra.mxu0 %v9458_v7 }
 0x50e   : > { %6589 = vmatprep.mubr.bf16.mxu0 %v9462_v51  ;;  %v9672_v54 = vadd.f32 %v9606_v27, %v6299_v40  ;;  %6666 = vmatpush3.bf16.msra.mxu0 %v7012_v36  ;;  %v2931_v29 = vpop.f32.mrf.mxu1 }
 0x50f   : > { %v2671_v47 = vpop.f32.mrf.mxu0  ;;  %6667 = vmatprep.subr.bf16.mxu0 %v7013_v3 }
 0x510   : > { %v9675_v11 = vadd.f32 %v9610_v9, %v2671_v47  ;;  %v6363_v23 = vpop.f32.mrf.mxu1  ;;  %6650 = vmatmul.mubr.bf16.gmra.mxu1 %v9465_v39 }
 0x511   : > { %v6300_v33 = vpop.f32.mrf.mxu0  ;;  %6733 = vmatprep.mubr.msk.f32.mxu1 %vm11130_vm8, %v11122_v57 }
 0x512   : > { %v9681_v7 = vadd.f32 %v9612_v1, %v6300_v33  ;;  %6668 = vmatpush3.bf16.msra.mxu0 %v7013_v3  ;;  %v2944_v51 = vpop.f32.mrf.mxu1 }
 0x513   : > { %v2674_v27 = vpop.f32.mrf.mxu0 }
 0x514   : > { %v9684_v36 = vadd.f32 %v9615_v34, %v2674_v27  ;;  %v6364_v63 = vpop.f32.mrf.mxu1 }
 0x515   : > { %v6303_v42 = vpop.f32.mrf.mxu0  ;;  %6590 = vmatmul.mubr.bf16.gmra.mxu0 %v9472_v0 }
 0x516   : > { %6593 = vmatprep.mubr.bf16.mxu0 %v9476_v62  ;;  %v9689_v39 = vadd.f32 %v9622_v19, %v6303_v42  ;;  %v2947_v9 = vpop.f32.mrf.mxu1 }
 0x517   : > { %v9691_v40 = vpop.f32.mrf.mxu0 }
 0x518   : > { %v9693_v1 = vpop.f32.mrf.mxu1 }
 0x519   : > { %v6304_v3 = vpop.f32.mrf.mxu0 }
 0x51a   : > { %v9696_v47 = vadd.f32 %v9632_v14, %v6304_v3  ;;  %v9698_v34 = vpop.f32.mrf.mxu1 }
 0x51b   : > { %v9700_v33 = vpop.f32.mrf.mxu0 }
 0x51c   : > { %11131 = vst [vmem:[#allocation29_spill] sm:$0xff] %v9700_v33  ;;  %v9702_v27 = vpop.f32.mrf.mxu1 }
 0x51d   : > { %11132 = vst [vmem:[#allocation52_spill] sm:$0xff] %v9702_v27  ;;  %v6307_v0 = vpop.f32.mrf.mxu0  ;;  %6594 = vmatmul.mubr.bf16.gmra.mxu0 %v9485_v30 }
 0x51e   : > { %6597 = vmatprep.mubr.bf16.mxu0 %v9489_v46  ;;  %v9707_v62 = vadd.f32 %v9642_v6, %v6307_v0  ;;  %v9709_v19 = vpop.f32.mrf.mxu1 }
 0x51f   : > { %v2703_v42 = vpop.f32.mrf.mxu0 }
 0x520   : > { %v9712_v14 = vadd.f32 %v9648_v8, %v2703_v42  ;;  %v9714_v3 = vpop.f32.mrf.mxu1 }
 0x521   : > { %11133 = vst [vmem:[#allocation56_spill] sm:$0xff] %v9714_v3  ;;  %v6308_v57 = vpop.f32.mrf.mxu0 }
 0x522   : > { %v9717_v43 = vadd.f32 %v9652_v18, %v6308_v57  ;;  %v9719_v33 = vpop.f32.mrf.mxu1 }
 0x523   : > { %11134 = vst [vmem:[#allocation30_spill] sm:$0xff] %v9719_v33  ;;  %v2706_v30 = vpop.f32.mrf.mxu0 }
 0x524   : > { %v9721_v27 = vadd.f32 %v2915_v4, %v2706_v30  ;;  %v9723_v46 = vpop.f32.mrf.mxu1 }
 0x525   : > { %v6311_v6 = vpop.f32.mrf.mxu0  ;;  %6598 = vmatmul.mubr.bf16.gmra.mxu0 %v9497_v44 }
 0x526   : > { %11135 = vst [vmem:[#allocation31_spill] sm:$0xff] %v9721_v27  ;;  %6601 = vmatprep.mubr.bf16.mxu0 %v9501_v58  ;;  %v9727_v8 = vadd.f32 %v6359_v2, %v6311_v6  ;;  %v9729_v0 = vpop.f32.mrf.mxu1 }
 0x527   : > { %v2719_v42 = vpop.f32.mrf.mxu0 }
 0x528   : > { %v9731_v3 = vadd.f32 %v2928_v49, %v2719_v42  ;;  %v9733_v57 = vpop.f32.mrf.mxu1 }
 0x529   : > { %v6312_v18 = vpop.f32.mrf.mxu0 }
 0x52a   : > { %v9735_v33 = vadd.f32 %v6360_v12, %v6312_v18  ;;  %v9737_v4 = vpop.f32.mrf.mxu1 }
 0x52b   : > { %11136 = vst [vmem:[#allocation60_spill] sm:$0xff] %v9737_v4  ;;  %v2722_v30 = vpop.f32.mrf.mxu0 }
 0x52c   : > { %v9739_v27 = vadd.f32 %v2931_v29, %v2722_v30  ;;  %v9741_v44 = vpop.f32.mrf.mxu1 }
 0x52d   : > { %v6315_v58 = vpop.f32.mrf.mxu0  ;;  %6602 = vmatmul.mubr.bf16.gmra.mxu0 %v9509_v13 }
 0x52e   : > { %11137 = vst [vmem:[#allocation63_spill] sm:$0xff] %v9739_v27  ;;  %6669 = vmatprep.mubr.bf16.mxu0 %v9252_v55  ;;  %v9745_v2 = vadd.f32 %v6363_v23, %v6315_v58  ;;  %v9747_v49 = vpop.f32.mrf.mxu1 }
 0x52f   : > { %v2735_v6 = vpop.f32.mrf.mxu0 }
 0x530   : > { %v9749_v42 = vadd.f32 %v2944_v51, %v2735_v6  ;;  %v9751_v12 = vpop.f32.mrf.mxu1 }
 0x531   : > { %v6316_v18 = vpop.f32.mrf.mxu0 }
 0x532   : > { %v9753_v4 = vadd.f32 %v6364_v63, %v6316_v18  ;;  %v9755_v29 = vpop.f32.mrf.mxu1 }
 0x533   : > { %v2738_v30 = vpop.f32.mrf.mxu0 }
 0x534   : > { %v9757_v27 = vadd.f32 %v2947_v9, %v2738_v30  ;;  %v9759_v13 = vpop.f32.mrf.mxu1 }
 0x535   : > { %v6383_v55 = vpop.f32.mrf.mxu0  ;;  %6670 = vmatmul.mubr.bf16.vlgmr.msra.gmra.mxu0 %v9254_v60 }
 0x536   : > { %11138 = vst [vmem:[#allocation34_spill] sm:$0xff] %v9757_v27  ;;  %v9763_v23 = vadd.f32 %v6383_v55, %v9618_v35  ;;  %6673 = vmatprep.mubr.bf16.mxu0 %v9256_v20  ;;  %v9766_v51 = vpop.f32.mrf.mxu1 }
 0x537   : > { %v3058_v58 = vpop.f32.mrf.mxu0 }
 0x538   : > { %v9769_v63 = vadd.f32 %v3058_v58, %v9620_v61  ;;  %v9771_v6 = vpop.f32.mrf.mxu1 }
 0x539   : > { %v6384_v9 = vpop.f32.mrf.mxu0 }
 0x53a   : > { %11139 = vst [vmem:[#allocation64_spill] sm:$0xff] %v9769_v63  ;;  %v9774_v18 = vadd.f32 %v6384_v9, %v9626_v41  ;;  %v9776_v30 = vpop.f32.mrf.mxu1 }
 0x53b   : > { %v3061_v60 = vpop.f32.mrf.mxu0 }
 0x53c   : > { %v9779_v35 = vadd.f32 %v3061_v60, %v9630_v25  ;;  %v9781_v55 = vpop.f32.mrf.mxu1 }
 0x53d   : > { %v6387_v20 = vpop.f32.mrf.mxu0  ;;  %6674 = vmatmul.mubr.bf16.gmra.mxu0 %v9258_v21 }
 0x53e   : > { %11140 = vst [vmem:[#allocation35_spill] sm:$0xff] %v9779_v35  ;;  %v9785_v61 = vadd.f32 %v6387_v20, %v9636_v59  ;;  %6677 = vmatprep.mubr.bf16.mxu0 %v9260_v45  ;;  %v9788_v58 = vpop.f32.mrf.mxu1 }
 0x53f   : > { %v3074_v41 = vpop.f32.mrf.mxu0 }
 0x540   : > { %v9791_v9 = vadd.f32 %v3074_v41, %v9640_v16  ;;  %v9793_v63 = vpop.f32.mrf.mxu1 }
 0x541   : > { %11141 = vst [vmem:[#allocation45_spill] sm:$0xff] %v9793_v63  ;;  %v6388_v25 = vpop.f32.mrf.mxu0 }
 0x542   : > { %v9796_v60 = vadd.f32 %v6388_v25, %v9646_v31  ;;  %v9798_v35 = vpop.f32.mrf.mxu1 }
 0x543   : > { %11142 = vst [vmem:[#allocation57_spill] sm:$0xff] %v9798_v35  ;;  %v3077_v21 = vpop.f32.mrf.mxu0 }
 0x544   : > { %v9801_v59 = vadd.f32 %v3077_v21, %v9650_v56  ;;  %v9803_v20 = vpop.f32.mrf.mxu1 }
 0x545   : > { %11143 = vst [vmem:[#allocation65_spill] sm:$0xff] %v9803_v20  ;;  %v6391_v45 = vpop.f32.mrf.mxu0  ;;  %6678 = vmatmul.mubr.bf16.gmra.mxu0 %v9262_v53 }
 0x546   : > { %v9807_v16 = vadd.f32 %v6391_v45, %v9656_v48  ;;  %6681 = vmatprep.mubr.bf16.mxu0 %v9264_v24  ;;  %v9810_v41 = vpop.f32.mrf.mxu1 }
 0x547   : > { %11144 = vst [vmem:[#allocation39_spill] sm:$0xff] %v9810_v41  ;;  %v3090_v31 = vpop.f32.mrf.mxu0 }
 0x548   : > { %v9813_v25 = vadd.f32 %v3090_v31, %v9659_v38  ;;  %v9815_v27 = vpop.f32.mrf.mxu1 }
 0x549   : > { %11145 = vst [vmem:[#allocation40_spill] sm:$0xff] %v9815_v27  ;;  %v6392_v56 = vpop.f32.mrf.mxu0 }
 0x54a   : > { %v9818_v21 = vadd.f32 %v6392_v56, %v9664_v50  ;;  %v9820_v20 = vpop.f32.mrf.mxu1 }
 0x54b   : > { %11146 = vst [vmem:[#allocation21_spill] sm:$0xff] %v9820_v20  ;;  %v3093_v53 = vpop.f32.mrf.mxu0 }
 0x54c   : > { %v9823_v48 = vadd.f32 %v3093_v53, %v9667_v5  ;;  %v9825_v45 = vpop.f32.mrf.mxu1 }
 0x54d   : > { %11147 = vst [vmem:[#allocation54_spill] sm:$0xff] %v9825_v45  ;;  %v6395_v24 = vpop.f32.mrf.mxu0  ;;  %6682 = vmatmul.mubr.bf16.gmra.mxu0 %v9536_v26 }
 0x54e   : > { %v9829_v38 = vadd.f32 %v6395_v24, %v9672_v54  ;;  %6685 = vmatprep.mubr.bf16.mxu0 %v9287_v28  ;;  %v9832_v31 = vpop.f32.mrf.mxu1  ;;  %v2897_v28 = vadd.f32 %v9628_v32, %v9691_v40 }
 0x54f   : > { %11148 = vst [vmem:[#allocation79_spill] sm:$0xff] %v9832_v31  ;;  %v3106_v50 = vpop.f32.mrf.mxu0 }
 0x550   : > { %v9835_v56 = vadd.f32 %v3106_v50, %v9675_v11  ;;  %v6459_v20 = vpop.f32.mrf.mxu1 }
 0x551   : > { %v6396_v27 = vpop.f32.mrf.mxu0 }
 0x552   : > { %v9838_v5 = vadd.f32 %v6396_v27, %v9681_v7  ;;  %v9840_v53 = vpop.f32.mrf.mxu1 }
 0x553   : > { %11149 = vst [vmem:[#allocation50_spill] sm:$0xff] %v9840_v53  ;;  %v3109_v45 = vpop.f32.mrf.mxu0 }
 0x554   : > { %v9843_v26 = vadd.f32 %v3109_v45, %v9684_v36  ;;  %v6460_v54 = vpop.f32.mrf.mxu1 }
 0x555   : > { %v6399_v24 = vpop.f32.mrf.mxu0  ;;  %6686 = vmatmul.mubr.bf16.gmra.mxu0 %v9313_v10 }
 0x556   : > { %v9849_v11 = vadd.f32 %v6399_v24, %v9689_v39  ;;  %6689 = vmatprep.mubr.bf16.mxu0 %v9317_v15  ;;  %v9852_v7 = vpop.f32.mrf.mxu1 }
 0x557   : > { %11151 = vst [vmem:[#allocation59_spill] sm:$0xff] %v9852_v7  ;;  %v3122_v27 = vpop.f32.mrf.mxu0 }
 0x558   : > { %11150 = vst [vmem:[#allocation58_spill] sm:$0xff] %v9849_v11  ;;  %v9854_v20 = vadd.f32 %v3122_v27, %v2897_v28  ;;  %v6527_v50 = vpop.f32.mrf.mxu1 }
 0x559   : > { %v6400_v36 = vpop.f32.mrf.mxu0 }
 0x55a   : > { %v9857_v45 = vadd.f32 %v6400_v36, %v9696_v47  ;;  %v3763_v54 = vpop.f32.mrf.mxu1 }
 0x55b   : > { %v9859_v10 = vpop.f32.mrf.mxu0 }
 0x55c   : > { %11152 = vst [vmem:[#allocation41_spill] sm:$0xff] %v9857_v45  ;;  %v6528_v53 = vpop.f32.mrf.mxu1 }
 0x55d   : > { %v6403_v32 = vpop.f32.mrf.mxu0  ;;  %6690 = vmatmul.mubr.bf16.gmra.mxu0 %v9341_v37 }
 0x55e   : > { %v9863_v39 = vadd.f32 %v6403_v32, %v9707_v62  ;;  %6693 = vmatprep.mubr.bf16.mxu0 %v9555_v52  ;;  %v3766_v15 = vpop.f32.mrf.mxu1 }
 0x55f   : > { %v3138_v40 = vpop.f32.mrf.mxu0 }
 0x560   : > { %11153 = vst [vmem:[#allocation43_spill] sm:$0xff] %v9863_v39  ;;  %v9867_v24 = vadd.f32 %v3138_v40, %v9712_v14  ;;  %v6531_v28 = vpop.f32.mrf.mxu1 }
 0x561   : > { %v6404_v47 = vpop.f32.mrf.mxu0 }
 0x562   : > { %v9870_v27 = vadd.f32 %v6404_v47, %v9717_v43  ;;  %v3779_v36 = vpop.f32.mrf.mxu1 }
 0x563   : > { %v9872_v7 = vpop.f32.mrf.mxu0 }
 0x564   : > { %11154 = vst [vmem:[#allocation61_spill] sm:$0xff] %v9870_v27  ;;  %v6532_v31 = vpop.f32.mrf.mxu1 }
 0x565   : > { %v6407_v37 = vpop.f32.mrf.mxu0  ;;  %6694 = vmatmul.mubr.bf16.gmra.mxu0 %v9378_v17 }
 0x566   : > { %v9876_v62 = vadd.f32 %v6407_v37, %v9727_v8  ;;  %6697 = vmatprep.mubr.bf16.mxu0 %v9380_v22  ;;  %v3782_v52 = vpop.f32.mrf.mxu1  ;;  %v11159_v37 = vld [vmem:[#allocation27_spill] sm:$0xff] }
 0x567   : > { %v3154_v14 = vpop.f32.mrf.mxu0 }
 0x568   : > { %11155 = vst [vmem:[#allocation80_spill] sm:$0xff] %v9876_v62  ;;  %v9880_v32 = vadd.f32 %v3154_v14, %v9731_v3  ;;  %v9882_v40 = vpop.f32.mrf.mxu1 }
 0x569   : > { %v6408_v43 = vpop.f32.mrf.mxu0 }
 0x56a   : > { %11156 = vst [vmem:[#allocation82_spill] sm:$0xff] %v9880_v32  ;;  %v9885_v47 = vadd.f32 %v6408_v43, %v9735_v33  ;;  %v9887_v27 = vpop.f32.mrf.mxu1 }
 0x56b   : > { %v9889_v39 = vpop.f32.mrf.mxu0 }
 0x56c   : > { %11157 = vst [vmem:[#allocation20_spill] sm:$0xff] %v9885_v47  ;;  %11158 = vst [vmem:[#allocation42_spill] sm:$0xff] %v9889_v39  ;;  %v9891_v17 = vpop.f32.mrf.mxu1 }
 0x56d   : > { %v6411_v8 = vpop.f32.mrf.mxu0  ;;  %6698 = vmatmul.mubr.bf16.gmra.mxu0 %v11159_v37 }
 0x56e   : > { %v9895_v22 = vadd.f32 %v6411_v8, %v9745_v2  ;;  %v9897_v3 = vpop.f32.mrf.mxu1 }
 0x56f   : > { %v3170_v14 = vpop.f32.mrf.mxu0 }
 0x570   : > { %11160 = vst [vmem:[#allocation67_spill] sm:$0xff] %v9895_v22  ;;  %v9900_v62 = vadd.f32 %v3170_v14, %v9749_v42  ;;  %v9902_v33 = vpop.f32.mrf.mxu1 }
 0x571   : > { %v6412_v43 = vpop.f32.mrf.mxu0 }
 0x572   : > { %11161 = vst [vmem:[#allocation36_spill] sm:$0xff] %v9900_v62  ;;  %v9905_v47 = vadd.f32 %v6412_v43, %v9753_v4  ;;  %v9907_v41 = vpop.f32.mrf.mxu1  ;;  %v11164_v4 = vld [vmem:[#allocation52_spill] sm:$0xff] }
 0x573   : > { %v9909_v39 = vpop.f32.mrf.mxu0 }
 0x574   : > { %11162 = vst [vmem:[#allocation49_spill] sm:$0xff] %v9905_v47  ;;  %11163 = vst [vmem:[#allocation25_spill] sm:$0xff] %v9909_v39  ;;  %v9911_v37 = vpop.f32.mrf.mxu1 }
 0x575   : > { %v6479_v2 = vpop.f32.mrf.mxu0 }
 0x576   : > { %v3548_v8 = vadd.f32 %v6479_v2, %v9693_v1  ;;  %v9914_v22 = vpop.f32.mrf.mxu1 }
 0x577   : > { %v3539_v32 = vpop.f32.mrf.mxu0 }
 0x578   : > { %v3540_v42 = vadd.f32 %v3539_v32, %v9698_v34  ;;  %v3890_v14 = vadd.f32 %v6527_v50, %v3548_v8  ;;  %v9917_v62 = vpop.f32.mrf.mxu1  ;;  %v11165_v32 = vld [vmem:[#allocation56_spill] sm:$0xff] }
 0x579   : > { %v6480_v45 = vpop.f32.mrf.mxu0 }
 0x57a   : > { %v3551_v43 = vadd.f32 %v6480_v45, %v11164_v4  ;;  %v9921_v47 = vadd.f32 %v3890_v14, %v9791_v9  ;;  %v3888_v39 = vadd.f32 %v3763_v54, %v3540_v42  ;;  %v9923_v35 = vpop.f32.mrf.mxu1  ;;  %v11166_v42 = vld [vmem:[#allocation30_spill] sm:$0xff] }
 0x57b   : > { %v3542_v63 = vpop.f32.mrf.mxu0 }
 0x57c   : > { %v3543_v1 = vadd.f32 %v3542_v63, %v9709_v19  ;;  %v9927_v2 = vadd.f32 %v3888_v39, %v9763_v23  ;;  %v3891_v11 = vadd.f32 %v6528_v53, %v3551_v43  ;;  %v9929_v34 = vpop.f32.mrf.mxu1 }
 0x57d   : > { %v6483_v50 = vpop.f32.mrf.mxu0 }
 0x57e   : > { %v3564_v8 = vadd.f32 %v6483_v50, %v11165_v32  ;;  %v9933_v45 = vadd.f32 %v3891_v11, %v9801_v59  ;;  %v3889_v9 = vadd.f32 %v3766_v15, %v3543_v1  ;;  %v9935_v14 = vpop.f32.mrf.mxu1 }
 0x57f   : > { %v3555_v54 = vpop.f32.mrf.mxu0 }
 0x580   : > { %v3556_v4 = vadd.f32 %v3555_v54, %v11166_v42  ;;  %v9939_v19 = vadd.f32 %v3889_v9, %v9774_v18  ;;  %v3894_v23 = vadd.f32 %v6531_v28, %v3564_v8  ;;  %v9941_v63 = vpop.f32.mrf.mxu1  ;;  %v11167_v54 = vld [vmem:[#allocation60_spill] sm:$0xff] }
 0x581   : > { %v6484_v53 = vpop.f32.mrf.mxu0 }
 0x582   : > { %v3567_v39 = vadd.f32 %v6484_v53, %v9723_v46  ;;  %v9945_v43 = vadd.f32 %v3894_v23, %v9813_v25  ;;  %v3892_v59 = vadd.f32 %v3779_v36, %v3556_v4  ;;  %v9947_v11 = vpop.f32.mrf.mxu1 }
 0x583   : > { %v3558_v15 = vpop.f32.mrf.mxu0 }
 0x584   : > { %v3559_v1 = vadd.f32 %v3558_v15, %v9729_v0  ;;  %v9951_v50 = vadd.f32 %v3892_v59, %v9785_v61  ;;  %v3895_v18 = vadd.f32 %v6532_v31, %v3567_v39  ;;  %v9953_v32 = vpop.f32.mrf.mxu1 }
 0x585   : > { %v6487_v28 = vpop.f32.mrf.mxu0 }
 0x586   : > { %v3580_v8 = vadd.f32 %v6487_v28, %v9733_v57  ;;  %v9957_v46 = vadd.f32 %v3895_v18, %v9823_v48  ;;  %v3893_v25 = vadd.f32 %v3782_v52, %v3559_v1  ;;  %v9959_v9 = vpop.f32.mrf.mxu1 }
 0x587   : > { %v3571_v36 = vpop.f32.mrf.mxu0 }
 0x588   : > { %v3572_v42 = vadd.f32 %v3571_v36, %v11167_v54  ;;  %v9963_v0 = vadd.f32 %v3893_v25, %v9796_v60  ;;  %v3898_v61 = vadd.f32 %v9882_v40, %v3580_v8  ;;  %v9966_v31 = vpop.f32.mrf.mxu1  ;;  %v11168_v25 = vld [vmem:[#allocation29_spill] sm:$0xff]  ;;  %v11169_v36 = vld [vmem:[#allocation28_spill] sm:$0xff] }
 0x589   : > { %v6488_v4 = vpop.f32.mrf.mxu0 }
 0x58a   : > { %v3583_v23 = vadd.f32 %v6488_v4, %v9741_v44  ;;  %v9970_v57 = vadd.f32 %v3898_v61, %v9835_v56  ;;  %v3896_v48 = vadd.f32 %v9887_v27, %v3572_v42  ;;  %v9973_v52 = vpop.f32.mrf.mxu1 }
 0x58b   : > { %v3574_v53 = vpop.f32.mrf.mxu0 }
 0x58c   : > { %v3575_v39 = vadd.f32 %v3574_v53, %v9747_v49  ;;  %v9977_v60 = vadd.f32 %v3896_v48, %v9807_v16  ;;  %v3899_v40 = vadd.f32 %v9891_v17, %v3583_v23  ;;  %v9980_v59 = vpop.f32.mrf.mxu1 }
 0x58d   : > { %v6491_v15 = vpop.f32.mrf.mxu0 }
 0x58e   : > { %v3596_v44 = vadd.f32 %v6491_v15, %v9751_v12  ;;  %v9984_v56 = vadd.f32 %v3899_v40, %v9843_v26  ;;  %v3897_v27 = vadd.f32 %v9897_v3, %v3575_v39  ;;  %v9987_v1 = vpop.f32.mrf.mxu1  ;;  %v2900_v12 = vadd.f32 %v11169_v36, %v11168_v25 }
 0x58f   : > { %v3587_v18 = vpop.f32.mrf.mxu0 }
 0x590   : > { %v3588_v49 = vadd.f32 %v3587_v18, %v9755_v29  ;;  %v9991_v16 = vadd.f32 %v3897_v27, %v9818_v21  ;;  %v3902_v17 = vadd.f32 %v9902_v33, %v3596_v44  ;;  %v6555_v28 = vpop.f32.mrf.mxu1  ;;  %v3202_v21 = vadd.f32 %v9859_v10, %v2900_v12  ;;  %v11173_v18 = vld [vmem:[#allocation31_spill] sm:$0xff] }
 0x591   : > { %v6492_v8 = vpop.f32.mrf.mxu0  ;;  %v11172_v27 = vmov 0.0  }
 0x592   : > { %v3599_v26 = vadd.f32 %v6492_v8, %v9759_v13  ;;  %v9998_v54 = vadd.f32 %v3902_v17, %v9854_v20  ;;  %v3900_v3 = vadd.f32 %v9907_v41, %v3588_v49  ;;  %v10001_v42 = vpop.f32.mrf.mxu1  ;;  %v11174_v17 = vld [vmem:[#allocation58_spill] sm:$0xff] }
 0x593   : > { %v3590_v29 = vpop.f32.mrf.mxu0 }
 0x594   : > { %v3591_v61 = vadd.f32 %v3590_v29, %v9766_v51  ;;  %v10006_v33 = vadd.f32 %v3900_v3, %v9829_v38  ;;  %v3903_v4 = vadd.f32 %v9911_v37, %v3599_v26  ;;  %v6556_v23 = vpop.f32.mrf.mxu1  ;;  %v10022_v37 = vld [vmem:[#allocation8 + $0x78] sm:$0xff]  ;;  %v11179_v3 = vld [vmem:[#allocation57_spill] sm:$0xff] }
 0x595   : > { %v6495_v48 = vpop.f32.mrf.mxu0  ;;  %11170 = vst [vmem:[#allocation51_spill] sm:$0xff] %v10022_v37  ;;  %6702 = vmatpush3.msra.mxu1 %v10022_v37 }
 0x596   : > { %v3612_v13 = vadd.f32 %v6495_v48, %v9771_v6  ;;  %v10010_v20 = vadd.f32 %v3903_v4, %v3202_v21  ;;  %v3901_v41 = vadd.f32 %v9914_v22, %v3591_v61  ;;  %v10013_v53 = vpop.f32.mrf.mxu1  ;;  %6703 = vmatprep.subr.mxu1 %v11172_v27  ;;  %v10053_v4 = vld [vmem:[#allocation8 + $0x68] sm:$0xff] }
 0x597   : > { %v3603_v39 = vpop.f32.mrf.mxu0  ;;  %11182 = vst [vmem:[#allocation72_spill] sm:$0xff] %v10053_v4  ;;  %v11183_v48 = vld [vmem:[#allocation65_spill] sm:$0xff] }
 0x598   : > { %v3604_v10 = vadd.f32 %v3603_v39, %v9776_v30  ;;  %v10017_v51 = vadd.f32 %v3901_v41, %v9838_v5  ;;  %v3906_v38 = vadd.f32 %v9917_v62, %v3612_v13  ;;  %v10020_v40 = vpop.f32.mrf.mxu1  ;;  %v3206_v62 = vadd.f32 %v9872_v7, %v11173_v18  ;;  %v11184_v41 = vld [vmem:[#allocation82_spill] sm:$0xff] }
 0x599   : > { %v6496_v15 = vpop.f32.mrf.mxu0 }
 0x59a   : > { %v3615_v6 = vadd.f32 %v6496_v15, %v9781_v55  ;;  %v10027_v22 = vadd.f32 %v3906_v38, %v9867_v24  ;;  %v3904_v44 = vadd.f32 %v9923_v35, %v3604_v10  ;;  %v4273_v30 = vpop.f32.mrf.mxu1  ;;  %v10040_v24 = vld [vmem:[#allocation8 + $0x70] sm:$0xff]  ;;  %v11177_v35 = vld [vmem:[#allocation45_spill] sm:$0xff]  ;;  %v11186_v38 = vld [vmem:[#allocation63_spill] sm:$0xff] }
 0x59b   : > { %v3606_v5 = vpop.f32.mrf.mxu0  ;;  %11176 = vst [vmem:[#allocation68_spill] sm:$0xff] %v10040_v24  ;;  %6704 = vmatpush3.msra.mxu1 %v10040_v24  ;;  %v11187_v15 = vld [vmem:[#allocation42_spill] sm:$0xff]  ;;  %v11189_v30 = vld [vmem:[#allocation43_spill] sm:$0xff] }
 0x59c   : > { %11171 = vst [vmem:[#allocation62_spill] sm:$0xff] %v10027_v22  ;;  %v3607_v49 = vadd.f32 %v3606_v5, %v9788_v58  ;;  %v10035_v28 = vadd.f32 %v3904_v44, %v11174_v17  ;;  %v3907_v8 = vadd.f32 %v9929_v34, %v3615_v6  ;;  %v10038_v55 = vpop.f32.mrf.mxu1  ;;  %6705 = vmatprep.subr.mxu1 %v11172_v27  ;;  %v11180_v34 = vld [vmem:[#allocation41_spill] sm:$0xff]  ;;  %v11188_v44 = vld [vmem:[#allocation39_spill] sm:$0xff]  ;;  %v11192_v17 = vld [vmem:[#allocation40_spill] sm:$0xff] }
 0x59d   : > { %v6499_v25 = vpop.f32.mrf.mxu0  ;;  %6706 = vmatpush3.msra.mxu1 %v10053_v4  ;;  %v3210_v6 = vadd.f32 %v11187_v15, %v11186_v38  ;;  %v11203_v38 = vld [vmem:[#allocation79_spill] sm:$0xff]  ;;  %v11204_v15 = vld [vmem:[#allocation80_spill] sm:$0xff] }
 0x59e   : > { %11175 = vst [vmem:[#allocation44_spill] sm:$0xff] %v10035_v28  ;;  %v3628_v36 = vadd.f32 %v6499_v25, %v11177_v35  ;;  %v10044_v12 = vadd.f32 %v3907_v8, %v3206_v62  ;;  %v3905_v7 = vadd.f32 %v9935_v14, %v3607_v49  ;;  %v4275_v26 = vpop.f32.mrf.mxu1  ;;  %6707 = vmatprep.subr.mxu1 %v11172_v27  ;;  %v10069_v49 = vld [vmem:[#allocation8 + $0x60] sm:$0xff] }
 0x59f   : > { %v3619_v58 = vpop.f32.mrf.mxu0  ;;  %11191 = vst [vmem:[#allocation81_spill] sm:$0xff] %v10069_v49  ;;  %6708 = vmatpush3.msra.mxu1 %v10069_v49  ;;  %v11195_v26 = vld [vmem:[#allocation61_spill] sm:$0xff] }
 0x5a0   : > { %11178 = vst [vmem:[#allocation70_spill] sm:$0xff] %v10044_v12  ;;  %v3620_v29 = vadd.f32 %v3619_v58, %v11179_v3  ;;  %v10050_v21 = vadd.f32 %v3905_v7, %v11180_v34  ;;  %v3910_v61 = vadd.f32 %v9941_v63, %v3628_v36  ;;  %6709 = vmatprep.subr.mxu1 %v11172_v27  ;;  %v11194_v36 = vld [vmem:[#allocation21_spill] sm:$0xff]  ;;  %v11198_v34 = vld [vmem:[#allocation54_spill] sm:$0xff]  ;;  %v11235_v12 = vld [vmem:[#allocation64_spill] sm:$0xff] }
 0x5a1   : > { %v6500_v23 = vpop.f32.mrf.mxu0 }
 0x5a2   : > { %11181 = vst [vmem:[#allocation71_spill] sm:$0xff] %v10050_v21  ;;  %v3631_v13 = vadd.f32 %v6500_v23, %v11183_v48  ;;  %v10058_v14 = vadd.f32 %v3910_v61, %v11184_v41  ;;  %v3908_v39 = vadd.f32 %v9947_v11, %v3620_v29  ;;  %v10082_v29 = vld [vmem:[#allocation8 + $0x58] sm:$0xff]  ;;  %v11199_v23 = vld [vmem:[#allocation36_spill] sm:$0xff]  ;;  %v11201_v41 = vld [vmem:[#allocation34_spill] sm:$0xff] }
 0x5a3   : > { %v3622_v10 = vpop.f32.mrf.mxu0  ;;  %11197 = vst [vmem:[#allocation74_spill] sm:$0xff] %v10082_v29  ;;  %6710 = vmatpush3.msra.mxu1 %v10082_v29 }
 0x5a4   : > { %11185 = vst [vmem:[#allocation66_spill] sm:$0xff] %v10058_v14  ;;  %v3623_v63 = vadd.f32 %v3622_v10, %v11188_v44  ;;  %v10066_v5 = vadd.f32 %v3908_v39, %v11189_v30  ;;  %v3911_v18 = vadd.f32 %v9953_v32, %v3631_v13  ;;  %6711 = vmatprep.subr.mxu1 %v11172_v27  ;;  %v11202_v39 = vld [vmem:[#allocation25_spill] sm:$0xff]  ;;  %v10098_v30 = vld [vmem:[#allocation8 + $0x50] sm:$0xff] }
 0x5a5   : > { %v6503_v62 = vpop.f32.mrf.mxu0  ;;  %v3214_v10 = vadd.f32 %v11202_v39, %v11201_v41  ;;  %11206 = vst [vmem:[#allocation53_spill] sm:$0xff] %v10098_v30  ;;  %6712 = vmatpush3.msra.mxu1 %v10098_v30  ;;  %v11216_v41 = vld [vmem:[#allocation49_spill] sm:$0xff] }
 0x5a6   : > { %11190 = vst [vmem:[#allocation46_spill] sm:$0xff] %v10066_v5  ;;  %v3644_v8 = vadd.f32 %v6503_v62, %v11192_v17  ;;  %v10072_v25 = vadd.f32 %v3911_v18, %v3210_v6  ;;  %v3909_v11 = vadd.f32 %v9959_v9, %v3623_v63  ;;  %6713 = vmatprep.subr.mxu1 %v11172_v27  ;;  %v11208_v17 = vld [vmem:[#allocation50_spill] sm:$0xff] }
 0x5a7   : > { %v3635_v35 = vpop.f32.mrf.mxu0 }
 0x5a8   : > { %11193 = vst [vmem:[#allocation47_spill] sm:$0xff] %v10072_v25  ;;  %v3636_v7 = vadd.f32 %v3635_v35, %v11194_v36  ;;  %v10079_v58 = vadd.f32 %v3909_v11, %v11195_v26  ;;  %v3914_v32 = vadd.f32 %v9966_v31, %v3644_v8  ;;  %v11209_v11 = vld [vmem:[#allocation20_spill] sm:$0xff] }
 0x5a9   : > { %v6504_v3 = vpop.f32.mrf.mxu0 }
 0x5aa   : > { %11196 = vst [vmem:[#allocation73_spill] sm:$0xff] %v10079_v58  ;;  %v3647_v61 = vadd.f32 %v6504_v3, %v11198_v34  ;;  %v10086_v48 = vadd.f32 %v3914_v32, %v11199_v23  ;;  %v3912_v9 = vadd.f32 %v9973_v52, %v3636_v7  ;;  %v10109_v7 = vld [vmem:[#allocation8 + $0x48] sm:$0xff]  ;;  %v11213_v3 = vld [vmem:[#allocation67_spill] sm:$0xff]  ;;  %v10118_v23 = vld [vmem:[#allocation8 + $0x40] sm:$0xff] }
 0x5ab   : > { %v3638_v13 = vpop.f32.mrf.mxu0  ;;  %11211 = vst [vmem:[#allocation78_spill] sm:$0xff] %v10109_v7  ;;  %6714 = vmatpush3.msra.mxu1 %v10109_v7  ;;  %11215 = vst [vmem:[#allocation69_spill] sm:$0xff] %v10118_v23 }
 0x5ac   : > { %11200 = vst [vmem:[#allocation75_spill] sm:$0xff] %v10086_v48  ;;  %v3639_v31 = vadd.f32 %v3638_v13, %v11203_v38  ;;  %v10095_v6 = vadd.f32 %v3912_v9, %v11204_v15  ;;  %v3915_v44 = vadd.f32 %v9980_v59, %v3647_v61  ;;  %6715 = vmatprep.subr.mxu1 %v11172_v27  ;;  %v10129_v38 = vld [vmem:[#allocation8 + $0x38] sm:$0xff] }
 0x5ad   : > { %v6507_v63 = vpop.f32.mrf.mxu0  ;;  %6716 = vmatpush3.msra.mxu1 %v10118_v23  ;;  %11218 = vst [vmem:[#allocation84_spill] sm:$0xff] %v10129_v38 }
 0x5ae   : > { %11205 = vst [vmem:[#allocation76_spill] sm:$0xff] %v10095_v6  ;;  %v10100_v18 = vadd.f32 %v3915_v44, %v3214_v10  ;;  %v3913_v52 = vadd.f32 %v9987_v1, %v3639_v31  ;;  %v11212_v1 = vld [vmem:[#allocation59_spill] sm:$0xff]  ;;  %6717 = vmatprep.subr.mxu1 %v11172_v27  ;;  %v10142_v63 = vpop.f32.mrf.mxu1 }
 0x5af   : > { %v3651_v62 = vpop.f32.mrf.mxu0  ;;  %6718 = vmatpush3.msra.mxu1 %v10129_v38 }
 0x5b0   : > { %11207 = vst [vmem:[#allocation55_spill] sm:$0xff] %v10100_v18  ;;  %v3652_v8 = vadd.f32 %v3651_v62, %v11208_v17  ;;  %v10107_v35 = vadd.f32 %v3913_v52, %v11209_v11  ;;  %6719 = vmatprep.subr.mxu1 %v11172_v27  ;;  %v10148_v17 = vpop.f32.mrf.mxu1  ;;  %v10154_v11 = vld [vmem:[#allocation8 + $0x30] sm:$0xff] }
 0x5b1   : > { %v6508_v36 = vpop.f32.mrf.mxu0  ;;  %11219 = vst [vmem:[#allocation85_spill] sm:$0xff] %v10154_v11  ;;  %6720 = vmatpush3.msra.mxu1 %v10154_v11 }
 0x5b2   : > { %11210 = vst [vmem:[#allocation77_spill] sm:$0xff] %v10107_v35  ;;  %v3916_v59 = vadd.f32 %v10001_v42, %v3652_v8  ;;  %v10156_v36 = vld [vmem:[#allocation8 + $0x28] sm:$0xff]  ;;  %6721 = vmatprep.subr.mxu1 %v11172_v27 }
 0x5b3   : > { %v3654_v26 = vpop.f32.mrf.mxu0  ;;  %11220 = vst [vmem:[#allocation32_spill] sm:$0xff] %v10156_v36  ;;  %6722 = vmatpush3.msra.mxu1 %v10156_v36 }
 0x5b4   : > { %v3655_v32 = vadd.f32 %v3654_v26, %v11212_v1  ;;  %v10116_v34 = vadd.f32 %v3916_v59, %v11213_v3  ;;  %v10159_v59 = vpop.f32.mrf.mxu1  ;;  %v10164_v1 = vld [vmem:[#allocation8 + $0x20] sm:$0xff]  ;;  %6723 = vmatprep.subr.mxu1 %v11172_v27  ;;  %v10170_v3 = vld [vmem:[#allocation8 + $0x18] sm:$0xff] }
 0x5b5   : > { %v6575_v61 = vpop.f32.mrf.mxu0  ;;  %11221 = vst [vmem:[#allocation38_spill] sm:$0xff] %v10164_v1  ;;  %11222 = vst [vmem:[#allocation33_spill] sm:$0xff] %v10170_v3  ;;  %6724 = vmatpush3.msra.mxu1 %v10164_v1  ;;  %v10188_v1 = vld [vmem:[#allocation8] sm:$0xff] }
 0x5b6   : > { %11214 = vst [vmem:[#allocation37_spill] sm:$0xff] %v10116_v34  ;;  %v3917_v9 = vadd.f32 %v10013_v53, %v3655_v32  ;;  %v10122_v13 = vadd.f32 %v10020_v40, %v6575_v61  ;;  %v4290_v61 = vpop.f32.mrf.mxu1  ;;  %6725 = vmatprep.subr.mxu1 %v11172_v27  ;;  %11225 = vst [vmem:[#allocation23_spill] sm:$0xff] %v10188_v1 }
 0x5b7   : > { %v4066_v42 = vpop.f32.mrf.mxu0  ;;  %6726 = vmatpush3.msra.mxu1 %v10170_v3 }
 0x5b8   : > { %v10127_v39 = vadd.f32 %v3917_v9, %v11216_v41  ;;  %v10176_v42 = vld [vmem:[#allocation8 + $0x10] sm:$0xff]  ;;  %6727 = vmatprep.subr.mxu1 %v11172_v27 }
 0x5b9   : > { %v6576_v10 = vpop.f32.mrf.mxu0  ;;  %11223 = vst [vmem:[#allocation24_spill] sm:$0xff] %v10176_v42  ;;  %6728 = vmatpush3.msra.mxu1 %v10176_v42 }
 0x5ba   : > { %11217 = vst [vmem:[#allocation83_spill] sm:$0xff] %v10127_v39  ;;  %v10132_v31 = vadd.f32 %v10038_v55, %v6576_v10  ;;  %v10182_v10 = vld [vmem:[#allocation8 + $0x8] sm:$0xff]  ;;  %6729 = vmatprep.subr.mxu1 %v11172_v27 }
 0x5bb   : > { %v4068_v53 = vpop.f32.mrf.mxu0  ;;  %11224 = vst [vmem:[#allocation26_spill] sm:$0xff] %v10182_v10  ;;  %6730 = vmatpush3.msra.mxu1 %v10182_v10 }
 0x5bc   : > { %v6631_v53 = vpop.f32.mrf.mxu1  ;;  %6731 = vmatprep.subr.mxu1 %v11172_v27 }
 0x5bd   : > { %v10136_v40 = vpop.f32.mrf.mxu0  ;;  %6732 = vmatpush3.msra.mxu1 %v10188_v1 }
 0x5be   : > { %v4303_v3 = vpop.f32.mrf.mxu1  ;;  %6736 = vmatprep.subr.mxu1 %v11172_v27 }
 0x5bf   : > { %v10138_v15 = vpop.f32.mrf.mxu0 }
 0x5c0   : > { %v10200_v23 = vpop.f32.mrf.mxu1 }
 0x5c1   : > { %v10140_v44 = vpop.f32.mrf.mxu0 }
 0x5c2   : > { %v10206_v10 = vpop.f32.mrf.mxu1 }
 0x5c3   : > { %v10144_v52 = vpop.f32.mrf.mxu0 }
 0x5c4   : > { %v10212_v1 = vpop.f32.mrf.mxu1 }
 0x5c5   : > { %v10146_v62 = vpop.f32.mrf.mxu0 }
 0x5c6   : > { %v10218_v27 = vpop.f32.mrf.mxu1 }
 0x5c7   : > { %v10150_v55 = vpop.f32.mrf.mxu0 }
 0x5c8   : > { %v10224_v34 = vpop.f32.mrf.mxu1 }
 0x5c9   : > { %v10152_v8 = vpop.f32.mrf.mxu0 }
 0x5ca   : > { %v10230_v6 = vpop.f32.mrf.mxu1 }
 0x5cb   : > { %v10161_v26 = vpop.f32.mrf.mxu0 }
 0x5cc   : > { %v10236_v25 = vpop.f32.mrf.mxu1 }
 0x5cd   : > { %v10167_v32 = vpop.f32.mrf.mxu0 }
 0x5cf   : > { %v10173_v9 = vpop.f32.mrf.mxu0 }
 0x5d1   : > { %v10179_v41 = vpop.f32.mrf.mxu0 }
 0x5d3   : > { %v10185_v36 = vpop.f32.mrf.mxu0 }
 0x5d5   : > { %v10191_v11 = vpop.f32.mrf.mxu0 }
 0x5d7   : > { %v10195_v38 = vpop.f32.mrf.mxu0 }
 0x5d9   : > { %v10198_v42 = vpop.f32.mrf.mxu0 }
 0x5db   : > { %v10202_v7 = vpop.f32.mrf.mxu0 }
 0x5dd   : > { %v10204_v30 = vpop.f32.mrf.mxu0 }
 0x5df   : > { %v10208_v29 = vpop.f32.mrf.mxu0 }
 0x5e1   : > { %v10210_v49 = vpop.f32.mrf.mxu0 }
 0x5e3   : > { %v10214_v4 = vpop.f32.mrf.mxu0 }
 0x5e4   : > { %11226 = vst [vmem:[#allocation48_spill] sm:$0xff] %v10214_v4  ;;  %v11236_v4 = vld [vmem:[#allocation35_spill] sm:$0xff] }
 0x5e5   : > { %v10216_v24 = vpop.f32.mrf.mxu0 }
 0x5e6   : > { %11227 = vst [vmem:[#allocation27_spill] sm:$0xff] %v10216_v24 }
 0x5e7   : > { %v10220_v37 = vpop.f32.mrf.mxu0 }
 0x5e8   : > { %11228 = vst [vmem:[#allocation52_spill] sm:$0xff] %v10220_v37 }
 0x5e9   : > { %v10222_v39 = vpop.f32.mrf.mxu0 }
 0x5ea   : > { %11229 = vst [vmem:[#allocation56_spill] sm:$0xff] %v10222_v39  ;;  %v10241_v39 = vpop.f32.mrf.mxu1 }
 0x5eb   : > { %v10226_v35 = vpop.f32.mrf.mxu0 }
 0x5ec   : > { %11230 = vst [vmem:[#allocation30_spill] sm:$0xff] %v10226_v35  ;;  %v10247_v28 = vpop.f32.mrf.mxu1 }
 0x5ed   : > { %v10228_v18 = vpop.f32.mrf.mxu0 }
 0x5ee   : > { %11231 = vst [vmem:[#allocation60_spill] sm:$0xff] %v10228_v18 }
 0x5ef   : > { %v10232_v48 = vpop.f32.mrf.mxu0 }
 0x5f0   : > { %11232 = vst [vmem:[#allocation29_spill] sm:$0xff] %v10232_v48 }
 0x5f1   : > { %v10234_v58 = vpop.f32.mrf.mxu0 }
 0x5f2   : > { %11233 = vst [vmem:[#allocation28_spill] sm:$0xff] %v10234_v58  ;;  %v4296_v58 = vadd.f32 %v10142_v63, %v10136_v40 }
 0x5f3   : > { %v10238_v5 = vpop.f32.mrf.mxu0 }
 0x5f4   : > { %11234 = vst [vmem:[#allocation31_spill] sm:$0xff] %v10238_v5 }
 0x5f5   : > { %v6671_v14 = vpop.f32.mrf.mxu0 }
 0x5f6   : > { %v4622_v21 = vadd.f32 %v6671_v14, %v10122_v13  ;;  %v4288_v14 = vadd.f32 %v10148_v17, %v10138_v15  ;;  %v10256_v13 = vpop.f32.mrf.mxu1 }
 0x5f7   : > { %v4497_v37 = vpop.f32.mrf.mxu0 }
 0x5f8   : > { %v10244_v35 = vadd.f32 %v4622_v21, %v11235_v12  ;;  %v4299_v21 = vadd.f32 %v10159_v59, %v10140_v44  ;;  %v10270_v15 = vpop.f32.mrf.mxu1 }
 0x5f9   : > { %v6672_v18 = vpop.f32.mrf.mxu0 }
 0x5fa   : > { %v4623_v24 = vadd.f32 %v6672_v18, %v10132_v31  ;;  %v4740_v44 = vmul.f32 %v10244_v35, %v10244_v35 }
 0x5fb   : > { %v4499_v48 = vpop.f32.mrf.mxu0 }
 0x5fc   : > { %v10252_v5 = vadd.f32 %v4623_v24, %v11236_v4  ;;  %v4291_v4 = vadd.f32 %v4290_v61, %v10144_v52 }
 0x5fd   : > { %v6675_v22 = vpop.f32.mrf.mxu0 }
 0x5fe   : > { %v4626_v37 = vadd.f32 %v6675_v22, %v4296_v58  ;;  %v4741_v31 = vmul.f32 %v10252_v5, %v10252_v5  ;;  %v4312_v58 = vadd.f32 %v6631_v53, %v10146_v62  ;;  %v4702_v63 = vadd.f32 %v10252_v5, %v10244_v35 }
 0x5ff   : > { %v4511_v12 = vpop.f32.mrf.mxu0  ;;  %v4304_v62 = vadd.f32 %v4303_v3, %v10150_v55  ;;  %v4315_v55 = vadd.f32 %v10200_v23, %v10152_v8 }
 0x600   : > { %v10261_v18 = vadd.f32 %v4626_v37, %v9921_v47  ;;  %v4624_v48 = vadd.f32 %v4511_v12, %v4288_v14  ;;  %v4772_v59 = vadd.f32 %v4741_v31, %v4740_v44  ;;  %v10286_v12 = vpop.f32.mrf.mxu1 }
 0x601   : > { %v6676_v24 = vpop.f32.mrf.mxu0 }
 0x602   : > { %v10267_v40 = vadd.f32 %v4624_v48, %v9927_v2  ;;  %v4627_v22 = vadd.f32 %v6676_v24, %v4299_v21 }
 0x603   : > { %v4514_v47 = vpop.f32.mrf.mxu0 }
 0x604   : > { %v4742_v17 = vmul.f32 %v10267_v40, %v10267_v40  ;;  %v10279_v52 = vadd.f32 %v4627_v22, %v9933_v45  ;;  %v4625_v2 = vadd.f32 %v4514_v47, %v4291_v4  ;;  %v4703_v53 = vadd.f32 %v4702_v63, %v10267_v40  ;;  %v10306_v63 = vpop.f32.mrf.mxu1 }
 0x605   : > { %v6679_v61 = vpop.f32.mrf.mxu0  ;;  %v4744_v22 = vmul.f32 %v10261_v18, %v10261_v18 }
 0x606   : > { %v10284_v14 = vadd.f32 %v4625_v2, %v9939_v19  ;;  %v4630_v37 = vadd.f32 %v6679_v61, %v4312_v58  ;;  %v4773_v21 = vadd.f32 %v4772_v59, %v4742_v17  ;;  %v4307_v19 = vadd.f32 %v10206_v10, %v10161_v26 }
 0x607   : > { %v4527_v48 = vpop.f32.mrf.mxu0  ;;  %v4745_v8 = vmul.f32 %v10279_v52, %v10279_v52 }
 0x608   : > { %v4704_v24 = vadd.f32 %v4703_v53, %v10284_v14  ;;  %v4743_v45 = vmul.f32 %v10284_v14, %v10284_v14  ;;  %v10292_v31 = vadd.f32 %v4630_v37, %v9945_v43  ;;  %v4628_v4 = vadd.f32 %v4527_v48, %v4304_v62  ;;  %v10324_v48 = vpop.f32.mrf.mxu1 }
 0x609   : > { %v6680_v3 = vpop.f32.mrf.mxu0  ;;  %v4328_v43 = vadd.f32 %v10212_v1, %v10167_v32  ;;  %v4320_v37 = vadd.f32 %v10218_v27, %v10173_v9 }
 0x60a   : > { %v4705_v58 = vadd.f32 %v4704_v24, %v10261_v18  ;;  %v4774_v44 = vadd.f32 %v4773_v21, %v4743_v45  ;;  %v10302_v47 = vadd.f32 %v4628_v4, %v9951_v50  ;;  %v4631_v17 = vadd.f32 %v6680_v3, %v4315_v55 }
 0x60b   : > { %v4530_v23 = vpop.f32.mrf.mxu0  ;;  %v4331_v21 = vadd.f32 %v10224_v34, %v10179_v41  ;;  %v4748_v34 = vmul.f32 %v10292_v31, %v10292_v31 }
 0x60c   : > { %v4775_v26 = vadd.f32 %v4774_v44, %v4744_v22  ;;  %v4706_v10 = vadd.f32 %v4705_v58, %v10279_v52  ;;  %v4629_v2 = vadd.f32 %v4530_v23, %v4307_v19  ;;  %v4746_v59 = vmul.f32 %v10302_v47, %v10302_v47  ;;  %v10337_v22 = vpop.f32.mrf.mxu1 }
 0x60d   : > { %v10314_v50 = vadd.f32 %v4631_v17, %v9957_v46  ;;  %v6683_v61 = vpop.f32.mrf.mxu0  ;;  %v4344_v23 = vadd.f32 %v10236_v25, %v10191_v11 }
 0x60e   : > { %v4707_v1 = vadd.f32 %v4706_v10, %v10302_v47  ;;  %v4776_v32 = vadd.f32 %v4775_v26, %v4745_v8  ;;  %v10318_v62 = vadd.f32 %v4629_v2, %v9963_v0  ;;  %v4634_v53 = vadd.f32 %v6683_v61, %v4328_v43  ;;  %v4367_v61 = vpop.f32.mrf.mxu1 }
 0x60f   : > { %v4543_v24 = vpop.f32.mrf.mxu0  ;;  %v4323_v0 = vadd.f32 %v10230_v6, %v10185_v36  ;;  %v4749_v58 = vmul.f32 %v10314_v50, %v10314_v50  ;;  %v4336_v8 = vadd.f32 %v10241_v39, %v10195_v38 }
 0x610   : > { %v4777_v45 = vadd.f32 %v4776_v32, %v4746_v59  ;;  %v4708_v46 = vadd.f32 %v4707_v1, %v10318_v62  ;;  %v4747_v4 = vmul.f32 %v10318_v62, %v10318_v62  ;;  %v10330_v55 = vadd.f32 %v4634_v53, %v9970_v57 }
 0x611   : > { %v4632_v19 = vadd.f32 %v4543_v24, %v4320_v37  ;;  %v6684_v27 = vpop.f32.mrf.mxu0 }
 0x612   : > { %v4709_v9 = vadd.f32 %v4708_v46, %v10292_v31  ;;  %v4778_v41 = vadd.f32 %v4777_v45, %v4747_v4  ;;  %v4635_v3 = vadd.f32 %v6684_v27, %v4331_v21  ;;  %v4752_v53 = vmul.f32 %v10330_v55, %v10330_v55  ;;  %v6648_v4 = vpop.f32.mrf.mxu1 }
 0x613   : > { %v10342_v57 = vadd.f32 %v4632_v19, %v9977_v60  ;;  %v4546_v44 = vpop.f32.mrf.mxu0  ;;  %v4339_v45 = vadd.f32 %v10256_v13, %v10202_v7  ;;  %v4360_v46 = vadd.f32 %v10270_v15, %v10204_v30 }
 0x614   : > { %v4779_v43 = vadd.f32 %v4778_v41, %v4748_v34  ;;  %v4710_v6 = vadd.f32 %v4709_v9, %v10314_v50  ;;  %v10346_v36 = vadd.f32 %v4635_v3, %v9984_v56  ;;  %v4633_v17 = vadd.f32 %v4546_v44, %v4323_v0  ;;  %v4370_v3 = vpop.f32.mrf.mxu1 }
 0x615   : > { %v6687_v26 = vpop.f32.mrf.mxu0  ;;  %v4750_v60 = vmul.f32 %v10342_v57, %v10342_v57  ;;  %v4347_v56 = vadd.f32 %v10247_v28, %v10198_v42 }
 0x616   : > { %v4711_v10 = vadd.f32 %v4710_v6, %v10342_v57  ;;  %v4780_v2 = vadd.f32 %v4779_v43, %v4749_v58  ;;  %v10356_v59 = vadd.f32 %v4633_v17, %v9991_v16  ;;  %v4638_v1 = vadd.f32 %v6687_v26, %v4344_v23  ;;  %v11237_v6 = vld [vmem:[#allocation62_spill] sm:$0xff]  ;;  %v11238_v26 = vld [vmem:[#allocation48_spill] sm:$0xff] }
 0x617   : > { %v4559_v32 = vpop.f32.mrf.mxu0 }
 0x618   : > { %v4781_v25 = vadd.f32 %v4780_v2, %v4750_v60  ;;  %v4712_v11 = vadd.f32 %v4711_v10, %v10356_v59  ;;  %v4751_v39 = vmul.f32 %v10356_v59, %v10356_v59  ;;  %v4636_v38 = vadd.f32 %v4559_v32, %v4336_v8 }
 0x619   : > { %v10366_v37 = vadd.f32 %v4638_v1, %v9998_v54  ;;  %v6688_v16 = vpop.f32.mrf.mxu0  ;;  %v4753_v54 = vmul.f32 %v10346_v36, %v10346_v36  ;;  %v4355_v10 = vadd.f32 %v10324_v48, %v11238_v26 }
 0x61a   : > { %v4713_v21 = vadd.f32 %v4712_v11, %v10330_v55  ;;  %v4782_v28 = vadd.f32 %v4781_v25, %v4751_v39  ;;  %v10370_v42 = vadd.f32 %v4636_v38, %v10006_v33  ;;  %v4639_v24 = vadd.f32 %v6688_v16, %v4347_v56  ;;  %v6651_v56 = vpop.f32.mrf.mxu1  ;;  %v11240_v25 = vld [vmem:[#allocation27_spill] sm:$0xff]  ;;  %v11241_v39 = vld [vmem:[#allocation70_spill] sm:$0xff] }
 0x61b   : > { %v4562_v0 = vpop.f32.mrf.mxu0  ;;  %v4352_v33 = vadd.f32 %v10286_v12, %v10208_v29  ;;  %v4376_v11 = vadd.f32 %v10337_v22, %v11240_v25 }
 0x61c   : > { %v4783_v19 = vadd.f32 %v4782_v28, %v4752_v53  ;;  %v4714_v27 = vadd.f32 %v4713_v21, %v10346_v36  ;;  %v10380_v34 = vadd.f32 %v4639_v24, %v10010_v20  ;;  %v4637_v9 = vadd.f32 %v4562_v0, %v4339_v45  ;;  %v11242_v24 = vld [vmem:[#allocation52_spill] sm:$0xff] }
 0x61d   : > { %v6691_v41 = vpop.f32.mrf.mxu0  ;;  %v4754_v30 = vmul.f32 %v10370_v42, %v10370_v42  ;;  %v4363_v20 = vadd.f32 %v10306_v63, %v10210_v49  ;;  %v4756_v49 = vmul.f32 %v10366_v37, %v10366_v37  ;;  %v4368_v45 = vadd.f32 %v4367_v61, %v11242_v24 }
 0x61e   : > { %v4715_v7 = vadd.f32 %v4714_v27, %v10370_v42  ;;  %v4784_v13 = vadd.f32 %v4783_v19, %v4753_v54  ;;  %v4642_v15 = vadd.f32 %v6691_v41, %v4360_v46  ;;  %v10388_v58 = vadd.f32 %v4637_v9, %v10017_v51  ;;  %v11239_v51 = vld [vmem:[#allocation44_spill] sm:$0xff]  ;;  %v11243_v46 = vld [vmem:[#allocation71_spill] sm:$0xff]  ;;  %v4383_v19 = vpop.f32.mrf.mxu1 }
 0x61f   : > { %v4575_v44 = vpop.f32.mrf.mxu0  ;;  %v4757_v48 = vmul.f32 %v10380_v34, %v10380_v34  ;;  %v11244_v41 = vld [vmem:[#allocation56_spill] sm:$0xff] }
 0x620   : > { %v4785_v43 = vadd.f32 %v4784_v13, %v4754_v30  ;;  %v10393_v29 = vadd.f32 %v4642_v15, %v11237_v6  ;;  %v4640_v12 = vadd.f32 %v4575_v44, %v4352_v33  ;;  %v4716_v17 = vadd.f32 %v4715_v7, %v10388_v58  ;;  %v11245_v13 = vld [vmem:[#allocation66_spill] sm:$0xff]  ;;  %v6652_v26 = vpop.f32.mrf.mxu1 }
 0x621   : > { %v4755_v23 = vmul.f32 %v10388_v58, %v10388_v58  ;;  %v6692_v8 = vpop.f32.mrf.mxu0  ;;  %v4379_v7 = vadd.f32 %v6648_v4, %v11244_v41  ;;  %v11246_v6 = vld [vmem:[#allocation30_spill] sm:$0xff]  ;;  %v11253_v41 = vld [vmem:[#allocation75_spill] sm:$0xff] }
 0x622   : > { %v10401_v60 = vadd.f32 %v4640_v12, %v11239_v51  ;;  %v4643_v2 = vadd.f32 %v6692_v8, %v4363_v20  ;;  %v4717_v63 = vadd.f32 %v4716_v17, %v10366_v37  ;;  %v4371_v12 = vadd.f32 %v4370_v3, %v11246_v6  ;;  %v11247_v17 = vld [vmem:[#allocation46_spill] sm:$0xff] }
 0x623   : > { %v4786_v1 = vadd.f32 %v4785_v43, %v4755_v23  ;;  %v4578_v32 = vpop.f32.mrf.mxu0  ;;  %v4760_v4 = vmul.f32 %v10393_v29, %v10393_v29 }
 0x624   : > { %v10409_v38 = vadd.f32 %v4643_v2, %v11241_v39  ;;  %v4641_v53 = vadd.f32 %v4578_v32, %v4355_v10  ;;  %v4718_v21 = vadd.f32 %v4717_v63, %v10380_v34  ;;  %v4758_v27 = vmul.f32 %v10401_v60, %v10401_v60 }
 0x625   : > { %v4787_v16 = vadd.f32 %v4786_v1, %v4756_v49  ;;  %v6695_v28 = vpop.f32.mrf.mxu0  ;;  %v11248_v49 = vld [vmem:[#allocation60_spill] sm:$0xff]  ;;  %v11249_v1 = vld [vmem:[#allocation47_spill] sm:$0xff] }
 0x626   : > { %v10416_v0 = vadd.f32 %v4641_v53, %v11243_v46  ;;  %v4646_v54 = vadd.f32 %v6695_v28, %v4376_v11  ;;  %v4719_v22 = vadd.f32 %v4718_v21, %v10401_v60  ;;  %v4392_v63 = vadd.f32 %v6651_v56, %v11248_v49  ;;  %v11251_v21 = vld [vmem:[#allocation73_spill] sm:$0xff] }
 0x627   : > { %v4788_v33 = vadd.f32 %v4787_v16, %v4757_v48  ;;  %v4591_v9 = vpop.f32.mrf.mxu0  ;;  %v4761_v3 = vmul.f32 %v10409_v38, %v10409_v38  ;;  %v11250_v48 = vld [vmem:[#allocation29_spill] sm:$0xff] }
 0x628   : > { %v4759_v30 = vmul.f32 %v10416_v0, %v10416_v0  ;;  %v10425_v15 = vadd.f32 %v4646_v54, %v11245_v13  ;;  %v4644_v61 = vadd.f32 %v4591_v9, %v4368_v45  ;;  %v4720_v20 = vadd.f32 %v4719_v22, %v10416_v0  ;;  %v4386_v45 = vpop.f32.mrf.mxu1 }
 0x629   : > { %v4789_v44 = vadd.f32 %v4788_v33, %v4758_v27  ;;  %v6696_v43 = vpop.f32.mrf.mxu0  ;;  %v4384_v16 = vadd.f32 %v4383_v19, %v11250_v48  ;;  %v11252_v27 = vld [vmem:[#allocation28_spill] sm:$0xff] }
 0x62a   : > { %v10430_v23 = vadd.f32 %v4644_v61, %v11247_v17  ;;  %v4647_v8 = vadd.f32 %v6696_v43, %v4379_v7  ;;  %v4721_v10 = vadd.f32 %v4720_v20, %v10393_v29  ;;  %v4395_v33 = vadd.f32 %v6652_v26, %v11252_v27  ;;  %v11255_v43 = vld [vmem:[#allocation76_spill] sm:$0xff] }
 0x62b   : > { %v4790_v51 = vadd.f32 %v4789_v44, %v4759_v30  ;;  %v4594_v2 = vpop.f32.mrf.mxu0  ;;  %v11254_v44 = vld [vmem:[#allocation31_spill] sm:$0xff] }
 0x62c   : > { %v10437_v32 = vadd.f32 %v4647_v8, %v11249_v1  ;;  %v4645_v25 = vadd.f32 %v4594_v2, %v4371_v12  ;;  %v4722_v39 = vadd.f32 %v4721_v10, %v10409_v38  ;;  %v4762_v46 = vmul.f32 %v10430_v23, %v10430_v23 }
 0x62d   : > { %v4791_v11 = vadd.f32 %v4790_v51, %v4760_v4  ;;  %v6699_v53 = vpop.f32.mrf.mxu0  ;;  %v4387_v20 = vadd.f32 %v4386_v45, %v11254_v44  ;;  %v11256_v4 = vld [vmem:[#allocation55_spill] sm:$0xff]  ;;  %v4764_v2 = vmul.f32 %v10425_v15, %v10425_v15  ;;  %v11258_v45 = vld [vmem:[#allocation37_spill] sm:$0xff] }
 0x62e   : > { %v10444_v28 = vadd.f32 %v4645_v25, %v11251_v21  ;;  %v4650_v24 = vadd.f32 %v6699_v53, %v4392_v63  ;;  %v4723_v56 = vadd.f32 %v4722_v39, %v10430_v23  ;;  %v11257_v63 = vld [vmem:[#allocation77_spill] sm:$0xff] }
 0x62f   : > { %v4792_v54 = vadd.f32 %v4791_v11, %v4761_v3  ;;  %v4607_v22 = vpop.f32.mrf.mxu0  ;;  %v4765_v11 = vmul.f32 %v10437_v32, %v10437_v32 }
 0x630   : > { %v4763_v9 = vmul.f32 %v10444_v28, %v10444_v28  ;;  %v10453_v7 = vadd.f32 %v4650_v24, %v11253_v41  ;;  %v4648_v19 = vadd.f32 %v4607_v22, %v4384_v16  ;;  %v4724_v13 = vadd.f32 %v4723_v56, %v10444_v28 }
 0x631   : > { %v4793_v30 = vadd.f32 %v4792_v54, %v4762_v46  ;;  %v6700_v61 = vpop.f32.mrf.mxu0  ;;  %v11259_v54 = vld [vmem:[#allocation83_spill] sm:$0xff] }
 0x632   : > { %v10458_v6 = vadd.f32 %v4648_v19, %v11255_v43  ;;  %v4651_v12 = vadd.f32 %v6700_v61, %v4395_v33  ;;  %v4725_v17 = vadd.f32 %v4724_v13, %v10425_v15  ;;  %v4770_v43 = vmul.f32 %v11258_v45, %v11258_v45 }
 0x633   : > { %v4794_v8 = vadd.f32 %v4793_v30, %v4763_v9  ;;  %v4610_v26 = vpop.f32.mrf.mxu0  ;;  %v4768_v9 = vmul.f32 %v10453_v7, %v10453_v7 }
 0x634   : > { %v10462_v10 = vadd.f32 %v4651_v12, %v11256_v4  ;;  %v4649_v51 = vadd.f32 %v4610_v26, %v4387_v20  ;;  %v4726_v49 = vadd.f32 %v4725_v17, %v10437_v32  ;;  %v4766_v16 = vmul.f32 %v10458_v6, %v10458_v6  ;;  %v11260_v4 = vld [vmem:[#allocation51_spill] sm:$0xff] }
 0x635   : > { %v4795_v25 = vadd.f32 %v4794_v8, %v4764_v2  ;;  %v4771_v26 = vmul.f32 %v11259_v54, %v11259_v54 }
 0x636   : > { %v10468_v1 = vadd.f32 %v4649_v51, %v11257_v63  ;;  %v4727_v3 = vadd.f32 %v4726_v49, %v10458_v6  ;;  %v4769_v13 = vmul.f32 %v10462_v10, %v10462_v10  ;;  %v11261_v51 = vmov 0.0   ;;  %v11262_v49 = vld [vmem:[#allocation68_spill] sm:$0xff] }
 0x637   : > { %v4796_v53 = vadd.f32 %v4795_v25, %v4765_v11  ;;  %v11263_v63 = vld [vmem:[#allocation72_spill] sm:$0xff]  ;;  %v11265_v11 = vld [vmem:[#allocation74_spill] sm:$0xff] }
 0x638   : > { %v4728_v39 = vadd.f32 %v4727_v3, %v10468_v1  ;;  %v4767_v46 = vmul.f32 %v10468_v1, %v10468_v1  ;;  %v11264_v3 = vld [vmem:[#allocation81_spill] sm:$0xff] }
 0x639   : > { %v4797_v24 = vadd.f32 %v4796_v53, %v4766_v16  ;;  %v11266_v53 = vld [vmem:[#allocation53_spill] sm:$0xff] }
 0x63a   : > { %v4729_v48 = vadd.f32 %v4728_v39, %v10453_v7 }
 0x63b   : > { %v4798_v33 = vadd.f32 %v4797_v24, %v4767_v46  ;;  %v11269_v24 = vld [vmem:[#allocation84_spill] sm:$0xff]  ;;  %v11270_v46 = vld [vmem:[#allocation85_spill] sm:$0xff] }
 0x63c   : > { %v4730_v21 = vadd.f32 %v4729_v48, %v10462_v10  ;;  %v11267_v48 = vld [vmem:[#allocation78_spill] sm:$0xff] }
 0x63d   : > { %v4799_v30 = vadd.f32 %v4798_v33, %v4768_v9  ;;  %v11272_v33 = vld [vmem:[#allocation38_spill] sm:$0xff]  ;;  %v11273_v9 = vld [vmem:[#allocation33_spill] sm:$0xff] }
 0x63e   : > { %v4731_v56 = vadd.f32 %v4730_v21, %v11258_v45  ;;  %v11268_v21 = vld [vmem:[#allocation69_spill] sm:$0xff] }
 0x63f   : > { %v4800_v44 = vadd.f32 %v4799_v30, %v4769_v13  ;;  %v11275_v30 = vld [vmem:[#allocation26_spill] sm:$0xff] }
 0x640   : > { %v4732_v22 = vadd.f32 %v4731_v56, %v11259_v54 }
 0x641   : > { %v4801_v17 = vadd.f32 %v4800_v44, %v4770_v43  ;;  %v7014_v44 = vld [vmem:[#allocation10 + $0x38] sm:$0xff]   ;;  %v7016_v43 = vld [vmem:[#allocation10 + $0x28] sm:$0xff]  }
 0x642   : > { %v4733_v27 = vrot.slane %v4732_v22, 4  ;;  %6771 = vmatprep.subr.bf16.mxu0 %v7014_v44 }
 0x643   : > { %v4802_v2 = vadd.f32 %v4801_v17, %v4771_v26  ;;  %6772 = vmatpush3.bf16.msra.mxu0 %v7014_v44  ;;  %v7018_v17 = vld [vmem:[#allocation10 + $0x18] sm:$0xff]   ;;  %v7020_v26 = vld [vmem:[#allocation10 + $0x8] sm:$0xff]  }
 0x644   : > { %v4734_v41 = vadd.f32 %v4733_v27, %v4732_v22  ;;  %v11271_v22 = vld [vmem:[#allocation32_spill] sm:$0xff] }
 0x645   : > { %v4803_v25 = vrot.slane %v4802_v2, 4 }
 0x646   : > { %v4735_v19 = vrot.slane %v4734_v41, 2 }
 0x647   : > { %v4804_v39 = vadd.f32 %v4803_v25, %v4802_v2 }
 0x648   : > { %v4736_v61 = vadd.f32 %v4735_v19, %v4734_v41  ;;  %v11274_v19 = vld [vmem:[#allocation24_spill] sm:$0xff] }
 0x649   : > { %v4805_v16 = vrot.slane %v4804_v39, 2 }
 0x64a   : > { %v4737_v20 = vrot.slane %v4736_v61, 1 }
 0x64b   : > { %v4806_v56 = vadd.f32 %v4805_v16, %v4804_v39 }
 0x64c   : > { %v4738_v12 = vadd.f32 %v4737_v20, %v4736_v61  ;;  %v11276_v61 = vld [vmem:[#allocation23_spill] sm:$0xff]  ;;  %v7015_v20 = vld [vmem:[#allocation10 + $0x30] sm:$0xff]  }
 0x64d   : > { %v4807_v27 = vrot.slane %v4806_v56, 1  ;;  %6773 = vmatprep.subr.bf16.mxu0 %v7015_v20 }
 0x64e   : > { %v4739_v8 = vmul.f32 0.00390625, %v4738_v12  ;;  %6774 = vmatpush3.bf16.msra.mxu0 %v7015_v20  ;;  %v7017_v12 = vld [vmem:[#allocation10 + $0x20] sm:$0xff]  }
 0x64f   : > { %v4808_v41 = vadd.f32 %v4807_v27, %v4806_v56  ;;  %6775 = vmatprep.subr.bf16.mxu0 %v7016_v43 }
 0x650   : > { %6734 = vmatmul.mubr.f32.vlgmr.msra.gmra.mxu1 %v4739_v8  ;;  %v7019_v8 = vld [vmem:[#allocation10 + $0x10] sm:$0xff]  }
 0x651   : > { %6737 = vmatpush3.msra.mxu1 %v11260_v4  ;;  %6768 = vmatprep.mubr.msk.f32.mxu1 %vm11130_vm8, %v11261_v51  ;;  %v4809_v13 = vmul.f32 0.00390625, %v4808_v41  ;;  %v7021_v4 = vld [vmem:[#allocation10] sm:$0xff]  }
 0x652   : > { %6738 = vmatprep.subr.mxu1 %v11261_v51  ;;  %6776 = vmatpush3.bf16.msra.mxu0 %v7016_v43 }
 0x653   : > { %6739 = vmatpush3.msra.mxu1 %v11262_v49  ;;  %6777 = vmatprep.subr.bf16.mxu0 %v7017_v12 }
 0x654   : > { %6740 = vmatprep.subr.mxu1 %v11261_v51 }
 0x655   : > { %6741 = vmatpush3.msra.mxu1 %v11263_v63 }
 0x656   : > { %6742 = vmatprep.subr.mxu1 %v11261_v51  ;;  %6778 = vmatpush3.bf16.msra.mxu0 %v7017_v12 }
 0x657   : > { %6743 = vmatpush3.msra.mxu1 %v11264_v3  ;;  %6779 = vmatprep.subr.bf16.mxu0 %v7018_v17 }
 0x658   : > { %6744 = vmatprep.subr.mxu1 %v11261_v51 }
 0x659   : > { %6745 = vmatpush3.msra.mxu1 %v11265_v11 }
 0x65a   : > { %6746 = vmatprep.subr.mxu1 %v11261_v51  ;;  %6780 = vmatpush3.bf16.msra.mxu0 %v7018_v17 }
 0x65b   : > { %6747 = vmatpush3.msra.mxu1 %v11266_v53  ;;  %6781 = vmatprep.subr.bf16.mxu0 %v7019_v8 }
 0x65c   : > { %6748 = vmatprep.subr.mxu1 %v11261_v51 }
 0x65d   : > { %6749 = vmatpush3.msra.mxu1 %v11267_v48  ;;  %v11277_v48 = vld [vmem:[#allocation22_spill] sm:$0xff] }
 0x65e   : > { %6750 = vmatprep.subr.mxu1 %v11261_v51  ;;  %6782 = vmatpush3.bf16.msra.mxu0 %v7019_v8 }
 0x65f   : > { %6751 = vmatpush3.msra.mxu1 %v11268_v21  ;;  %6783 = vmatprep.subr.bf16.mxu0 %v7020_v26 }
 0x660   : > { %6752 = vmatprep.subr.mxu1 %v11261_v51 }
 0x661   : > { %6753 = vmatpush3.msra.mxu1 %v11269_v24 }
 0x662   : > { %6754 = vmatprep.subr.mxu1 %v11261_v51  ;;  %6784 = vmatpush3.bf16.msra.mxu0 %v7020_v26 }
 0x663   : > { %6755 = vmatpush3.msra.mxu1 %v11270_v46  ;;  %6785 = vmatprep.subr.bf16.mxu0 %v7021_v4 }
 0x664   : > { %6756 = vmatprep.subr.mxu1 %v11261_v51 }
 0x665   : > { %6757 = vmatpush3.msra.mxu1 %v11271_v22 }
 0x666   : > { %6758 = vmatprep.subr.mxu1 %v11261_v51  ;;  %6786 = vmatpush3.bf16.msra.mxu0 %v7021_v4 }
 0x667   : > { %6759 = vmatpush3.msra.mxu1 %v11272_v33 }
 0x668   : > { %6760 = vmatprep.subr.mxu1 %v11261_v51 }
 0x669   : > { %6761 = vmatpush3.msra.mxu1 %v11273_v9 }
 0x66a   : > { %6762 = vmatprep.subr.mxu1 %v11261_v51 }
 0x66b   : > { %6763 = vmatpush3.msra.mxu1 %v11274_v19 }
 0x66c   : > { %6764 = vmatprep.subr.mxu1 %v11261_v51 }
 0x66d   : > { %6765 = vmatpush3.msra.mxu1 %v11275_v30 }
 0x66e   : > { %6766 = vmatprep.subr.mxu1 %v11261_v51 }
 0x66f   : > { %6767 = vmatpush3.msra.mxu1 %v11276_v61 }
 0x670   : > { %6769 = vmatmul.mubr.f32.vlgmr.msra.gmra.mxu1 %v4809_v13 }
 0x710   : > { %v4876_v51 = vpop.f32.mrf.mxu1 }
 0x711   : > { %v4950_v49 = vmul.f32 %v4876_v51, %v4876_v51  ;;  %v10524_v16 = vrot.slane %v4876_v51, %v11277_v48 }
 0x712   : > { %v6735_v2 = vpop.f32.mrf.mxu1 }
 0x713   : > { %v4957_v24 = vsub.f32 %v10244_v35, %v10524_v16  ;;  %v4958_v56 = vsub.f32 %v10252_v5, %v10524_v16  ;;  %v4959_v46 = vsub.f32 %v10267_v40, %v10524_v16  ;;  %v4960_v22 = vsub.f32 %v10284_v14, %v10524_v16 }
 0x714   : > { %v4961_v27 = vsub.f32 %v10261_v18, %v10524_v16  ;;  %v4962_v33 = vsub.f32 %v10279_v52, %v10524_v16  ;;  %v4963_v9 = vsub.f32 %v10302_v47, %v10524_v16  ;;  %v4964_v35 = vsub.f32 %v10318_v62, %v10524_v16  ;;  %v10556_v47 = vld [vmem:[%s10799_s11] ss:$0 sm:$0xff] }
 0x715   : > { %v4965_v5 = vsub.f32 %v10292_v31, %v10524_v16  ;;  %v4966_v40 = vsub.f32 %v10314_v50, %v10524_v16  ;;  %v4967_v30 = vsub.f32 %v10342_v57, %v10524_v16  ;;  %v4968_v13 = vsub.f32 %v10356_v59, %v10524_v16 }
 0x716   : > { %v4969_v61 = vsub.f32 %v10330_v55, %v10524_v16  ;;  %v4970_v44 = vsub.f32 %v10346_v36, %v10524_v16  ;;  %v4971_v20 = vsub.f32 %v10370_v42, %v10524_v16  ;;  %v10581_v55 = vld [vmem:[%s10800_s12] ss:$0 sm:$0xff]  ;;  %v4972_v2 = vsub.f32 %v10388_v58, %v10524_v16 }
 0x730   : > { %v4946_v63 = vpop.f32.mrf.mxu1 }
 0x731   : > { %v4951_v25 = vsub.f32 %v4946_v63, %v4950_v49  ;;  %v4973_v49 = vsub.f32 %v10366_v37, %v10524_v16 }
 0x732   : > { %v6770_v3 = vpop.f32.mrf.mxu1 }
 0x733   : > { %v4952_v11 = vmax.f32 %v4951_v25, 0.0 }
 0x735   : > { %v4989_v39 = vadd.f32 1e-05, %v4952_v11 }
 0x737   : > { %7026 = vrsqrt.f32 %v4989_v39 }
 0x744   : > { %v7027_v53 = vpop.eup %7026 }
 0x745   : > { %v10527_v21 = vrot.slane %v7027_v53, %v11277_v48 }
 0x747   : > { %v4995_v14 = vmul.f32 %v10527_v21, %v4957_v24  ;;  %v4996_v41 = vmul.f32 %v10527_v21, %v4958_v56  ;;  %v4997_v18 = vmul.f32 %v10527_v21, %v4959_v46  ;;  %v4998_v52 = vmul.f32 %v10527_v21, %v4960_v22 }
 0x748   : > { %v4999_v62 = vmul.f32 %v10527_v21, %v4961_v27  ;;  %v5000_v31 = vmul.f32 %v10527_v21, %v4962_v33  ;;  %v5001_v19 = vmul.f32 %v10527_v21, %v4963_v9  ;;  %v5002_v50 = vmul.f32 %v10527_v21, %v4964_v35 }
 0x749   : > { %v5003_v43 = vmul.f32 %v10527_v21, %v4965_v5  ;;  %v5004_v12 = vmul.f32 %v10527_v21, %v4966_v40  ;;  %v5033_v17 = vmul.f32 %v10556_v47, %v4995_v14  ;;  %v5034_v57 = vmul.f32 %v10556_v47, %v4996_v41 }
 0x74a   : > { %v5035_v8 = vmul.f32 %v10556_v47, %v4997_v18  ;;  %v5036_v59 = vmul.f32 %v10556_v47, %v4998_v52  ;;  %v5037_v36 = vmul.f32 %v10556_v47, %v4999_v62  ;;  %v5038_v26 = vmul.f32 %v10556_v47, %v5000_v31 }
 0x74b   : > { %v5039_v4 = vmul.f32 %v10556_v47, %v5001_v19  ;;  %v5040_v51 = vmul.f32 %v10556_v47, %v5002_v50  ;;  %v5005_v63 = vmul.f32 %v10527_v21, %v4967_v30  ;;  %v5006_v25 = vmul.f32 %v10527_v21, %v4968_v13 }
 0x74c   : > { %v5007_v3 = vmul.f32 %v10527_v21, %v4969_v61  ;;  %v5008_v11 = vmul.f32 %v10527_v21, %v4970_v44  ;;  %v5041_v39 = vmul.f32 %v10556_v47, %v5003_v43  ;;  %v5042_v53 = vmul.f32 %v10556_v47, %v5004_v12 }
 0x74d   : > { %v5073_v48 = vadd.f32 %v10581_v55, %v5035_v8  ;;  %v5074_v24 = vadd.f32 %v10581_v55, %v5036_v59  ;;  %v5071_v58 = vadd.f32 %v10581_v55, %v5033_v17  ;;  %v5072_v37 = vadd.f32 %v10581_v55, %v5034_v57 }
 0x74e   : > { %v5075_v56 = vadd.f32 %v10581_v55, %v5037_v36  ;;  %v5076_v46 = vadd.f32 %v10581_v55, %v5038_v26  ;;  %v5077_v22 = vadd.f32 %v10581_v55, %v5039_v4  ;;  %v5078_v27 = vadd.f32 %v10581_v55, %v5040_v51 }
 0x74f   : > { %vm5105_vm6 = vcmp.ge.f32.partialorder %v5073_v48, 0.0  ;;  %vm5106_vm7 = vcmp.ge.f32.partialorder %v5074_v24, 0.0  ;;  %v5137_v33 = vmul.f32 0.2, %v5073_v48  ;;  %v5138_v9 = vmul.f32 0.2, %v5074_v24 }
 0x750   : > { %vm5103_vm9 = vcmp.ge.f32.partialorder %v5071_v58, 0.0  ;;  %vm5104_vm10 = vcmp.ge.f32.partialorder %v5072_v37, 0.0  ;;  %v5135_v35 = vmul.f32 0.2, %v5071_v58  ;;  %v5136_v5 = vmul.f32 0.2, %v5072_v37 }
 0x751   : > { %v5169_v40 = vsel %vm5105_vm6, %v5073_v48, %v5137_v33  ;;  %v5170_v14 = vsel %vm5106_vm7, %v5074_v24, %v5138_v9  ;;  %vm5107_vm11 = vcmp.ge.f32.partialorder %v5075_v56, 0.0  ;;  %vm5108_vm12 = vcmp.ge.f32.partialorder %v5076_v46, 0.0 }
 0x752   : > { %v5167_v41 = vsel %vm5103_vm9, %v5071_v58, %v5135_v35  ;;  %v5168_v18 = vsel %vm5104_vm10, %v5072_v37, %v5136_v5  ;;  %v5200_v52 = vpack.c.bf16 %v5170_v14, %v5169_v40  ;;  %v5139_v62 = vmul.f32 0.2, %v5075_v56 }
 0x753   : > { %v4974_v31 = vsub.f32 %v10380_v34, %v10524_v16  ;;  %v5043_v19 = vmul.f32 %v10556_v47, %v5005_v63  ;;  %v5199_v50 = vpack.c.bf16 %v5168_v18, %v5167_v41  ;;  %v5140_v30 = vmul.f32 0.2, %v5076_v46 }
 0x754   : > { %v5044_v13 = vmul.f32 %v10556_v47, %v5006_v25  ;;  %v5045_v61 = vmul.f32 %v10556_v47, %v5007_v3  ;;  %v5171_v44 = vsel %vm5107_vm11, %v5075_v56, %v5139_v62  ;;  %v5079_v43 = vadd.f32 %v10581_v55, %v5041_v39 }
 0x755   : > { %6787 = vmatprep.mubr.bf16.mxu0 %v5199_v50  ;;  %v5172_v12 = vsel %vm5108_vm12, %v5076_v46, %v5140_v30  ;;  %v5141_v17 = vmul.f32 0.2, %v5077_v22  ;;  %v5142_v57 = vmul.f32 0.2, %v5078_v27  ;;  %v5080_v8 = vadd.f32 %v10581_v55, %v5042_v53 }
 0x756   : > { %v5046_v59 = vmul.f32 %v10556_v47, %v5008_v11  ;;  %6788 = vmatmul.mubr.bf16.vlgmr.msra.gmra.mxu0 %v5200_v52  ;;  %v5201_v34 = vpack.c.bf16 %v5172_v12, %v5171_v44  ;;  %vm5109_vm13 = vcmp.ge.f32.partialorder %v5077_v22, 0.0  ;;  %vm5110_vm1 = vcmp.ge.f32.partialorder %v5078_v27, 0.0 }
 0x757   : > { %vm5111_vm2 = vcmp.ge.f32.partialorder %v5079_v43, 0.0  ;;  %vm5112_vm3 = vcmp.ge.f32.partialorder %v5080_v8, 0.0  ;;  %v5143_v36 = vmul.f32 0.2, %v5079_v43  ;;  %v5144_v26 = vmul.f32 0.2, %v5080_v8 }
 0x758   : > { %v5009_v4 = vmul.f32 %v10527_v21, %v4971_v20  ;;  %v5010_v51 = vmul.f32 %v10527_v21, %v4972_v2  ;;  %v5011_v63 = vmul.f32 %v10527_v21, %v4973_v49  ;;  %v5012_v25 = vmul.f32 %v10527_v21, %v4974_v31  ;;  %6791 = vmatprep.mubr.bf16.mxu0 %v5201_v34 }
 0x759   : > { %v5173_v3 = vsel %vm5109_vm13, %v5077_v22, %v5141_v17  ;;  %v5174_v11 = vsel %vm5110_vm1, %v5078_v27, %v5142_v57  ;;  %v5081_v39 = vadd.f32 %v10581_v55, %v5043_v19  ;;  %v5082_v53 = vadd.f32 %v10581_v55, %v5044_v13 }
 0x75a   : > { %v5175_v48 = vsel %vm5111_vm2, %v5079_v43, %v5143_v36  ;;  %v5176_v24 = vsel %vm5112_vm3, %v5080_v8, %v5144_v26  ;;  %v5083_v58 = vadd.f32 %v10581_v55, %v5045_v61  ;;  %v5084_v42 = vadd.f32 %v10581_v55, %v5046_v59 }
 0x75b   : > { %v4975_v20 = vsub.f32 %v10401_v60, %v10524_v16  ;;  %v4976_v2 = vsub.f32 %v10416_v0, %v10524_v16  ;;  %v4977_v49 = vsub.f32 %v10393_v29, %v10524_v16  ;;  %v4978_v37 = vsub.f32 %v10409_v38, %v10524_v16 }
 0x75c   : > { %v5047_v56 = vmul.f32 %v10556_v47, %v5009_v4  ;;  %v5048_v46 = vmul.f32 %v10556_v47, %v5010_v51  ;;  %v5049_v22 = vmul.f32 %v10556_v47, %v5011_v63  ;;  %v5202_v27 = vpack.c.bf16 %v5174_v11, %v5173_v3 }
 0x75d   : > { %v5050_v33 = vmul.f32 %v10556_v47, %v5012_v25  ;;  %v5203_v9 = vpack.c.bf16 %v5176_v24, %v5175_v48  ;;  %v5145_v60 = vmul.f32 0.2, %v5081_v39  ;;  %v5146_v35 = vmul.f32 0.2, %v5082_v53 }
 0x75e   : > { %6792 = vmatmul.mubr.bf16.gmra.mxu0 %v5202_v27  ;;  %vm5113_vm4 = vcmp.ge.f32.partialorder %v5081_v39, 0.0  ;;  %vm5114_vm0 = vcmp.ge.f32.partialorder %v5082_v53, 0.0  ;;  %v5147_v0 = vmul.f32 0.2, %v5083_v58  ;;  %v5148_v29 = vmul.f32 0.2, %v5084_v42 }
 0x75f   : > { %6795 = vmatprep.mubr.bf16.mxu0 %v5203_v9  ;;  %vm5115_vm14 = vcmp.ge.f32.partialorder %v5083_v58, 0.0  ;;  %vm5116_vm15 = vcmp.ge.f32.partialorder %v5084_v42, 0.0  ;;  %v5013_v38 = vmul.f32 %v10527_v21, %v4975_v20  ;;  %v5014_v5 = vmul.f32 %v10527_v21, %v4976_v2 }
 0x760   : > { %v5015_v40 = vmul.f32 %v10527_v21, %v4977_v49  ;;  %v5016_v14 = vmul.f32 %v10527_v21, %v4978_v37  ;;  %v5177_v41 = vsel %vm5113_vm4, %v5081_v39, %v5145_v60  ;;  %v5178_v18 = vsel %vm5114_vm0, %v5082_v53, %v5146_v35 }
 0x761   : > { %v5085_v52 = vadd.f32 %v10581_v55, %v5047_v56  ;;  %v5086_v62 = vadd.f32 %v10581_v55, %v5048_v46  ;;  %v5179_v31 = vsel %vm5115_vm14, %v5083_v58, %v5147_v0  ;;  %v5180_v19 = vsel %vm5116_vm15, %v5084_v42, %v5148_v29 }
 0x762   : > { %v5087_v50 = vadd.f32 %v10581_v55, %v5049_v22  ;;  %v5088_v30 = vadd.f32 %v10581_v55, %v5050_v33  ;;  %v4979_v13 = vsub.f32 %v10430_v23, %v10524_v16  ;;  %v4980_v61 = vsub.f32 %v10444_v28, %v10524_v16 }
 0x763   : > { %v4981_v44 = vsub.f32 %v10425_v15, %v10524_v16  ;;  %v4982_v43 = vsub.f32 %v10437_v32, %v10524_v16  ;;  %v5051_v12 = vmul.f32 %v10556_v47, %v5013_v38  ;;  %v5052_v17 = vmul.f32 %v10556_v47, %v5014_v5 }
 0x764   : > { %v5053_v57 = vmul.f32 %v10556_v47, %v5015_v40  ;;  %v5204_v8 = vpack.c.bf16 %v5178_v18, %v5177_v41  ;;  %v5054_v59 = vmul.f32 %v10556_v47, %v5016_v14  ;;  %v5205_v34 = vpack.c.bf16 %v5180_v19, %v5179_v31 }
 0x765   : > { %v5149_v23 = vmul.f32 0.2, %v5085_v52  ;;  %v5150_v36 = vmul.f32 0.2, %v5086_v62  ;;  %vm5117_vm5 = vcmp.ge.f32.partialorder %v5085_v52, 0.0  ;;  %vm5118_vm8 = vcmp.ge.f32.partialorder %v5086_v62, 0.0 }
 0x766   : > { %6796 = vmatmul.mubr.bf16.gmra.mxu0 %v5204_v8  ;;  %v5151_v28 = vmul.f32 0.2, %v5087_v50  ;;  %v5152_v15 = vmul.f32 0.2, %v5088_v30  ;;  %vm5119_vm6 = vcmp.ge.f32.partialorder %v5087_v50, 0.0  ;;  %vm5120_vm7 = vcmp.ge.f32.partialorder %v5088_v30, 0.0 }
 0x767   : > { %6799 = vmatprep.mubr.bf16.mxu0 %v5205_v34  ;;  %v5017_v32 = vmul.f32 %v10527_v21, %v4979_v13  ;;  %v5018_v26 = vmul.f32 %v10527_v21, %v4980_v61  ;;  %v5019_v4 = vmul.f32 %v10527_v21, %v4981_v44  ;;  %v5020_v51 = vmul.f32 %v10527_v21, %v4982_v43 }
 0x768   : > { %v5181_v63 = vsel %vm5117_vm5, %v5085_v52, %v5149_v23  ;;  %v5182_v25 = vsel %vm5118_vm8, %v5086_v62, %v5150_v36  ;;  %v5089_v3 = vadd.f32 %v10581_v55, %v5051_v12  ;;  %v5090_v11 = vadd.f32 %v10581_v55, %v5052_v17 }
 0x769   : > { %v5183_v39 = vsel %vm5119_vm6, %v5087_v50, %v5151_v28  ;;  %v5184_v53 = vsel %vm5120_vm7, %v5088_v30, %v5152_v15  ;;  %v5091_v48 = vadd.f32 %v10581_v55, %v5053_v57  ;;  %v5092_v24 = vadd.f32 %v10581_v55, %v5054_v59 }
 0x76a   : > { %v4983_v58 = vsub.f32 %v10458_v6, %v10524_v16  ;;  %v4984_v42 = vsub.f32 %v10468_v1, %v10524_v16  ;;  %v4985_v20 = vsub.f32 %v10453_v7, %v10524_v16  ;;  %v4986_v2 = vsub.f32 %v10462_v10, %v10524_v16 }
 0x76b   : > { %v5055_v49 = vmul.f32 %v10556_v47, %v5017_v32  ;;  %v5056_v37 = vmul.f32 %v10556_v47, %v5018_v26  ;;  %v5057_v56 = vmul.f32 %v10556_v47, %v5019_v4  ;;  %v5206_v46 = vpack.c.bf16 %v5182_v25, %v5181_v63 }
 0x76c   : > { %v5058_v22 = vmul.f32 %v10556_v47, %v5020_v51  ;;  %v5207_v27 = vpack.c.bf16 %v5184_v53, %v5183_v39  ;;  %v5153_v6 = vmul.f32 0.2, %v5089_v3  ;;  %v5154_v33 = vmul.f32 0.2, %v5090_v11 }
 0x76d   : > { %vm5121_vm9 = vcmp.ge.f32.partialorder %v5089_v3, 0.0  ;;  %vm5122_vm10 = vcmp.ge.f32.partialorder %v5090_v11, 0.0  ;;  %v5155_v1 = vmul.f32 0.2, %v5091_v48  ;;  %v5156_v7 = vmul.f32 0.2, %v5092_v24 }
 0x76e   : > { %6800 = vmatmul.mubr.bf16.gmra.mxu0 %v5206_v46  ;;  %vm5123_vm11 = vcmp.ge.f32.partialorder %v5091_v48, 0.0  ;;  %vm5124_vm12 = vcmp.ge.f32.partialorder %v5092_v24, 0.0  ;;  %v5021_v10 = vmul.f32 %v10527_v21, %v4983_v58  ;;  %v5022_v9 = vmul.f32 %v10527_v21, %v4984_v42 }
 0x76f   : > { %6803 = vmatprep.mubr.bf16.mxu0 %v5207_v27  ;;  %v5023_v60 = vmul.f32 %v10527_v21, %v4985_v20  ;;  %v5024_v35 = vmul.f32 %v10527_v21, %v4986_v2  ;;  %v5185_v0 = vsel %vm5121_vm9, %v5089_v3, %v5153_v6  ;;  %v5186_v29 = vsel %vm5122_vm10, %v5090_v11, %v5154_v33 }
 0x770   : > { %v5093_v38 = vadd.f32 %v10581_v55, %v5055_v49  ;;  %v5094_v5 = vadd.f32 %v10581_v55, %v5056_v37  ;;  %v5187_v40 = vsel %vm5123_vm11, %v5091_v48, %v5155_v1  ;;  %v5188_v14 = vsel %vm5124_vm12, %v5092_v24, %v5156_v7 }
 0x771   : > { %v5095_v41 = vadd.f32 %v10581_v55, %v5057_v56  ;;  %v5096_v18 = vadd.f32 %v10581_v55, %v5058_v22  ;;  %v4987_v52 = vsub.f32 %v11258_v45, %v10524_v16  ;;  %v4988_v62 = vsub.f32 %v11259_v54, %v10524_v16 }
 0x772   : > { %v5059_v31 = vmul.f32 %v10556_v47, %v5021_v10  ;;  %v5060_v19 = vmul.f32 %v10556_v47, %v5022_v9  ;;  %v5061_v50 = vmul.f32 %v10556_v47, %v5023_v60  ;;  %v5208_v30 = vpack.c.bf16 %v5186_v29, %v5185_v0 }
 0x773   : > { %v5062_v13 = vmul.f32 %v10556_v47, %v5024_v35  ;;  %v5209_v61 = vpack.c.bf16 %v5188_v14, %v5187_v40  ;;  %v5157_v44 = vmul.f32 0.2, %v5093_v38  ;;  %v5158_v43 = vmul.f32 0.2, %v5094_v5 }
 0x774   : > { %vm5125_vm13 = vcmp.ge.f32.partialorder %v5093_v38, 0.0  ;;  %vm5126_vm1 = vcmp.ge.f32.partialorder %v5094_v5, 0.0  ;;  %v5159_v12 = vmul.f32 0.2, %v5095_v41  ;;  %v5160_v45 = vmul.f32 0.2, %v5096_v18 }
 0x775   : > { %vm5127_vm2 = vcmp.ge.f32.partialorder %v5095_v41, 0.0  ;;  %vm5128_vm3 = vcmp.ge.f32.partialorder %v5096_v18, 0.0  ;;  %v5025_v54 = vmul.f32 %v10527_v21, %v4987_v52  ;;  %v5026_v16 = vmul.f32 %v10527_v21, %v4988_v62 }
 0x776   : > { %6804 = vmatmul.mubr.bf16.gmra.mxu0 %v5208_v30  ;;  %v5189_v17 = vsel %vm5125_vm13, %v5093_v38, %v5157_v44  ;;  %v5190_v57 = vsel %vm5126_vm1, %v5094_v5, %v5158_v43  ;;  %v5097_v8 = vadd.f32 %v10581_v55, %v5059_v31  ;;  %v5098_v59 = vadd.f32 %v10581_v55, %v5060_v19 }
 0x777   : > { %6807 = vmatprep.mubr.bf16.mxu0 %v5209_v61  ;;  %v5191_v34 = vsel %vm5127_vm2, %v5095_v41, %v5159_v12  ;;  %v5192_v23 = vsel %vm5128_vm3, %v5096_v18, %v5160_v45  ;;  %v5099_v36 = vadd.f32 %v10581_v55, %v5061_v50  ;;  %v5100_v28 = vadd.f32 %v10581_v55, %v5062_v13 }
 0x778   : > { %v5063_v15 = vmul.f32 %v10556_v47, %v5025_v54  ;;  %v5210_v32 = vpack.c.bf16 %v5190_v57, %v5189_v17  ;;  %v5064_v26 = vmul.f32 %v10556_v47, %v5026_v16  ;;  %v5211_v4 = vpack.c.bf16 %v5192_v23, %v5191_v34 }
 0x779   : > { %v5161_v51 = vmul.f32 0.2, %v5097_v8  ;;  %v5162_v21 = vmul.f32 0.2, %v5098_v59  ;;  %vm5129_vm4 = vcmp.ge.f32.partialorder %v5097_v8, 0.0  ;;  %vm5130_vm0 = vcmp.ge.f32.partialorder %v5098_v59, 0.0 }
 0x77a   : > { %v5163_v63 = vmul.f32 0.2, %v5099_v36  ;;  %v5164_v25 = vmul.f32 0.2, %v5100_v28  ;;  %vm5131_vm14 = vcmp.ge.f32.partialorder %v5099_v36, 0.0  ;;  %vm5132_vm15 = vcmp.ge.f32.partialorder %v5100_v28, 0.0 }
 0x77b   : > { %v5193_v3 = vsel %vm5129_vm4, %v5097_v8, %v5161_v51  ;;  %v5194_v11 = vsel %vm5130_vm0, %v5098_v59, %v5162_v21  ;;  %v5101_v39 = vadd.f32 %v10581_v55, %v5063_v15  ;;  %v5102_v53 = vadd.f32 %v10581_v55, %v5064_v26 }
 0x77c   : > { %v5195_v48 = vsel %vm5131_vm14, %v5099_v36, %v5163_v63  ;;  %v5196_v47 = vsel %vm5132_vm15, %v5100_v28, %v5164_v25  ;;  %v5212_v24 = vpack.c.bf16 %v5194_v11, %v5193_v3 }
 0x77d   : > { %v5213_v58 = vpack.c.bf16 %v5196_v47, %v5195_v48  ;;  %v5165_v42 = vmul.f32 0.2, %v5101_v39  ;;  %v5166_v20 = vmul.f32 0.2, %v5102_v53  ;;  %vm5133_vm5 = vcmp.ge.f32.partialorder %v5101_v39, 0.0 }
 0x77e   : > { %6808 = vmatmul.mubr.bf16.gmra.mxu0 %v5210_v32  ;;  %vm5134_vm8 = vcmp.ge.f32.partialorder %v5102_v53, 0.0 }
 0x77f   : > { %6811 = vmatprep.mubr.bf16.mxu0 %v5211_v4  ;;  %v5197_v2 = vsel %vm5133_vm5, %v5101_v39, %v5165_v42  ;;  %v5198_v49 = vsel %vm5134_vm8, %v5102_v53, %v5166_v20 }
 0x780   : > { %v5214_v37 = vpack.c.bf16 %v5198_v49, %v5197_v2 }
 0x786   : > { %6812 = vmatmul.mubr.bf16.gmra.mxu0 %v5212_v24 }
 0x787   : > { %6815 = vmatprep.mubr.bf16.mxu0 %v5213_v58 }
 0x78e   : > { %6816 = vmatmul.mubr.bf16.gmra.mxu0 %v5214_v37 }
 0x816   : > { %v6789_v56 = vpop.f32.mrf.mxu0 }
 0x817   : > { %5442 = vst [vmem:[%s10704_s27 + $0x10] sm:$0xff] %v6789_v56 }
 0x818   : > { %v5313_v55 = vpop.f32.mrf.mxu0 }
 0x819   : > { %5440 = vst [vmem:[%s10704_s27] sm:$0xff] %v5313_v55 }
 0x81a   : > { %v6790_v46 = vpop.f32.mrf.mxu0 }
 0x81b   : > { %5443 = vst [vmem:[%s10704_s27 + $0x18] sm:$0xff] %v6790_v46 }
 0x81c   : > { %v5316_v22 = vpop.f32.mrf.mxu0 }
 0x81d   : > { %5441 = vst [vmem:[%s10704_s27 + $0x8] sm:$0xff] %v5316_v22 }
 0x81e   : > { %v6793_v27 = vpop.f32.mrf.mxu0 }
 0x81f   : > { %5446 = vst [vmem:[%s10704_s27 + $0x30] sm:$0xff] %v6793_v27 }
 0x820   : > { %v5329_v6 = vpop.f32.mrf.mxu0 }
 0x821   : > { %5444 = vst [vmem:[%s10704_s27 + $0x20] sm:$0xff] %v5329_v6 }
 0x822   : > { %v6794_v33 = vpop.f32.mrf.mxu0 }
 0x823   : > { %5447 = vst [vmem:[%s10704_s27 + $0x38] sm:$0xff] %v6794_v33 }
 0x824   : > { %v5332_v1 = vpop.f32.mrf.mxu0 }
 0x825   : > { %5445 = vst [vmem:[%s10704_s27 + $0x28] sm:$0xff] %v5332_v1 }
 0x826   : > { %v6797_v7 = vpop.f32.mrf.mxu0 }
 0x827   : > { %5450 = vst [vmem:[%s10704_s27 + $0x50] sm:$0xff] %v6797_v7 }
 0x828   : > { %v5345_v10 = vpop.f32.mrf.mxu0 }
 0x829   : > { %5448 = vst [vmem:[%s10704_s27 + $0x40] sm:$0xff] %v5345_v10 }
 0x82a   : > { %v6798_v9 = vpop.f32.mrf.mxu0 }
 0x82b   : > { %5451 = vst [vmem:[%s10704_s27 + $0x58] sm:$0xff] %v6798_v9 }
 0x82c   : > { %v5348_v60 = vpop.f32.mrf.mxu0 }
 0x82d   : > { %5449 = vst [vmem:[%s10704_s27 + $0x48] sm:$0xff] %v5348_v60 }
 0x82e   : > { %v6801_v35 = vpop.f32.mrf.mxu0 }
 0x82f   : > { %5454 = vst [vmem:[%s10704_s27 + $0x70] sm:$0xff] %v6801_v35 }
 0x830   : > { %v5361_v0 = vpop.f32.mrf.mxu0 }
 0x831   : > { %5452 = vst [vmem:[%s10704_s27 + $0x60] sm:$0xff] %v5361_v0 }
 0x832   : > { %v6802_v29 = vpop.f32.mrf.mxu0 }
 0x833   : > { %5455 = vst [vmem:[%s10704_s27 + $0x78] sm:$0xff] %v6802_v29 }
 0x834   : > { %v5364_v38 = vpop.f32.mrf.mxu0 }
 0x835   : > { %5453 = vst [vmem:[%s10704_s27 + $0x68] sm:$0xff] %v5364_v38 }
 0x836   : > { %v6805_v5 = vpop.f32.mrf.mxu0 }
 0x837   : > { %5458 = vst [vmem:[%s10704_s27 + $0x90] sm:$0xff] %v6805_v5 }
 0x838   : > { %v5377_v40 = vpop.f32.mrf.mxu0 }
 0x839   : > { %5456 = vst [vmem:[%s10704_s27 + $0x80] sm:$0xff] %v5377_v40 }
 0x83a   : > { %v6806_v14 = vpop.f32.mrf.mxu0 }
 0x83b   : > { %5459 = vst [vmem:[%s10704_s27 + $0x98] sm:$0xff] %v6806_v14 }
 0x83c   : > { %v5380_v41 = vpop.f32.mrf.mxu0 }
 0x83d   : > { %5457 = vst [vmem:[%s10704_s27 + $0x88] sm:$0xff] %v5380_v41 }
 0x83e   : > { %v6809_v18 = vpop.f32.mrf.mxu0 }
 0x83f   : > { %5462 = vst [vmem:[%s10704_s27 + $0xb0] sm:$0xff] %v6809_v18 }
 0x840   : > { %v5393_v52 = vpop.f32.mrf.mxu0 }
 0x841   : > { %5460 = vst [vmem:[%s10704_s27 + $0xa0] sm:$0xff] %v5393_v52 }
 0x842   : > { %v6810_v62 = vpop.f32.mrf.mxu0 }
 0x843   : > { %5463 = vst [vmem:[%s10704_s27 + $0xb8] sm:$0xff] %v6810_v62 }
 0x844   : > { %v5396_v31 = vpop.f32.mrf.mxu0 }
 0x845   : > { %5461 = vst [vmem:[%s10704_s27 + $0xa8] sm:$0xff] %v5396_v31 }
 0x846   : > { %v6813_v19 = vpop.f32.mrf.mxu0 }
 0x847   : > { %5466 = vst [vmem:[%s10704_s27 + $0xd0] sm:$0xff] %v6813_v19 }
 0x848   : > { %v5409_v50 = vpop.f32.mrf.mxu0 }
 0x849   : > { %5464 = vst [vmem:[%s10704_s27 + $0xc0] sm:$0xff] %v5409_v50 }
 0x84a   : > { %v6814_v30 = vpop.f32.mrf.mxu0 }
 0x84b   : > { %5467 = vst [vmem:[%s10704_s27 + $0xd8] sm:$0xff] %v6814_v30 }
 0x84c   : > { %v5412_v13 = vpop.f32.mrf.mxu0 }
 0x84d   : > { %5465 = vst [vmem:[%s10704_s27 + $0xc8] sm:$0xff] %v5412_v13 }
 0x84e   : > { %v6817_v61 = vpop.f32.mrf.mxu0 }
 0x84f   : > { %5470 = vst [vmem:[%s10704_s27 + $0xf0] sm:$0xff] %v6817_v61 }
 0x850   : > { %v5425_v44 = vpop.f32.mrf.mxu0 }
 0x851   : > { %5468 = vst [vmem:[%s10704_s27 + $0xe0] sm:$0xff] %v5425_v44 }
 0x852   : > { %v6818_v43 = vpop.f32.mrf.mxu0 }
 0x853   : > { %5471 = vst [vmem:[%s10704_s27 + $0xf8] sm:$0xff] %v6818_v43 }
 0x854   : > { %v5428_v12 = vpop.f32.mrf.mxu0 }
 0x855   : > { %5469 = vst [vmem:[%s10704_s27 + $0xe8] sm:$0xff] %v5428_v12 }
 0x856   : > { %7173 = shalt.err (!%p7170_p3)
}
 0x857   : > { %s7174_s9 = scalar_lea.hbm %s10741_s21, 4096  ;;  %s7178_s26 = scalar_lea.hbm %s10802_s14, 8192 }
 0x858   : > { %p7175_p6 = scmp.ne.s32.totalorder %s10741_s21, %s7174_s9  ;;  %p7179_p13 = scmp.lt.s32.totalorder %s10741_s21, %s10802_s14 }
 0x859   : > { %p7180_p11 = scmp.lt.s32.totalorder %s7178_s26, %s7174_s9 }
 0x85a   : > { %p7176_p4 = pnand %p7175_p6, %p11278_p2 }
 0x85b   : > { %p7181_p5 = por %p7180_p11, %p7179_p13 }
 0x85c   : > { %p7177_p8 = pneg %p7176_p4 }
 0x85e   : > { %p7182_p1 = pnand %p7181_p5, %p7177_p8 }
 0x860   : > { %7185 = shalt.err (!%p7182_p1)
}
 0x861   : > { %s7248_s29 = smov 128   ;;  %s7249_s19 = smov 8  }
 0x862   : > { %6837 = dma.vmem_to_hbm [thread:$0]  (%p11278_p2), %s10743_s10, 4096, %s10741_s21, %s5473_s18, %s7248_s29, %s7248_s29, %s7249_s19  }
 0x863 PF: > { %s11279_s23 = sld [smem:[#allocation16_spill]]  ;;  %p11282_p7 = scmp.ge.s32.totalorder %s7232_s16, 2 }
 0x864   : > { %s11280_s17 = sld [smem:[#allocation18_spill]] }
 0x869   : > { %s5501_s24 = sand.u32 1, %s11279_s23  }
 0x86a   : > { %p11281_p12 = scmp.ne.s32.totalorder %s11280_s17, 0  ;;  %s5502_s22 = scalar_lea.sflag [#allocation4], %s5501_s24 }
 0x86c   : > { %p6857_p9 = pnand %p11282_p7, %p11281_p12 }
 0x86e   : > { %p6858_p0 = pneg %p6857_p9 }
 0x870   : > { %7215 = dma.done.wait (%p6858_p0), %s5502_s22, 4096  }
 0x871   : > { %7217 = vsyncadd (%p6858_p0), %s5502_s22, 4294963200  ;;  %s11283_s9 = sld [smem:[#allocation17_spill]]  ;;  %p29_p10 = scmp.ge.s32.totalorder %s7425_s28, 4  }
 0x872   : > { %s11284_s15 = sld [smem:[#allocation19_spill]]  ;;  %s11285_s29 = smov %s7224_s30 }
 0x873   : > { %s11287_s16 = smov %s7425_s28  ;;  %31 = sbr.rel (!%p29_p10) target bundleno = 12 (0xc), region = 145 }
 0x877   : > { %s11286_s30 = smov %s11283_s9 }
 0x878   :  { %5507 = vsyncpa [#allocation3], 1 }
 0x879   :  { %5509 = vsyncpa [#allocation3 + $0x1], 1 }
 0x87a   :  { %5510 = vsyncpa [#allocation6], 1 }
 0x87b   :  { %5511 = vsyncpa [#allocation9], 1 }
 0x87c   :  { %5512 = vsyncpa [#allocation4], 1 }
 0x87d   :  { %5514 = vsyncpa [#allocation4 + $0x1], 1 }

</bundles_post_ra>
